<compile_context>
chip_gen: v6e
topology: v6e:2x2x1
jax: 0.10.0
libtpu: 0.0.40
codegen_flags: <defaults>
</compile_context>

<pallas_src>
import functools

import jax
import jax.numpy as jnp
from jax import lax
from jax.experimental import pallas as pl
from jax.experimental.pallas import tpu as pltpu

_LANE = 128  # pad channels to multiples of the TPU lane width


def _round_up(x, m):
    return ((x + m - 1) // m) * m


def _conv_stats_kernel(x0_ref, x1_ref, x2_ref, w_ref, conv_ref, stats_ref, acc_ref, *, H, W):
    """Conv3d (k=3, p=1) for one (sample, depth-plane) block + per-plane norm statistics.

    x{0,1,2}_ref : (1, 1, H+2, W+2, Cinp)  three depth taps (d, d+1, d+2) of the padded input
    w_ref        : (3, 3, 3*Cinp, Coutp)   weights with the kw tap folded into the contraction
    conv_ref     : (1, 1, H, W, Coutp)     un-normalized conv output (f32 intermediate)
    stats_ref    : (1, 1, 2, Coutp)        per-plane [sum, sum-of-squares] over H*W per channel
    acc_ref      : (H*W, Coutp) f32        VMEM scratch accumulator
    """
    Coutp = w_ref.shape[-1]
    Cinp3 = w_ref.shape[-2]  # = 3 * Cinp

    acc_ref[...] = jnp.zeros_like(acc_ref)

    x_refs = (x0_ref, x1_ref, x2_ref)
    for kd in range(3):
        for kh in range(3):
            band = x_refs[kd][0, 0, kh:kh + H]  # (H, W+2, Cinp)
            # Fold the kw tap into the contraction dim: (H*W, 3*Cinp) @ (3*Cinp, Coutp).
            lhs = jnp.concatenate(
                [band[:, 0:W, :], band[:, 1:W + 1, :], band[:, 2:W + 2, :]], axis=-1
            ).reshape(H * W, Cinp3)
            acc_ref[...] += jnp.dot(lhs, w_ref[kd, kh],
                                    preferred_element_type=jnp.float32)

    acc = acc_ref[...]                                   # (H*W, Coutp) f32
    conv_ref[0, 0] = acc.reshape(H, W, Coutp).astype(conv_ref.dtype)
    s = jnp.sum(acc, axis=0, keepdims=True)              # (1, Coutp)
    ss = jnp.sum(acc * acc, axis=0, keepdims=True)       # (1, Coutp)
    stats_ref[0, 0] = jnp.concatenate([s, ss], axis=0)


def _norm_act_kernel(y_ref, ab_ref, o_ref, *, slope):
    """Apply per-(sample, channel) normalization + LeakyReLU to one depth plane."""
    Coutp = y_ref.shape[-1]
    y = y_ref[0, 0]                                      # (H, W, Coutp) f32
    a = ab_ref[0, 0:1, :].reshape(1, 1, Coutp)           # rsqrt(var + eps)
    b = ab_ref[0, 1:2, :].reshape(1, 1, Coutp)           # -mean * rsqrt(var + eps)
    z = y * a + b
    z = jnp.where(z >= 0, z, slope * z)
    o_ref[0, 0] = z.astype(o_ref.dtype)


def conv_block_forward(x_ncdhw, weight, bias=None, *, eps=1e-5, slope=0.01,
                       compute_dtype=jnp.bfloat16):
    """ConvBlock forward: Conv3d(k=3,p=1) -> Dropout3d(eval) -> InstanceNorm3d -> LeakyReLU.

    x_ncdhw: (N, Cin, D, H, W); weight: (Cout, Cin, 3, 3, 3); bias: (Cout,) accepted for
    interface parity but unused (InstanceNorm cancels a per-channel bias exactly).
    """
    del bias
    N, Cin, D, H, W = x_ncdhw.shape
    Cout = weight.shape[0]
    Cinp = _round_up(Cin, _LANE)
    Coutp = _round_up(Cout, _LANE)
    out_dtype = x_ncdhw.dtype

    # Layout glue (would disappear in an end-to-end channels-last NDHWC pipeline):
    # NCDHW -> NDHWC, spatial zero pad (padding=1), channel pad to lane width, cast for MXU.
    x = jnp.transpose(x_ncdhw, (0, 2, 3, 4, 1))
    xp = jnp.pad(x, ((0, 0), (1, 1), (1, 1), (1, 1), (0, Cinp - Cin))).astype(compute_dtype)

    # OIDHW -> (kd, kh, kw, Cin, Cout), pad channels, fold kw into the contraction dim.
    w = jnp.transpose(weight, (2, 3, 4, 1, 0))
    w = jnp.pad(w, ((0, 0), (0, 0), (0, 0), (0, Cinp - Cin), (0, Coutp - Cout)))
    w = w.reshape(3, 3, 3 * Cinp, Coutp).astype(compute_dtype)

    itemsize = jnp.dtype(compute_dtype).itemsize
    plane_in_bytes = (H + 2) * (W + 2) * Cinp * itemsize
    plane_out_bytes = H * W * Coutp * 4
    w_bytes = 3 * 3 * 3 * Cinp * Coutp * itemsize
    acc_bytes = H * W * Coutp * 4
    stats_bytes = 2 * Coutp * 4
    need1 = 2 * (3 * plane_in_bytes + w_bytes + plane_out_bytes + stats_bytes) + acc_bytes
    vmem1 = int(min(max(2 * need1, 32 * 1024 * 1024), 64 * 1024 * 1024))

    kernel1 = functools.partial(_conv_stats_kernel, H=H, W=W)
    conv_f32, stats = pl.pallas_call(
        kernel1,
        out_shape=(
            jax.ShapeDtypeStruct((N, D, H, W, Coutp), jnp.float32),
            jax.ShapeDtypeStruct((N, D, 2, Coutp), jnp.float32),
        ),
        grid_spec=pltpu.PrefetchScalarGridSpec(
            num_scalar_prefetch=0,
            grid=(N, D),
            in_specs=[
                # The same padded input passed three times with D-shifted index maps:
                # output plane d consumes input planes d, d+1, d+2 (padding=1 halo).
                pl.BlockSpec((1, 1, H + 2, W + 2, Cinp),
                             lambda n, d, kd=kd: (n, d + kd, 0, 0, 0))
                for kd in range(3)
            ] + [
                pl.BlockSpec((3, 3, 3 * Cinp, Coutp), lambda n, d: (0, 0, 0, 0)),
            ],
            out_specs=(
                pl.BlockSpec((1, 1, H, W, Coutp), lambda n, d: (n, d, 0, 0, 0)),
                pl.BlockSpec((1, 1, 2, Coutp), lambda n, d: (n, d, 0, 0)),
            ),
            scratch_shapes=[pltpu.VMEM((H * W, Coutp), jnp.float32)],
        ),
        compiler_params=pltpu.CompilerParams(
            dimension_semantics=("parallel", "parallel"),
            vmem_limit_bytes=vmem1,
        ),
        cost_estimate=pl.CostEstimate(
            flops=2 * N * D * H * W * 27 * Cinp * Coutp,
            transcendentals=0,
            bytes_accessed=3 * xp.size * itemsize + w.size * itemsize
            + N * D * H * W * Coutp * 4 + N * D * 2 * Coutp * 4,
        ),
    )(xp, xp, xp, w)

    # Tiny per-(sample, channel) reduction of the partial stats (exact InstanceNorm stats
    # over the full D*H*W despite spatial tiling).
    cnt = float(D * H * W)
    s = stats[:, :, 0, :].sum(axis=1)                    # (N, Coutp)
    ss = stats[:, :, 1, :].sum(axis=1)                   # (N, Coutp)
    mean = s / cnt
    var = ss / cnt - mean * mean                         # biased variance (InstanceNorm)
    a = lax.rsqrt(var + eps)
    ab = jnp.stack([a, -mean * a], axis=1)               # (N, 2, Coutp) f32

    need2 = 2 * (2 * plane_out_bytes + 2 * Coutp * 4)
    vmem2 = int(min(max(2 * need2, 32 * 1024 * 1024), 64 * 1024 * 1024))
    kernel2 = functools.partial(_norm_act_kernel, slope=slope)
    out = pl.pallas_call(
        kernel2,
        out_shape=jax.ShapeDtypeStruct((N, D, H, W, Coutp), out_dtype),
        grid_spec=pltpu.PrefetchScalarGridSpec(
            num_scalar_prefetch=0,
            grid=(N, D),
            in_specs=[
                pl.BlockSpec((1, 1, H, W, Coutp), lambda n, d: (n, d, 0, 0, 0)),
                pl.BlockSpec((1, 2, Coutp), lambda n, d: (n, 0, 0)),
            ],
            out_specs=pl.BlockSpec((1, 1, H, W, Coutp), lambda n, d: (n, d, 0, 0, 0)),
        ),
        compiler_params=pltpu.CompilerParams(
            dimension_semantics=("parallel", "parallel"),
            vmem_limit_bytes=vmem2,
        ),
        cost_estimate=pl.CostEstimate(
            flops=3 * N * D * H * W * Coutp,
            transcendentals=0,
            bytes_accessed=2 * N * D * H * W * Coutp * 4 + N * 2 * Coutp * 4,
        ),
    )(conv_f32, ab)

    out = out[..., :Cout]                                # drop lane-padding channels
    return jnp.transpose(out, (0, 4, 1, 2, 3))           # NDHWC -> NCDHW


def conv_block_reference(x, w, b, eps=1e-5, slope=0.01):
    """Pure-JAX reference matching the PyTorch eval-mode ConvBlock forward (with bias)."""
    y = lax.conv_general_dilated(
        x, w, window_strides=(1, 1, 1),
        padding=((1, 1), (1, 1), (1, 1)),
        dimension_numbers=("NCDHW", "OIDHW", "NCDHW"),
    )
    y = y + b[None, :, None, None, None]
    mean = jnp.mean(y, axis=(2, 3, 4), keepdims=True)
    var = jnp.var(y, axis=(2, 3, 4), keepdims=True)
    y = (y - mean) / jnp.sqrt(var + eps)
    return jnp.where(y >= 0, y, slope * y)


if __name__ == "__main__":
    key = jax.random.PRNGKey(0)
    k_x, k_w, k_b = jax.random.split(key, 3)

    N, Cin, Cout = 2, 4, 8
    D = H = W = 8

    x = jax.random.normal(k_x, (N, Cin, D, H, W), dtype=jnp.float32)
    weight = 0.1 * jax.random.normal(k_w, (Cout, Cin, 3, 3, 3), dtype=jnp.float32)
    bias = 0.1 * jax.random.normal(k_b, (Cout,), dtype=jnp.float32)

    ref = conv_block_reference(x, weight, bias)

    # f32 MXU path: tight check vs the XLA reference (also proves the bias cancellation).
    out_f32 = jax.block_until_ready(
        conv_block_forward(x, weight, bias, compute_dtype=jnp.float32))
    assert out_f32.shape == (N, Cout, D, H, W), out_f32.shape
    assert jnp.allclose(out_f32, ref, rtol=1e-3, atol=1e-3), \
        float(jnp.max(jnp.abs(out_f32 - ref)))

    # bf16 MXU path (the performance default: half the HBM/DMA traffic, native MXU dtype).
    out_bf16 = jax.block_until_ready(conv_block_forward(x, weight, bias))
    assert out_bf16.shape == (N, Cout, D, H, W), out_bf16.shape
    assert jnp.allclose(out_bf16, ref, rtol=5e-2, atol=5e-2), \
        float(jnp.max(jnp.abs(out_bf16 - ref)))

    print("KERNEL_OK")
</pallas_src>

<mosaic_0001>
module attributes {stable_mosaic.version = 11 : i64} {
  func.func @_conv_stats_kernel(%arg0: i32, %arg1: i32, %arg2: memref<1x1x10x10x128xf32, #tpu.memory_space<vmem>>, %arg3: memref<1x1x10x10x128xf32, #tpu.memory_space<vmem>>, %arg4: memref<1x1x10x10x128xf32, #tpu.memory_space<vmem>>, %arg5: memref<3x3x384x128xf32, #tpu.memory_space<vmem>>, %arg6: memref<1x1x8x8x128xf32, #tpu.memory_space<vmem>>, %arg7: memref<1x1x2x128xf32, #tpu.memory_space<vmem>>, %arg8: memref<64x128xf32, #tpu.memory_space<vmem>>) attributes {dimension_semantics = [#tpu.dimension_semantics<parallel>, #tpu.dimension_semantics<parallel>], iteration_bounds = array<i64: 2, 8>, scalar_prefetch = 0 : i64, scratch_operands = 1 : i64, tpu.core_type = #tpu.core_type<tc>, window_params = [{transform_indices = @transform_0, window_bounds = array<i64: 1, 1, 10, 10, 128>}, {transform_indices = @transform_1, window_bounds = array<i64: 1, 1, 10, 10, 128>}, {transform_indices = @transform_2, window_bounds = array<i64: 1, 1, 10, 10, 128>}, {pipeline_mode = #tpu.pipeline_mode<synchronous>, transform_indices = @transform_3, window_bounds = array<i64: 3, 3, 384, 128>}, {transform_indices = @transform_4, window_bounds = array<i64: 1, 1, 8, 8, 128>}, {transform_indices = @transform_5, window_bounds = array<i64: 1, 1, 2, 128>}]} {
    %cst = arith.constant 0.000000e+00 : f32
    %0 = vector.broadcast %cst : f32 to vector<64x128xf32>
    %c0 = arith.constant 0 : index
    %c0_0 = arith.constant 0 : index
    %1 = vector.load %arg8[%c0, %c0_0] : memref<64x128xf32, #tpu.memory_space<vmem>>, vector<64x128xf32>
    tpu.vector_store %arg8[%c0, %c0_0], %0 {strides = array<i32>} : memref<64x128xf32, #tpu.memory_space<vmem>>, vector<64x128xf32>,
    %c0_1 = arith.constant 0 : index
    %c0_2 = arith.constant 0 : index
    %c0_3 = arith.constant 0 : index
    %c0_4 = arith.constant 0 : index
    %c0_5 = arith.constant 0 : index
    %2 = vector.load %arg2[%c0_1, %c0_2, %c0_3, %c0_4, %c0_5] : memref<1x1x10x10x128xf32, #tpu.memory_space<vmem>>, vector<1x1x8x10x128xf32>
    %3 = vector.shape_cast %2 : vector<1x1x8x10x128xf32> to vector<8x10x128xf32>
    %4 = vector.extract_strided_slice %3 {offsets = [0, 0, 0], sizes = [8, 8, 128], strides = [1, 1, 1]} : vector<8x10x128xf32> to vector<8x8x128xf32>
    %5 = vector.extract_strided_slice %3 {offsets = [0, 1, 0], sizes = [8, 8, 128], strides = [1, 1, 1]} : vector<8x10x128xf32> to vector<8x8x128xf32>
    %6 = vector.extract_strided_slice %3 {offsets = [0, 2, 0], sizes = [8, 8, 128], strides = [1, 1, 1]} : vector<8x10x128xf32> to vector<8x8x128xf32>
    %7 = tpu.concatenate %4, %5, %6 in 2 : vector<8x8x128xf32>, vector<8x8x128xf32>, vector<8x8x128xf32> -> vector<8x8x384xf32>
    %8 = vector.shape_cast %7 : vector<8x8x384xf32> to vector<64x384xf32>
    %c0_6 = arith.constant 0 : index
    %c0_7 = arith.constant 0 : index
    %9 = vector.load %arg8[%c0_6, %c0_7] : memref<64x128xf32, #tpu.memory_space<vmem>>, vector<64x128xf32>
    %c0_8 = arith.constant 0 : index
    %c0_9 = arith.constant 0 : index
    %c0_10 = arith.constant 0 : index
    %c0_11 = arith.constant 0 : index
    %10 = vector.load %arg5[%c0_8, %c0_9, %c0_10, %c0_11] : memref<3x3x384x128xf32, #tpu.memory_space<vmem>>, vector<1x1x384x128xf32>
    %11 = vector.shape_cast %10 : vector<1x1x384x128xf32> to vector<384x128xf32>
    %cst_12 = arith.constant dense<0.000000e+00> : vector<64x128xf32>
    %12 = tpu.matmul %8, %11, %cst_12 {dimension_numbers = #tpu.dot_dimension_numbers<[1], [0], [0], [1], [0, 0, 1, 1], [], []>} : vector<64x384xf32>, vector<384x128xf32>, vector<64x128xf32> -> vector<64x128xf32>
    %13 = arith.addf %9, %12 : vector<64x128xf32>
    %c0_13 = arith.constant 0 : index
    %c0_14 = arith.constant 0 : index
    %14 = vector.load %arg8[%c0_13, %c0_14] : memref<64x128xf32, #tpu.memory_space<vmem>>, vector<64x128xf32>
    tpu.vector_store %arg8[%c0_13, %c0_14], %13 {strides = array<i32>} : memref<64x128xf32, #tpu.memory_space<vmem>>, vector<64x128xf32>,
    %c0_15 = arith.constant 0 : index
    %c0_16 = arith.constant 0 : index
    %c1 = arith.constant 1 : index
    %c0_17 = arith.constant 0 : index
    %c0_18 = arith.constant 0 : index
    %15 = vector.load %arg2[%c0_15, %c0_16, %c1, %c0_17, %c0_18] : memref<1x1x10x10x128xf32, #tpu.memory_space<vmem>>, vector<1x1x8x10x128xf32>
    %16 = vector.shape_cast %15 : vector<1x1x8x10x128xf32> to vector<8x10x128xf32>
    %17 = vector.extract_strided_slice %16 {offsets = [0, 0, 0], sizes = [8, 8, 128], strides = [1, 1, 1]} : vector<8x10x128xf32> to vector<8x8x128xf32>
    %18 = vector.extract_strided_slice %16 {offsets = [0, 1, 0], sizes = [8, 8, 128], strides = [1, 1, 1]} : vector<8x10x128xf32> to vector<8x8x128xf32>
    %19 = vector.extract_strided_slice %16 {offsets = [0, 2, 0], sizes = [8, 8, 128], strides = [1, 1, 1]} : vector<8x10x128xf32> to vector<8x8x128xf32>
    %20 = tpu.concatenate %17, %18, %19 in 2 : vector<8x8x128xf32>, vector<8x8x128xf32>, vector<8x8x128xf32> -> vector<8x8x384xf32>
    %21 = vector.shape_cast %20 : vector<8x8x384xf32> to vector<64x384xf32>
    %c0_19 = arith.constant 0 : index
    %c0_20 = arith.constant 0 : index
    %22 = vector.load %arg8[%c0_19, %c0_20] : memref<64x128xf32, #tpu.memory_space<vmem>>, vector<64x128xf32>
    %c0_21 = arith.constant 0 : index
    %c1_22 = arith.constant 1 : index
    %c0_23 = arith.constant 0 : index
    %c0_24 = arith.constant 0 : index
    %23 = vector.load %arg5[%c0_21, %c1_22, %c0_23, %c0_24] : memref<3x3x384x128xf32, #tpu.memory_space<vmem>>, vector<1x1x384x128xf32>
    %24 = vector.shape_cast %23 : vector<1x1x384x128xf32> to vector<384x128xf32>
    %cst_25 = arith.constant dense<0.000000e+00> : vector<64x128xf32>
    %25 = tpu.matmul %21, %24, %cst_25 {dimension_numbers = #tpu.dot_dimension_numbers<[1], [0], [0], [1], [0, 0, 1, 1], [], []>} : vector<64x384xf32>, vector<384x128xf32>, vector<64x128xf32> -> vector<64x128xf32>
    %26 = arith.addf %22, %25 : vector<64x128xf32>
    %c0_26 = arith.constant 0 : index
    %c0_27 = arith.constant 0 : index
    %27 = vector.load %arg8[%c0_26, %c0_27] : memref<64x128xf32, #tpu.memory_space<vmem>>, vector<64x128xf32>
    tpu.vector_store %arg8[%c0_26, %c0_27], %26 {strides = array<i32>} : memref<64x128xf32, #tpu.memory_space<vmem>>, vector<64x128xf32>,
    %c0_28 = arith.constant 0 : index
    %c0_29 = arith.constant 0 : index
    %c2 = arith.constant 2 : index
    %c0_30 = arith.constant 0 : index
    %c0_31 = arith.constant 0 : index
    %28 = vector.load %arg2[%c0_28, %c0_29, %c2, %c0_30, %c0_31] : memref<1x1x10x10x128xf32, #tpu.memory_space<vmem>>, vector<1x1x8x10x128xf32>
    %29 = vector.shape_cast %28 : vector<1x1x8x10x128xf32> to vector<8x10x128xf32>
    %30 = vector.extract_strided_slice %29 {offsets = [0, 0, 0], sizes = [8, 8, 128], strides = [1, 1, 1]} : vector<8x10x128xf32> to vector<8x8x128xf32>
    %31 = vector.extract_strided_slice %29 {offsets = [0, 1, 0], sizes = [8, 8, 128], strides = [1, 1, 1]} : vector<8x10x128xf32> to vector<8x8x128xf32>
    %32 = vector.extract_strided_slice %29 {offsets = [0, 2, 0], sizes = [8, 8, 128], strides = [1, 1, 1]} : vector<8x10x128xf32> to vector<8x8x128xf32>
    %33 = tpu.concatenate %30, %31, %32 in 2 : vector<8x8x128xf32>, vector<8x8x128xf32>, vector<8x8x128xf32> -> vector<8x8x384xf32>
    %34 = vector.shape_cast %33 : vector<8x8x384xf32> to vector<64x384xf32>
    %c0_32 = arith.constant 0 : index
    %c0_33 = arith.constant 0 : index
    %35 = vector.load %arg8[%c0_32, %c0_33] : memref<64x128xf32, #tpu.memory_space<vmem>>, vector<64x128xf32>
    %c0_34 = arith.constant 0 : index
    %c2_35 = arith.constant 2 : index
    %c0_36 = arith.constant 0 : index
    %c0_37 = arith.constant 0 : index
    %36 = vector.load %arg5[%c0_34, %c2_35, %c0_36, %c0_37] : memref<3x3x384x128xf32, #tpu.memory_space<vmem>>, vector<1x1x384x128xf32>
    %37 = vector.shape_cast %36 : vector<1x1x384x128xf32> to vector<384x128xf32>
    %cst_38 = arith.constant dense<0.000000e+00> : vector<64x128xf32>
    %38 = tpu.matmul %34, %37, %cst_38 {dimension_numbers = #tpu.dot_dimension_numbers<[1], [0], [0], [1], [0, 0, 1, 1], [], []>} : vector<64x384xf32>, vector<384x128xf32>, vector<64x128xf32> -> vector<64x128xf32>
    %39 = arith.addf %35, %38 : vector<64x128xf32>
    %c0_39 = arith.constant 0 : index
    %c0_40 = arith.constant 0 : index
    %40 = vector.load %arg8[%c0_39, %c0_40] : memref<64x128xf32, #tpu.memory_space<vmem>>, vector<64x128xf32>
    tpu.vector_store %arg8[%c0_39, %c0_40], %39 {strides = array<i32>} : memref<64x128xf32, #tpu.memory_space<vmem>>, vector<64x128xf32>,
    %c0_41 = arith.constant 0 : index
    %c0_42 = arith.constant 0 : index
    %c0_43 = arith.constant 0 : index
    %c0_44 = arith.constant 0 : index
    %c0_45 = arith.constant 0 : index
    %41 = vector.load %arg3[%c0_41, %c0_42, %c0_43, %c0_44, %c0_45] : memref<1x1x10x10x128xf32, #tpu.memory_space<vmem>>, vector<1x1x8x10x128xf32>
    %42 = vector.shape_cast %41 : vector<1x1x8x10x128xf32> to vector<8x10x128xf32>
    %43 = vector.extract_strided_slice %42 {offsets = [0, 0, 0], sizes = [8, 8, 128], strides = [1, 1, 1]} : vector<8x10x128xf32> to vector<8x8x128xf32>
    %44 = vector.extract_strided_slice %42 {offsets = [0, 1, 0], sizes = [8, 8, 128], strides = [1, 1, 1]} : vector<8x10x128xf32> to vector<8x8x128xf32>
    %45 = vector.extract_strided_slice %42 {offsets = [0, 2, 0], sizes = [8, 8, 128], strides = [1, 1, 1]} : vector<8x10x128xf32> to vector<8x8x128xf32>
    %46 = tpu.concatenate %43, %44, %45 in 2 : vector<8x8x128xf32>, vector<8x8x128xf32>, vector<8x8x128xf32> -> vector<8x8x384xf32>
    %47 = vector.shape_cast %46 : vector<8x8x384xf32> to vector<64x384xf32>
    %c0_46 = arith.constant 0 : index
    %c0_47 = arith.constant 0 : index
    %48 = vector.load %arg8[%c0_46, %c0_47] : memref<64x128xf32, #tpu.memory_space<vmem>>, vector<64x128xf32>
    %c1_48 = arith.constant 1 : index
    %c0_49 = arith.constant 0 : index
    %c0_50 = arith.constant 0 : index
    %c0_51 = arith.constant 0 : index
    %49 = vector.load %arg5[%c1_48, %c0_49, %c0_50, %c0_51] : memref<3x3x384x128xf32, #tpu.memory_space<vmem>>, vector<1x1x384x128xf32>
    %50 = vector.shape_cast %49 : vector<1x1x384x128xf32> to vector<384x128xf32>
    %cst_52 = arith.constant dense<0.000000e+00> : vector<64x128xf32>
    %51 = tpu.matmul %47, %50, %cst_52 {dimension_numbers = #tpu.dot_dimension_numbers<[1], [0], [0], [1], [0, 0, 1, 1], [], []>} : vector<64x384xf32>, vector<384x128xf32>, vector<64x128xf32> -> vector<64x128xf32>
    %52 = arith.addf %48, %51 : vector<64x128xf32>
    %c0_53 = arith.constant 0 : index
    %c0_54 = arith.constant 0 : index
    %53 = vector.load %arg8[%c0_53, %c0_54] : memref<64x128xf32, #tpu.memory_space<vmem>>, vector<64x128xf32>
    tpu.vector_store %arg8[%c0_53, %c0_54], %52 {strides = array<i32>} : memref<64x128xf32, #tpu.memory_space<vmem>>, vector<64x128xf32>,
    %c0_55 = arith.constant 0 : index
    %c0_56 = arith.constant 0 : index
    %c1_57 = arith.constant 1 : index
    %c0_58 = arith.constant 0 : index
    %c0_59 = arith.constant 0 : index
    %54 = vector.load %arg3[%c0_55, %c0_56, %c1_57, %c0_58, %c0_59] : memref<1x1x10x10x128xf32, #tpu.memory_space<vmem>>, vector<1x1x8x10x128xf32>
    %55 = vector.shape_cast %54 : vector<1x1x8x10x128xf32> to vector<8x10x128xf32>
    %56 = vector.extract_strided_slice %55 {offsets = [0, 0, 0], sizes = [8, 8, 128], strides = [1, 1, 1]} : vector<8x10x128xf32> to vector<8x8x128xf32>
    %57 = vector.extract_strided_slice %55 {offsets = [0, 1, 0], sizes = [8, 8, 128], strides = [1, 1, 1]} : vector<8x10x128xf32> to vector<8x8x128xf32>
    %58 = vector.extract_strided_slice %55 {offsets = [0, 2, 0], sizes = [8, 8, 128], strides = [1, 1, 1]} : vector<8x10x128xf32> to vector<8x8x128xf32>
    %59 = tpu.concatenate %56, %57, %58 in 2 : vector<8x8x128xf32>, vector<8x8x128xf32>, vector<8x8x128xf32> -> vector<8x8x384xf32>
    %60 = vector.shape_cast %59 : vector<8x8x384xf32> to vector<64x384xf32>
    %c0_60 = arith.constant 0 : index
    %c0_61 = arith.constant 0 : index
    %61 = vector.load %arg8[%c0_60, %c0_61] : memref<64x128xf32, #tpu.memory_space<vmem>>, vector<64x128xf32>
    %c1_62 = arith.constant 1 : index
    %c1_63 = arith.constant 1 : index
    %c0_64 = arith.constant 0 : index
    %c0_65 = arith.constant 0 : index
    %62 = vector.load %arg5[%c1_62, %c1_63, %c0_64, %c0_65] : memref<3x3x384x128xf32, #tpu.memory_space<vmem>>, vector<1x1x384x128xf32>
    %63 = vector.shape_cast %62 : vector<1x1x384x128xf32> to vector<384x128xf32>
    %cst_66 = arith.constant dense<0.000000e+00> : vector<64x128xf32>
    %64 = tpu.matmul %60, %63, %cst_66 {dimension_numbers = #tpu.dot_dimension_numbers<[1], [0], [0], [1], [0, 0, 1, 1], [], []>} : vector<64x384xf32>, vector<384x128xf32>, vector<64x128xf32> -> vector<64x128xf32>
    %65 = arith.addf %61, %64 : vector<64x128xf32>
    %c0_67 = arith.constant 0 : index
    %c0_68 = arith.constant 0 : index
    %66 = vector.load %arg8[%c0_67, %c0_68] : memref<64x128xf32, #tpu.memory_space<vmem>>, vector<64x128xf32>
    tpu.vector_store %arg8[%c0_67, %c0_68], %65 {strides = array<i32>} : memref<64x128xf32, #tpu.memory_space<vmem>>, vector<64x128xf32>,
    %c0_69 = arith.constant 0 : index
    %c0_70 = arith.constant 0 : index
    %c2_71 = arith.constant 2 : index
    %c0_72 = arith.constant 0 : index
    %c0_73 = arith.constant 0 : index
    %67 = vector.load %arg3[%c0_69, %c0_70, %c2_71, %c0_72, %c0_73] : memref<1x1x10x10x128xf32, #tpu.memory_space<vmem>>, vector<1x1x8x10x128xf32>
    %68 = vector.shape_cast %67 : vector<1x1x8x10x128xf32> to vector<8x10x128xf32>
    %69 = vector.extract_strided_slice %68 {offsets = [0, 0, 0], sizes = [8, 8, 128], strides = [1, 1, 1]} : vector<8x10x128xf32> to vector<8x8x128xf32>
    %70 = vector.extract_strided_slice %68 {offsets = [0, 1, 0], sizes = [8, 8, 128], strides = [1, 1, 1]} : vector<8x10x128xf32> to vector<8x8x128xf32>
    %71 = vector.extract_strided_slice %68 {offsets = [0, 2, 0], sizes = [8, 8, 128], strides = [1, 1, 1]} : vector<8x10x128xf32> to vector<8x8x128xf32>
    %72 = tpu.concatenate %69, %70, %71 in 2 : vector<8x8x128xf32>, vector<8x8x128xf32>, vector<8x8x128xf32> -> vector<8x8x384xf32>
    %73 = vector.shape_cast %72 : vector<8x8x384xf32> to vector<64x384xf32>
    %c0_74 = arith.constant 0 : index
    %c0_75 = arith.constant 0 : index
    %74 = vector.load %arg8[%c0_74, %c0_75] : memref<64x128xf32, #tpu.memory_space<vmem>>, vector<64x128xf32>
    %c1_76 = arith.constant 1 : index
    %c2_77 = arith.constant 2 : index
    %c0_78 = arith.constant 0 : index
    %c0_79 = arith.constant 0 : index
    %75 = vector.load %arg5[%c1_76, %c2_77, %c0_78, %c0_79] : memref<3x3x384x128xf32, #tpu.memory_space<vmem>>, vector<1x1x384x128xf32>
    %76 = vector.shape_cast %75 : vector<1x1x384x128xf32> to vector<384x128xf32>
    %cst_80 = arith.constant dense<0.000000e+00> : vector<64x128xf32>
    %77 = tpu.matmul %73, %76, %cst_80 {dimension_numbers = #tpu.dot_dimension_numbers<[1], [0], [0], [1], [0, 0, 1, 1], [], []>} : vector<64x384xf32>, vector<384x128xf32>, vector<64x128xf32> -> vector<64x128xf32>
    %78 = arith.addf %74, %77 : vector<64x128xf32>
    %c0_81 = arith.constant 0 : index
    %c0_82 = arith.constant 0 : index
    %79 = vector.load %arg8[%c0_81, %c0_82] : memref<64x128xf32, #tpu.memory_space<vmem>>, vector<64x128xf32>
    tpu.vector_store %arg8[%c0_81, %c0_82], %78 {strides = array<i32>} : memref<64x128xf32, #tpu.memory_space<vmem>>, vector<64x128xf32>,
    %c0_83 = arith.constant 0 : index
    %c0_84 = arith.constant 0 : index
    %c0_85 = arith.constant 0 : index
    %c0_86 = arith.constant 0 : index
    %c0_87 = arith.constant 0 : index
    %80 = vector.load %arg4[%c0_83, %c0_84, %c0_85, %c0_86, %c0_87] : memref<1x1x10x10x128xf32, #tpu.memory_space<vmem>>, vector<1x1x8x10x128xf32>
    %81 = vector.shape_cast %80 : vector<1x1x8x10x128xf32> to vector<8x10x128xf32>
    %82 = vector.extract_strided_slice %81 {offsets = [0, 0, 0], sizes = [8, 8, 128], strides = [1, 1, 1]} : vector<8x10x128xf32> to vector<8x8x128xf32>
    %83 = vector.extract_strided_slice %81 {offsets = [0, 1, 0], sizes = [8, 8, 128], strides = [1, 1, 1]} : vector<8x10x128xf32> to vector<8x8x128xf32>
    %84 = vector.extract_strided_slice %81 {offsets = [0, 2, 0], sizes = [8, 8, 128], strides = [1, 1, 1]} : vector<8x10x128xf32> to vector<8x8x128xf32>
    %85 = tpu.concatenate %82, %83, %84 in 2 : vector<8x8x128xf32>, vector<8x8x128xf32>, vector<8x8x128xf32> -> vector<8x8x384xf32>
    %86 = vector.shape_cast %85 : vector<8x8x384xf32> to vector<64x384xf32>
    %c0_88 = arith.constant 0 : index
    %c0_89 = arith.constant 0 : index
    %87 = vector.load %arg8[%c0_88, %c0_89] : memref<64x128xf32, #tpu.memory_space<vmem>>, vector<64x128xf32>
    %c2_90 = arith.constant 2 : index
    %c0_91 = arith.constant 0 : index
    %c0_92 = arith.constant 0 : index
    %c0_93 = arith.constant 0 : index
    %88 = vector.load %arg5[%c2_90, %c0_91, %c0_92, %c0_93] : memref<3x3x384x128xf32, #tpu.memory_space<vmem>>, vector<1x1x384x128xf32>
    %89 = vector.shape_cast %88 : vector<1x1x384x128xf32> to vector<384x128xf32>
    %cst_94 = arith.constant dense<0.000000e+00> : vector<64x128xf32>
    %90 = tpu.matmul %86, %89, %cst_94 {dimension_numbers = #tpu.dot_dimension_numbers<[1], [0], [0], [1], [0, 0, 1, 1], [], []>} : vector<64x384xf32>, vector<384x128xf32>, vector<64x128xf32> -> vector<64x128xf32>
    %91 = arith.addf %87, %90 : vector<64x128xf32>
    %c0_95 = arith.constant 0 : index
    %c0_96 = arith.constant 0 : index
    %92 = vector.load %arg8[%c0_95, %c0_96] : memref<64x128xf32, #tpu.memory_space<vmem>>, vector<64x128xf32>
    tpu.vector_store %arg8[%c0_95, %c0_96], %91 {strides = array<i32>} : memref<64x128xf32, #tpu.memory_space<vmem>>, vector<64x128xf32>,
    %c0_97 = arith.constant 0 : index
    %c0_98 = arith.constant 0 : index
    %c1_99 = arith.constant 1 : index
    %c0_100 = arith.constant 0 : index
    %c0_101 = arith.constant 0 : index
    %93 = vector.load %arg4[%c0_97, %c0_98, %c1_99, %c0_100, %c0_101] : memref<1x1x10x10x128xf32, #tpu.memory_space<vmem>>, vector<1x1x8x10x128xf32>
    %94 = vector.shape_cast %93 : vector<1x1x8x10x128xf32> to vector<8x10x128xf32>
    %95 = vector.extract_strided_slice %94 {offsets = [0, 0, 0], sizes = [8, 8, 128], strides = [1, 1, 1]} : vector<8x10x128xf32> to vector<8x8x128xf32>
    %96 = vector.extract_strided_slice %94 {offsets = [0, 1, 0], sizes = [8, 8, 128], strides = [1, 1, 1]} : vector<8x10x128xf32> to vector<8x8x128xf32>
    %97 = vector.extract_strided_slice %94 {offsets = [0, 2, 0], sizes = [8, 8, 128], strides = [1, 1, 1]} : vector<8x10x128xf32> to vector<8x8x128xf32>
    %98 = tpu.concatenate %95, %96, %97 in 2 : vector<8x8x128xf32>, vector<8x8x128xf32>, vector<8x8x128xf32> -> vector<8x8x384xf32>
    %99 = vector.shape_cast %98 : vector<8x8x384xf32> to vector<64x384xf32>
    %c0_102 = arith.constant 0 : index
    %c0_103 = arith.constant 0 : index
    %100 = vector.load %arg8[%c0_102, %c0_103] : memref<64x128xf32, #tpu.memory_space<vmem>>, vector<64x128xf32>
    %c2_104 = arith.constant 2 : index
    %c1_105 = arith.constant 1 : index
    %c0_106 = arith.constant 0 : index
    %c0_107 = arith.constant 0 : index
    %101 = vector.load %arg5[%c2_104, %c1_105, %c0_106, %c0_107] : memref<3x3x384x128xf32, #tpu.memory_space<vmem>>, vector<1x1x384x128xf32>
    %102 = vector.shape_cast %101 : vector<1x1x384x128xf32> to vector<384x128xf32>
    %cst_108 = arith.constant dense<0.000000e+00> : vector<64x128xf32>
    %103 = tpu.matmul %99, %102, %cst_108 {dimension_numbers = #tpu.dot_dimension_numbers<[1], [0], [0], [1], [0, 0, 1, 1], [], []>} : vector<64x384xf32>, vector<384x128xf32>, vector<64x128xf32> -> vector<64x128xf32>
    %104 = arith.addf %100, %103 : vector<64x128xf32>
    %c0_109 = arith.constant 0 : index
    %c0_110 = arith.constant 0 : index
    %105 = vector.load %arg8[%c0_109, %c0_110] : memref<64x128xf32, #tpu.memory_space<vmem>>, vector<64x128xf32>
    tpu.vector_store %arg8[%c0_109, %c0_110], %104 {strides = array<i32>} : memref<64x128xf32, #tpu.memory_space<vmem>>, vector<64x128xf32>,
    %c0_111 = arith.constant 0 : index
    %c0_112 = arith.constant 0 : index
    %c2_113 = arith.constant 2 : index
    %c0_114 = arith.constant 0 : index
    %c0_115 = arith.constant 0 : index
    %106 = vector.load %arg4[%c0_111, %c0_112, %c2_113, %c0_114, %c0_115] : memref<1x1x10x10x128xf32, #tpu.memory_space<vmem>>, vector<1x1x8x10x128xf32>
    %107 = vector.shape_cast %106 : vector<1x1x8x10x128xf32> to vector<8x10x128xf32>
    %108 = vector.extract_strided_slice %107 {offsets = [0, 0, 0], sizes = [8, 8, 128], strides = [1, 1, 1]} : vector<8x10x128xf32> to vector<8x8x128xf32>
    %109 = vector.extract_strided_slice %107 {offsets = [0, 1, 0], sizes = [8, 8, 128], strides = [1, 1, 1]} : vector<8x10x128xf32> to vector<8x8x128xf32>
    %110 = vector.extract_strided_slice %107 {offsets = [0, 2, 0], sizes = [8, 8, 128], strides = [1, 1, 1]} : vector<8x10x128xf32> to vector<8x8x128xf32>
    %111 = tpu.concatenate %108, %109, %110 in 2 : vector<8x8x128xf32>, vector<8x8x128xf32>, vector<8x8x128xf32> -> vector<8x8x384xf32>
    %112 = vector.shape_cast %111 : vector<8x8x384xf32> to vector<64x384xf32>
    %c0_116 = arith.constant 0 : index
    %c0_117 = arith.constant 0 : index
    %113 = vector.load %arg8[%c0_116, %c0_117] : memref<64x128xf32, #tpu.memory_space<vmem>>, vector<64x128xf32>
    %c2_118 = arith.constant 2 : index
    %c2_119 = arith.constant 2 : index
    %c0_120 = arith.constant 0 : index
    %c0_121 = arith.constant 0 : index
    %114 = vector.load %arg5[%c2_118, %c2_119, %c0_120, %c0_121] : memref<3x3x384x128xf32, #tpu.memory_space<vmem>>, vector<1x1x384x128xf32>
    %115 = vector.shape_cast %114 : vector<1x1x384x128xf32> to vector<384x128xf32>
    %cst_122 = arith.constant dense<0.000000e+00> : vector<64x128xf32>
    %116 = tpu.matmul %112, %115, %cst_122 {dimension_numbers = #tpu.dot_dimension_numbers<[1], [0], [0], [1], [0, 0, 1, 1], [], []>} : vector<64x384xf32>, vector<384x128xf32>, vector<64x128xf32> -> vector<64x128xf32>
    %117 = arith.addf %113, %116 : vector<64x128xf32>
    %c0_123 = arith.constant 0 : index
    %c0_124 = arith.constant 0 : index
    %118 = vector.load %arg8[%c0_123, %c0_124] : memref<64x128xf32, #tpu.memory_space<vmem>>, vector<64x128xf32>
    tpu.vector_store %arg8[%c0_123, %c0_124], %117 {strides = array<i32>} : memref<64x128xf32, #tpu.memory_space<vmem>>, vector<64x128xf32>,
    %c0_125 = arith.constant 0 : index
    %c0_126 = arith.constant 0 : index
    %119 = vector.load %arg8[%c0_125, %c0_126] : memref<64x128xf32, #tpu.memory_space<vmem>>, vector<64x128xf32>
    %120 = vector.shape_cast %119 : vector<64x128xf32> to vector<8x8x128xf32>
    %c0_127 = arith.constant 0 : index
    %c0_128 = arith.constant 0 : index
    %c0_129 = arith.constant 0 : index
    %c0_130 = arith.constant 0 : index
    %c0_131 = arith.constant 0 : index
    %121 = vector.load %arg6[%c0_127, %c0_128, %c0_129, %c0_130, %c0_131] : memref<1x1x8x8x128xf32, #tpu.memory_space<vmem>>, vector<1x1x8x8x128xf32>
    %122 = vector.shape_cast %121 : vector<1x1x8x8x128xf32> to vector<8x8x128xf32>
    %123 = vector.shape_cast %120 : vector<8x8x128xf32> to vector<1x1x8x8x128xf32>
    tpu.vector_store %arg6[%c0_127, %c0_128, %c0_129, %c0_130, %c0_131], %123 {strides = array<i32>} : memref<1x1x8x8x128xf32, #tpu.memory_space<vmem>>, vector<1x1x8x8x128xf32>,
    %cst_132 = arith.constant dense<0.000000e+00> : vector<128xf32>
    %124 = vector.multi_reduction <add>, %119, %cst_132 [0] : vector<64x128xf32> to vector<128xf32>
    %125 = vector.shape_cast %124 : vector<128xf32> to vector<1x128xf32>
    %126 = arith.mulf %119, %119 : vector<64x128xf32>
    %cst_133 = arith.constant dense<0.000000e+00> : vector<128xf32>
    %127 = vector.multi_reduction <add>, %126, %cst_133 [0] : vector<64x128xf32> to vector<128xf32>
    %128 = vector.shape_cast %127 : vector<128xf32> to vector<1x128xf32>
    %129 = tpu.concatenate %125, %128 in 0 : vector<1x128xf32>, vector<1x128xf32> -> vector<2x128xf32>
    %c0_134 = arith.constant 0 : index
    %c0_135 = arith.constant 0 : index
    %c0_136 = arith.constant 0 : index
    %c0_137 = arith.constant 0 : index
    %130 = vector.load %arg7[%c0_134, %c0_135, %c0_136, %c0_137] : memref<1x1x2x128xf32, #tpu.memory_space<vmem>>, vector<1x1x2x128xf32>
    %131 = vector.shape_cast %130 : vector<1x1x2x128xf32> to vector<2x128xf32>
    %132 = vector.shape_cast %129 : vector<2x128xf32> to vector<1x1x2x128xf32>
    tpu.vector_store %arg7[%c0_134, %c0_135, %c0_136, %c0_137], %132 {strides = array<i32>} : memref<1x1x2x128xf32, #tpu.memory_space<vmem>>, vector<1x1x2x128xf32>,
    return
  }
  func.func @transform_0(%arg0: i32, %arg1: i32) -> (i32, i32, i32, i32, i32) {
    %c0_i32 = arith.constant 0 : i32
    %0 = arith.addi %arg1, %c0_i32 : i32
    %c0_i32_0 = arith.constant 0 : i32
    %c0_i32_1 = arith.constant 0 : i32
    %c0_i32_2 = arith.constant 0 : i32
    %c0_i32_3 = arith.constant 0 : i32
    return %arg0, %0, %c0_i32_0, %c0_i32_1, %c0_i32_2 : i32, i32, i32, i32, i32
  }
  func.func @transform_1(%arg0: i32, %arg1: i32) -> (i32, i32, i32, i32, i32) {
    %c1_i32 = arith.constant 1 : i32
    %0 = arith.addi %arg1, %c1_i32 : i32
    %c0_i32 = arith.constant 0 : i32
    %c0_i32_0 = arith.constant 0 : i32
    %c0_i32_1 = arith.constant 0 : i32
    %c0_i32_2 = arith.constant 0 : i32
    return %arg0, %0, %c0_i32, %c0_i32_0, %c0_i32_1 : i32, i32, i32, i32, i32
  }
  func.func @transform_2(%arg0: i32, %arg1: i32) -> (i32, i32, i32, i32, i32) {
    %c2_i32 = arith.constant 2 : i32
    %0 = arith.addi %arg1, %c2_i32 : i32
    %c0_i32 = arith.constant 0 : i32
    %c0_i32_0 = arith.constant 0 : i32
    %c0_i32_1 = arith.constant 0 : i32
    %c0_i32_2 = arith.constant 0 : i32
    return %arg0, %0, %c0_i32, %c0_i32_0, %c0_i32_1 : i32, i32, i32, i32, i32
  }
  func.func @transform_3(%arg0: i32, %arg1: i32) -> (i32, i32, i32, i32) {
    %c0_i32 = arith.constant 0 : i32
    %c0_i32_0 = arith.constant 0 : i32
    %c0_i32_1 = arith.constant 0 : i32
    %c0_i32_2 = arith.constant 0 : i32
    %c0_i32_3 = arith.constant 0 : i32
    return %c0_i32, %c0_i32_0, %c0_i32_1, %c0_i32_2 : i32, i32, i32, i32
  }
  func.func @transform_4(%arg0: i32, %arg1: i32) -> (i32, i32, i32, i32, i32) {
    %c0_i32 = arith.constant 0 : i32
    %c0_i32_0 = arith.constant 0 : i32
    %c0_i32_1 = arith.constant 0 : i32
    %c0_i32_2 = arith.constant 0 : i32
    return %arg0, %arg1, %c0_i32, %c0_i32_0, %c0_i32_1 : i32, i32, i32, i32, i32
  }
  func.func @transform_5(%arg0: i32, %arg1: i32) -> (i32, i32, i32, i32) {
    %c0_i32 = arith.constant 0 : i32
    %c0_i32_0 = arith.constant 0 : i32
    %c0_i32_1 = arith.constant 0 : i32
    return %arg0, %arg1, %c0_i32, %c0_i32_0 : i32, i32, i32, i32
  }
}

</mosaic_0001>

<bundles_post_ra>
// kernel: tpu_custom_call.1
= control target key start
LH: loop header
LB: loop body
LE: loop exit
PB: predicated region body
PF: predicated region fallthrough
CT: control target
= control target key end

     0   :  { %11 = vsyncpa [#allocation4], 0  ;;  %s8269_s0 = inlined_call_operand.vmem [shape: f32[2,10,10,10,128], index: 0, kind: input, shape index: {}]   ;;  %s8270_s1 = inlined_call_operand.vmem [shape: f32[2,10,10,10,128], index: 1, kind: input, shape index: {}]   ;;  %s8271_s2 = inlined_call_operand.vmem [shape: f32[2,10,10,10,128], index: 2, kind: input, shape index: {}]   ;;  %s8272_s3 = inlined_call_operand.vmem [shape: f32[3,3,384,128], index: 3, kind: input, shape index: {}]   ;;  %s8273_s4 = inlined_call_operand.hbm [shape: f32[2,8,8,8,128], index: 4, kind: output, shape index: {0}]   ;;  %s8274_s5 = inlined_call_operand.hbm [shape: f32[2,8,2,128], index: 5, kind: output, shape index: {1}]  }
   0x1   :  { %13 = vsyncpa [#allocation4 + $0x1], 0 }
   0x2   :  { %14 = vsyncpa [#allocation6], 0 }
   0x3   :  { %16 = vsyncpa [#allocation6 + $0x1], 0  ;;  %s5877_s18 = smov 0   ;;  %s5879_s19 = smov 0  }
   0x4   :  { %s5881_s20 = smov 0   ;;  %s5883_s21 = smov 0  }
   0x5   :  { %s5885_s22 = smov 0   ;;  %s5887_s23 = smov 0  }
   0x6   :  { %s5889_s24 = smov 0   ;;  %s5891_s25 = smov 0  }
   0x7 LB: > { %s4022_s26 = sadd.s32 4294967295, %s5841_s25   ;;  %s4023_s27 = sadd.s32 4294967294, %s5841_s25   ;;  %s5841_s25 = sphi %s5891_s25, %s22_s25   ;;  %s5837_s24 = sphi %s5889_s24, %s8296_s24   ;;  %s5833_s23 = sphi %s5887_s23, %s8295_s23   ;;  %s5829_s22 = sphi %s5885_s22, %s8294_s22   ;;  %s5825_s21 = sphi %s5883_s21, %s8293_s21   ;;  %s5821_s20 = sphi %s5881_s20, %s8292_s20   ;;  %s5817_s19 = sphi %s5879_s19, %s8291_s19   ;;  %s5813_s18 = sphi %s5877_s18, %s8290_s18  }
   0x8   : > { %s31_s28 = sadd.s32 1, %s5833_s23  ;;  %s34_s29 = sadd.s32 1, %s5837_s24 }
   0x9   : > { %p32_p0 = scmp.ge.s32.totalorder %s31_s28, 8  ;;  %p162_p1 = scmp.ne.s32.totalorder %s5821_s20, %s5817_s19 }
   0xa   : > { %p163_p2 = scmp.eq.s32.totalorder %s4022_s26, 15  ;;  %p168_p5 = scmp.ne.s32.totalorder %s5817_s19, %s5813_s18 }
   0xb   : > { %s8298_s28 = smov (%p32_p0, %s31_s28), 0  ;;  %s8300_s29 = smov (!%p32_p0, %s34_s29), %s5837_s24 }
   0xc   : > { %s148_s30 = ssub.s32 %s5833_s23, %s8298_s28  ;;  %p5928_p3 = por %p163_p2, %p162_p1 }
   0xd   : > { %p36_p4 = scmp.ge.s32.totalorder %s8300_s29, 2  ;;  %p169_p6 = scmp.eq.s32.totalorder %s4023_s27, 15 }
   0xe   : > { %p4026_p7 = scmp.ge.s32.totalorder %s5841_s25, 1  ;;  %p258_p9 = scmp.lt.s32.totalorder %s5841_s25, 17 }
   0xf   : > { %s8302_s29 = smov (%p36_p4, %s8300_s29), 0  ;;  %p5937_p8 = por %p169_p6, %p168_p5 }
  0x10   : > { %s147_s8 = ssub.s32 %s5837_s24, %s8302_s29  ;;  %s152_s9 = sadd.s32 1, %s5821_s20 }
  0x11   : > { %s149_s10 = sor.u32 %s148_s30, %s147_s8  ;;  %p259_p10 = pnand %p4026_p7, %p258_p9 }
  0x12   : > { %p150_p11 = scmp.eq.s32.totalorder %s149_s10, 0 }
  0x13   : > { %262 = sbr.rel (%p259_p10) target bundleno = 678 (0x2a6), region = 36 }
  0x14   : > { %s5946_s11 = scalar_select %p150_p11, %s5821_s20, %s152_s9  }
  0x18   : > { %v491_v0 = vld [vmem:[%s8272_s3 + $0xf8] sm:$0xff]  ;;  %v490_v2 = vld [vmem:[%s8272_s3 + $0xf0] sm:$0xff]  ;;  %p315_p12 = scmp.lt.s32.totalorder %s5829_s22, 1  ;;  %p317_p13 = scmp.lt.s32.totalorder %s5825_s21, 9  ;;  %v489_v5 = vld [vmem:[%s8272_s3 + $0xe8] sm:$0xff]  ;;  %vm386_vm0 = vcmask 1046528  }
  0x19   : > { %v475_v1 = vld [vmem:[%s8272_s3 + $0x78] sm:$0xff]  ;;  %4521 = vmatprep.subr.mxu0 %v491_v0  ;;  %v474_v4 = vld [vmem:[%s8272_s3 + $0x70] sm:$0xff]  ;;  %v473_v7 = vld [vmem:[%s8272_s3 + $0x68] sm:$0xff]  ;;  %vm419_vm1 = vcmask 1045504   ;;  %s335_s12 = sadd.s32 2, %s5825_s21  ;;  %s4514_s15 = sshll.u32 %s5825_s21, 3 }
  0x1a   : > { %v507_v3 = vld [vmem:[%s8272_s3 + $0x178] sm:$0xff]  ;;  %4522 = vmatpush3.msra.mxu0 %v475_v1  ;;  %v506_v6 = vld [vmem:[%s8272_s3 + $0x170] sm:$0xff]  ;;  %v505_v8 = vld [vmem:[%s8272_s3 + $0x168] sm:$0xff]  ;;  %s316_s26 = scalar_select %p315_p12, %s5829_s22, 1 }
  0x1b   : > { %5241 = vmatprep.subr.mxu1 %v507_v3  ;;  %4523 = vmatprep.subr.mxu0 %v490_v2  ;;  %v488_v9 = vld [vmem:[%s8272_s3 + $0xe0] sm:$0xff]  ;;  %s5984_s8 = scalar_select %p317_p13, %s5825_s21, 9  ;;  %v487_v12 = vld [vmem:[%s8272_s3 + $0xd8] sm:$0xff]  ;;  %v486_v15 = vld [vmem:[%s8272_s3 + $0xd0] sm:$0xff] }
  0x1c   : > { %5242 = vmatpush3.msra.mxu1 %v507_v3  ;;  %4524 = vmatpush3.msra.mxu0 %v474_v4  ;;  %v472_v10 = vld [vmem:[%s8272_s3 + $0x60] sm:$0xff]  ;;  %v471_v13 = vld [vmem:[%s8272_s3 + $0x58] sm:$0xff]  ;;  %s6001_s9 = smul.u32 200, %s316_s26  ;;  %v470_v16 = vld [vmem:[%s8272_s3 + $0x50] sm:$0xff]  ;;  %p7349_p1 = scmp.lt.s32.totalorder %s335_s12, 9 }
  0x1d   : > { %5243 = vmatprep.subr.mxu1 %v506_v6  ;;  %4525 = vmatprep.subr.mxu0 %v489_v5  ;;  %v504_v11 = vld [vmem:[%s8272_s3 + $0x160] sm:$0xff]  ;;  %v503_v14 = vld [vmem:[%s8272_s3 + $0x158] sm:$0xff]  ;;  %s5637_s13 = smul.u32 20, %s5984_s8  ;;  %v502_v17 = vld [vmem:[%s8272_s3 + $0x150] sm:$0xff]  ;;  %s324_s8 = sadd.s32 1, %s5825_s21 }
  0x1e   : > { %5244 = vmatpush3.msra.mxu1 %v506_v6  ;;  %4526 = vmatpush3.msra.mxu0 %v473_v7  ;;  %v485_v18 = vld [vmem:[%s8272_s3 + $0xc8] sm:$0xff]  ;;  %v484_v21 = vld [vmem:[%s8272_s3 + $0xc0] sm:$0xff]  ;;  %v483_v24 = vld [vmem:[%s8272_s3 + $0xb8] sm:$0xff]  ;;  %p6673_p0 = scmp.lt.s32.totalorder %s324_s8, 9  ;;  %s8306_s12 = smov (!%p7349_p1, %s335_s12), 9 }
  0x1f   : > { %5245 = vmatprep.subr.mxu1 %v505_v8  ;;  %4527 = vmatprep.subr.mxu0 %v488_v9  ;;  %v469_v19 = vld [vmem:[%s8272_s3 + $0x48] sm:$0xff]  ;;  %s321_s16 = sadd.s32 %s6001_s9, %s5637_s13  ;;  %v468_v22 = vld [vmem:[%s8272_s3 + $0x40] sm:$0xff]  ;;  %v467_v25 = vld [vmem:[%s8272_s3 + $0x38] sm:$0xff]  ;;  %s5640_s10 = smul.u32 20, %s8306_s12 }
  0x20   : > { %5246 = vmatpush3.msra.mxu1 %v505_v8  ;;  %4528 = vmatpush3.msra.mxu0 %v472_v10  ;;  %v501_v20 = vld [vmem:[%s8272_s3 + $0x148] sm:$0xff]  ;;  %v500_v23 = vld [vmem:[%s8272_s3 + $0x140] sm:$0xff]  ;;  %v499_v26 = vld [vmem:[%s8272_s3 + $0x138] sm:$0xff]  ;;  %s4029_s17 = sshll.u32 %s321_s16, 3  ;;  %s8304_s8 = smov (!%p6673_p0, %s324_s8), 9 }
  0x21   : > { %5247 = vmatprep.subr.mxu1 %v504_v11  ;;  %4529 = vmatprep.subr.mxu0 %v487_v12  ;;  %v482_v27 = vld [vmem:[%s8272_s3 + $0xb0] sm:$0xff]  ;;  %v481_v30 = vld [vmem:[%s8272_s3 + $0xa8] sm:$0xff]  ;;  %s6056_s26 = scalar_lea.vmem %s8269_s0, %s4029_s17  ;;  %v480_v33 = vld [vmem:[%s8272_s3 + $0xa0] sm:$0xff]  ;;  %s5639_s30 = smul.u32 20, %s8304_s8 }
  0x22   : > { %5248 = vmatpush3.msra.mxu1 %v504_v11  ;;  %4530 = vmatpush3.msra.mxu0 %v471_v13  ;;  %v466_v28 = vld [vmem:[%s8272_s3 + $0x30] sm:$0xff]  ;;  %v465_v31 = vld [vmem:[%s8272_s3 + $0x28] sm:$0xff]  ;;  %v464_v34 = vld [vmem:[%s8272_s3 + $0x20] sm:$0xff]  ;;  %s7414_s16 = sadd.s32 %s5640_s10, %s6001_s9 }
  0x23   : > { %5249 = vmatprep.subr.mxu1 %v503_v14  ;;  %4531 = vmatprep.subr.mxu0 %v486_v15  ;;  %v498_v29 = vld [vmem:[%s8272_s3 + $0x130] sm:$0xff]  ;;  %v497_v32 = vld [vmem:[%s8272_s3 + $0x128] sm:$0xff]  ;;  %v496_v35 = vld [vmem:[%s8272_s3 + $0x120] sm:$0xff]  ;;  %s6729_s27 = sadd.s32 %s5639_s30, %s6001_s9  ;;  %s4031_s17 = sshll.u32 %s7414_s16, 3 }
  0x24   : > { %5250 = vmatpush3.msra.mxu1 %v503_v14  ;;  %4532 = vmatpush3.msra.mxu0 %v470_v16  ;;  %v354_v36 = vld [vmem:[%s6056_s26] sm:$0xff]  ;;  %v355_v37 = vld [vmem:[%s6056_s26 + $0x8] sm:$0x3]  ;;  %v479_v38 = vld [vmem:[%s8272_s3 + $0x98] sm:$0xff]  ;;  %s4030_s14 = sshll.u32 %s6729_s27, 3  ;;  %s7457_s10 = scalar_lea.vmem %s8271_s2, %s4031_s17 }
  0x25   : > { %5251 = vmatprep.subr.mxu1 %v502_v17  ;;  %4533 = vmatprep.subr.mxu0 %v485_v18  ;;  %v463_v39 = vld [vmem:[%s8272_s3 + $0x18] sm:$0xff]  ;;  %v478_v41 = vld [vmem:[%s8272_s3 + $0x90] sm:$0xff]  ;;  %v387_v42 = vrot.slane %v354_v36, 1  ;;  %v388_v43 = vrot.slane %v355_v37, 1  ;;  %v477_v46 = vld [vmem:[%s8272_s3 + $0x88] sm:$0xff]  ;;  %v420_v53 = vrot.slane %v354_v36, 2  ;;  %s6764_s30 = scalar_lea.vmem %s8270_s1, %s4030_s14 }
  0x26   : > { %5252 = vmatpush3.msra.mxu1 %v502_v17  ;;  %4534 = vmatpush3.msra.mxu0 %v469_v19  ;;  %v495_v40 = vld [vmem:[%s8272_s3 + $0x118] sm:$0xff]  ;;  %v462_v44 = vld [vmem:[%s8272_s3 + $0x10] sm:$0xff]  ;;  %v461_v49 = vld [vmem:[%s8272_s3 + $0x8] sm:$0xff]  ;;  %v421_v54 = vrot.slane %v355_v37, 2  ;;  %s4515_s9 = sshll.u32 %s5829_s22, 6 }
  0x27   : > { %5253 = vmatprep.subr.mxu1 %v501_v20  ;;  %4535 = vmatprep.subr.mxu0 %v484_v21  ;;  %v494_v45 = vld [vmem:[%s8272_s3 + $0x110] sm:$0xff]  ;;  %v357_v48 = vld [vmem:[%s6056_s26 + $0x18] sm:$0x3]  ;;  %v493_v50 = vld [vmem:[%s8272_s3 + $0x108] sm:$0xff]  ;;  %v389_v52 = vsel %vm386_vm0, %v387_v42, %v388_v43  ;;  %s3843_s12 = sadd.s32 %s4515_s9, %s4514_s15  ;;  %s5843_s15 = smov [#allocation3]  }
  0x28   : > { %5254 = vmatpush3.msra.mxu1 %v501_v20  ;;  %4536 = vmatpush3.msra.mxu0 %v468_v22  ;;  %v6097_v47 = vld [vmem:[%s6056_s26 + $0x10] sm:$0xff]  ;;  %v476_v51 = vld [vmem:[%s8272_s3 + $0x80] sm:$0xff]  ;;  %v424_v57 = vrot.slane %v357_v48, 2  ;;  %v391_v60 = vrot.slane %v357_v48, 1  ;;  %v4079_v61 = vld [vmem:[%s8272_s3 + $0x278] sm:$0xff]  ;;  %v422_v62 = vsel %vm419_vm1, %v420_v53, %v421_v54  ;;  %s4516_s27 = sshll.u32 %s3843_s12, 7 }
  0x29   : > { %5255 = vmatprep.subr.mxu1 %v500_v23  ;;  %4537 = vmatprep.subr.mxu0 %v483_v24  ;;  %v460_v55 = vld [vmem:[%s8272_s3] sm:$0xff]  ;;  %v423_v56 = vrot.slane %v6097_v47, 2  ;;  %v390_v59 = vrot.slane %v6097_v47, 1  ;;  %v4063_v63 = vld [vmem:[%s8272_s3 + $0x1f8] sm:$0xff]  ;;  %v359_v1 = vld [vmem:[%s6056_s26 + $0x28] sm:$0x3] }
  0x2a   : > { %5256 = vmatpush3.msra.mxu1 %v500_v23  ;;  %4538 = vmatpush3.msra.mxu0 %v467_v25  ;;  %v492_v58 = vld [vmem:[%s8272_s3 + $0x100] sm:$0xff]  ;;  %v4078_v3 = vld [vmem:[%s8272_s3 + $0x270] sm:$0xff]  ;;  %v4095_v4 = vld [vmem:[%s8272_s3 + $0x2f8] sm:$0xff]  ;;  %v394_v8 = vrot.slane %v359_v1, 1  ;;  %v427_v16 = vrot.slane %v359_v1, 2  ;;  %s5723_s9 = sshll.u32 %s5843_s15, 4  ;;  %s5724_s9 = int_to_ptr.vmem [resolvable:$false] %s5723_s9 }
  0x2b   : > { %5257 = vmatprep.subr.mxu1 %v499_v26  ;;  %4539 = vmatprep.subr.mxu0 %v482_v27  ;;  %v6126_v0 = vld [vmem:[%s6056_s26 + $0x20] sm:$0xff]  ;;  %v425_v2 = vsel %vm419_vm1, %v423_v56, %v424_v57  ;;  %v392_v5 = vsel %vm386_vm0, %v390_v59, %v391_v60  ;;  %v4062_v6 = vld [vmem:[%s8272_s3 + $0x1f0] sm:$0xff]  ;;  %v4077_v9 = vld [vmem:[%s8272_s3 + $0x268] sm:$0xff]  ;;  %s5725_s12 = scalar_lea.vmem %s5724_s9, 2048 }
  0x2c   : > { %5258 = vmatpush3.msra.mxu1 %v499_v26  ;;  %4540 = vmatpush3.msra.mxu0 %v466_v28  ;;  %v6145_v7 = vrot.slane %v6126_v0, 1  ;;  %v4094_v10 = vld [vmem:[%s8272_s3 + $0x2f0] sm:$0xff]  ;;  %v4061_v11 = vld [vmem:[%s8272_s3 + $0x1e8] sm:$0xff]  ;;  %v361_v13 = vld [vmem:[%s6056_s26 + $0x38] sm:$0x3]  ;;  %v6164_v15 = vrot.slane %v6126_v0, 2 }
  0x2d   : > { %5259 = vmatprep.subr.mxu1 %v498_v29  ;;  %4541 = vmatprep.subr.mxu0 %v481_v30  ;;  %v6157_v12 = vld [vmem:[%s6056_s26 + $0x30] sm:$0xff]  ;;  %v4076_v14 = vld [vmem:[%s8272_s3 + $0x260] sm:$0xff]  ;;  %v4093_v17 = vld [vmem:[%s8272_s3 + $0x2e8] sm:$0xff]  ;;  %v430_v21 = vrot.slane %v361_v13, 2  ;;  %v397_v24 = vrot.slane %v361_v13, 1 }
  0x2e   : > { %5260 = vmatpush3.msra.mxu1 %v498_v29  ;;  %4542 = vmatpush3.msra.mxu0 %v465_v31  ;;  %v395_v18 = vsel %vm386_vm0, %v6145_v7, %v394_v8  ;;  %v4060_v19 = vld [vmem:[%s8272_s3 + $0x1e0] sm:$0xff]  ;;  %v6176_v20 = vrot.slane %v6157_v12, 2  ;;  %v4075_v22 = vld [vmem:[%s8272_s3 + $0x258] sm:$0xff]  ;;  %v6182_v23 = vrot.slane %v6157_v12, 1  ;;  %v428_v26 = vsel %vm419_vm1, %v6164_v15, %v427_v16  ;;  %v363_v29 = vld [vmem:[%s6056_s26 + $0x48] sm:$0x3] }
  0x2f   : > { %5261 = vmatprep.subr.mxu1 %v497_v32  ;;  %4543 = vmatprep.subr.mxu0 %v480_v33  ;;  %v4092_v25 = vld [vmem:[%s8272_s3 + $0x2e0] sm:$0xff]  ;;  %v4059_v27 = vld [vmem:[%s8272_s3 + $0x1d8] sm:$0xff]  ;;  %v4074_v31 = vld [vmem:[%s8272_s3 + $0x250] sm:$0xff] }
  0x30   : > { %5262 = vmatpush3.msra.mxu1 %v497_v32  ;;  %4544 = vmatpush3.msra.mxu0 %v464_v34  ;;  %v6193_v28 = vld [vmem:[%s6056_s26 + $0x40] sm:$0xff]  ;;  %v431_v30 = vsel %vm419_vm1, %v6176_v20, %v430_v21  ;;  %v4091_v32 = vld [vmem:[%s8272_s3 + $0x2d8] sm:$0xff]  ;;  %v398_v33 = vsel %vm386_vm0, %v6182_v23, %v397_v24  ;;  %v4058_v34 = vld [vmem:[%s8272_s3 + $0x1d0] sm:$0xff] }
  0x31   : > { %5263 = vmatprep.subr.mxu1 %v496_v35  ;;  %4545 = vmatprep.subr.mxu0 %v479_v38  ;;  %v4073_v37 = vld [vmem:[%s8272_s3 + $0x248] sm:$0xff]  ;;  %v4090_v38 = vld [vmem:[%s8272_s3 + $0x2d0] sm:$0xff]  ;;  %v4072_v42 = vld [vmem:[%s8272_s3 + $0x240] sm:$0xff]  ;;  %v6230_v43 = vrot.slane %v6193_v28, 2 }
  0x32   : > { %5264 = vmatpush3.msra.mxu1 %v496_v35  ;;  %4546 = vmatpush3.msra.mxu0 %v463_v39  ;;  %v6211_v35 = vrot.slane %v6193_v28, 1  ;;  %v4057_v39 = vld [vmem:[%s8272_s3 + $0x1c8] sm:$0xff]  ;;  %v4056_v48 = vld [vmem:[%s8272_s3 + $0x1c0] sm:$0xff]  ;;  %v4055_v57 = vld [vmem:[%s8272_s3 + $0x1b8] sm:$0xff] }
  0x33   : > { %5265 = vmatprep.subr.mxu1 %v495_v40  ;;  %4547 = vmatprep.subr.mxu0 %v478_v41  ;;  %v365_v41 = vld [vmem:[%s6056_s26 + $0x58] sm:$0x3]  ;;  %v4088_v54 = vld [vmem:[%s8272_s3 + $0x2c0] sm:$0xff]  ;;  %v367_v60 = vld [vmem:[%s6056_s26 + $0x68] sm:$0x3] }
  0x34   : > { %5266 = vmatpush3.msra.mxu1 %v495_v40  ;;  %4548 = vmatpush3.msra.mxu0 %v462_v44  ;;  %v6223_v40 = vld [vmem:[%s6056_s26 + $0x50] sm:$0xff]  ;;  %v433_v44 = vrot.slane %v363_v29, 2  ;;  %v403_v53 = vrot.slane %v365_v41, 1  ;;  %v4097_v8 = vld [vmem:[%s6056_s26 + $0x28] sm:$0x3]  ;;  %v439_v16 = vrot.slane %v367_v60, 2 }
  0x35   : > { %5267 = vmatprep.subr.mxu1 %v494_v45  ;;  %4549 = vmatprep.subr.mxu0 %v477_v46  ;;  %v1180_v13 = vrot.slane %v4097_v8, 2 }
  0x36   : > { %5268 = vmatpush3.msra.mxu1 %v494_v45  ;;  %4550 = vmatpush3.msra.mxu0 %v461_v49  ;;  %v4089_v45 = vld [vmem:[%s8272_s3 + $0x2c8] sm:$0xff]  ;;  %v6242_v49 = vrot.slane %v6223_v40, 2 }
  0x37   : > { %5269 = vmatprep.subr.mxu1 %v493_v50  ;;  %4551 = vmatprep.subr.mxu0 %v476_v51  ;;  %v4071_v51 = vld [vmem:[%s8272_s3 + $0x238] sm:$0xff] }
  0x38   : > { %572 = vmatprep.mubr.f32.mxu0 %v389_v52  ;;  %4552 = vmatpush3.msra.mxu0 %v460_v55  ;;  %v6248_v52 = vrot.slane %v6223_v40, 1  ;;  %v434_v55 = vsel %vm419_vm1, %v6230_v43, %v433_v44  ;;  %v4103_v44 = vld [vmem:[%s6056_s26 + $0x58] sm:$0x3] }
  0x39   : > { %5270 = vmatpush3.msra.mxu1 %v493_v50  ;;  %573 = vmatmul.mubr.f32.vlgmr.msra.gmra.mxu0 %v354_v36  ;;  %v400_v36 = vrot.slane %v363_v29, 1  ;;  %v436_v50 = vrot.slane %v365_v41, 2 }
  0x3a   : > { %5271 = vmatprep.subr.mxu1 %v492_v58  ;;  %4601 = vmatprep.subr.mxu0 %v4079_v61  ;;  %v404_v1 = vsel %vm386_vm0, %v6248_v52, %v403_v53  ;;  %v4051_v53 = vld [vmem:[%s8272_s3 + $0x198] sm:$0xff] }
  0x3b   : > { %5272 = vmatpush3.msra.mxu1 %v492_v58  ;;  %5273 = vmatprep.mubr.f32.mxu1 %v422_v62  ;;  %v401_v46 = vsel %vm386_vm0, %v6211_v35, %v400_v36  ;;  %v6259_v58 = vld [vmem:[%s6056_s26 + $0x60] sm:$0xff]  ;;  %v437_v61 = vsel %vm419_vm1, %v6242_v49, %v436_v50  ;;  %v4070_v62 = vld [vmem:[%s8272_s3 + $0x230] sm:$0xff]  ;;  %v1189_v50 = vrot.slane %v4103_v44, 2 }
  0x3c   : > { %4602 = vmatpush3.msra.mxu0 %v4063_v63  ;;  %5274 = vmatmul.mubr.f32.vlgmr.msra.gmra.mxu1 %v425_v2  ;;  %v4087_v63 = vld [vmem:[%s8272_s3 + $0x2b8] sm:$0xff]  ;;  %v4054_v2 = vld [vmem:[%s8272_s3 + $0x1b0] sm:$0xff] }
  0x3d   : > { %4603 = vmatprep.subr.mxu0 %v4078_v3  ;;  %5285 = vmatprep.subr.mxu1 %v4095_v4  ;;  %v4069_v3 = vld [vmem:[%s8272_s3 + $0x228] sm:$0xff] }
  0x3e   : > { %577 = vmatprep.mubr.f32.mxu0 %v392_v5  ;;  %4604 = vmatpush3.msra.mxu0 %v4062_v6  ;;  %v6283_v5 = vrot.slane %v6259_v58, 1  ;;  %v406_v6 = vrot.slane %v367_v60, 1  ;;  %v6361_v60 = vsel %vm419_vm1, %v6242_v49, %v1189_v50 }
  0x3f   : > { %5286 = vmatpush3.msra.mxu1 %v4095_v4  ;;  %578 = vmatmul.mubr.f32.gmra.mxu0 %v6097_v47  ;;  %v4086_v4 = vld [vmem:[%s8272_s3 + $0x2b0] sm:$0xff] }
  0x40   : > { %4605 = vmatprep.subr.mxu0 %v4077_v9  ;;  %5287 = vmatprep.subr.mxu1 %v4094_v10  ;;  %v4053_v9 = vld [vmem:[%s8272_s3 + $0x1a8] sm:$0xff] }
  0x41   : > { %4606 = vmatpush3.msra.mxu0 %v4061_v11  ;;  %5288 = vmatpush3.msra.mxu1 %v4094_v10  ;;  %v6290_v10 = vrot.slane %v6259_v58, 2  ;;  %v1148_v11 = vrot.slane %v4097_v8, 1 }
  0x42   : > { %4607 = vmatprep.subr.mxu0 %v4076_v14  ;;  %5289 = vmatprep.subr.mxu1 %v4093_v17  ;;  %v4099_v14 = vld [vmem:[%s6056_s26 + $0x38] sm:$0x3] }
  0x43   : > { %582 = vmatprep.mubr.f32.mxu0 %v395_v18  ;;  %4608 = vmatpush3.msra.mxu0 %v4060_v19  ;;  %v369_v18 = vld [vmem:[%s6056_s26 + $0x78] sm:$0x3]  ;;  %v1183_v19 = vrot.slane %v4099_v14, 2  ;;  %v1151_v21 = vrot.slane %v4099_v14, 1  ;;  %v6302_v24 = vsel %vm386_vm0, %v6145_v7, %v1148_v11  ;;  %v4065_v11 = vld [vmem:[%s8272_s3 + $0x208] sm:$0xff] }
  0x44   : > { %5290 = vmatpush3.msra.mxu1 %v4093_v17  ;;  %583 = vmatmul.mubr.f32.gmra.mxu0 %v6126_v0  ;;  %v6294_v17 = vld [vmem:[%s6056_s26 + $0x70] sm:$0xff] }
  0x45   : > { %4609 = vmatprep.subr.mxu0 %v4075_v22  ;;  %5291 = vmatprep.subr.mxu1 %v4092_v25  ;;  %v4068_v22 = vld [vmem:[%s8272_s3 + $0x220] sm:$0xff]  ;;  %v6316_v29 = vsel %vm419_vm1, %v6176_v20, %v1183_v19  ;;  %v6335_v41 = vrot.slane %v6294_v17, 1  ;;  %v4049_v19 = vld [vmem:[%s8272_s3 + $0x188] sm:$0xff] }
  0x46   : > { %5276 = vmatprep.mubr.f32.mxu1 %v428_v26  ;;  %4610 = vmatpush3.msra.mxu0 %v4059_v27  ;;  %v4085_v26 = vld [vmem:[%s8272_s3 + $0x2a8] sm:$0xff]  ;;  %v407_v27 = vsel %vm386_vm0, %v6283_v5, %v406_v6  ;;  %v4050_v6 = vld [vmem:[%s8272_s3 + $0x190] sm:$0xff] }
  0x47   : > { %5292 = vmatpush3.msra.mxu1 %v4092_v25  ;;  %4611 = vmatprep.subr.mxu0 %v4074_v31  ;;  %v6306_v25 = vsel %vm419_vm1, %v6164_v15, %v1180_v13  ;;  %v4101_v31 = vld [vmem:[%s6056_s26 + $0x48] sm:$0x3] }
  0x48   : > { %5277 = vmatmul.mubr.f32.gmra.mxu1 %v431_v30  ;;  %5293 = vmatprep.subr.mxu1 %v4091_v32  ;;  %v6320_v30 = vsel %vm386_vm0, %v6182_v23, %v1151_v21  ;;  %v1154_v36 = vrot.slane %v4101_v31, 1  ;;  %v4035_v21 = vld [vmem:[%s6056_s26 + $0x28] sm:$0x3] }
  0x49   : > { %587 = vmatprep.mubr.f32.mxu0 %v398_v33  ;;  %4612 = vmatpush3.msra.mxu0 %v4058_v34  ;;  %v6327_v33 = vrot.slane %v6294_v17, 2  ;;  %v442_v34 = vrot.slane %v369_v18, 2 }
  0x4a   : > { %5294 = vmatpush3.msra.mxu1 %v4091_v32  ;;  %588 = vmatmul.mubr.f32.gmra.mxu0 %v6157_v12  ;;  %v4052_v32 = vld [vmem:[%s8272_s3 + $0x1a0] sm:$0xff] }
  0x4b   : > { %4613 = vmatprep.subr.mxu0 %v4073_v37  ;;  %5295 = vmatprep.subr.mxu1 %v4090_v38  ;;  %v1186_v37 = vrot.slane %v4101_v31, 2  ;;  %v4081_v31 = vld [vmem:[%s8272_s3 + $0x288] sm:$0xff] }
  0x4c   : > { %4614 = vmatpush3.msra.mxu0 %v4057_v39  ;;  %5296 = vmatpush3.msra.mxu1 %v4090_v38  ;;  %v4067_v38 = vld [vmem:[%s8272_s3 + $0x218] sm:$0xff]  ;;  %v440_v39 = vsel %vm419_vm1, %v6290_v10, %v439_v16 }
  0x4d   : > { %4615 = vmatprep.subr.mxu0 %v4072_v42  ;;  %5297 = vmatprep.subr.mxu1 %v4089_v45  ;;  %v409_v42 = vrot.slane %v369_v18, 1  ;;  %v4082_v18 = vld [vmem:[%s8272_s3 + $0x290] sm:$0xff] }
  0x4e   : > { %592 = vmatprep.mubr.f32.mxu0 %v401_v46  ;;  %4616 = vmatpush3.msra.mxu0 %v4056_v48  ;;  %v6343_v46 = vsel %vm386_vm0, %v6211_v35, %v1154_v36  ;;  %v6347_v48 = vsel %vm419_vm1, %v6230_v43, %v1186_v37  ;;  %v803_v37 = vrot.slane %v4035_v21, 2 }
  0x4f   : > { %5298 = vmatpush3.msra.mxu1 %v4089_v45  ;;  %593 = vmatmul.mubr.f32.gmra.mxu0 %v6193_v28  ;;  %v4084_v45 = vld [vmem:[%s8272_s3 + $0x2a0] sm:$0xff] }
  0x50   : > { %4617 = vmatprep.subr.mxu0 %v4071_v51  ;;  %5299 = vmatprep.subr.mxu1 %v4088_v54  ;;  %v1157_v51 = vrot.slane %v4103_v44, 1  ;;  %v4127_v44 = vld [vmem:[%s8272_s3 + $0x378] sm:$0xff]  ;;  %v804_v50 = vsel %vm419_vm1, %v6164_v15, %v803_v37 }
  0x51   : > { %5279 = vmatprep.mubr.f32.mxu1 %v434_v55  ;;  %4618 = vmatpush3.msra.mxu0 %v4055_v57  ;;  %v4066_v55 = vld [vmem:[%s8272_s3 + $0x210] sm:$0xff]  ;;  %v4033_v57 = vld [vmem:[%s6056_s26 + $0x18] sm:$0x3] }
  0x52   : > { %5300 = vmatpush3.msra.mxu1 %v4088_v54  ;;  %4619 = vmatprep.subr.mxu0 %v4070_v62  ;;  %v443_v54 = vsel %vm419_vm1, %v6327_v33, %v442_v34  ;;  %v4105_v62 = vld [vmem:[%s6056_s26 + $0x68] sm:$0x3]  ;;  %v768_v13 = vrot.slane %v4033_v57, 1  ;;  %v800_v34 = vrot.slane %v4033_v57, 2 }
  0x53   : > { %5280 = vmatmul.mubr.f32.gmra.mxu1 %v437_v61  ;;  %5301 = vmatprep.subr.mxu1 %v4087_v63  ;;  %v6365_v61 = vsel %vm386_vm0, %v6248_v52, %v1157_v51  ;;  %v4142_v51 = vld [vmem:[%s8272_s3 + $0x3f0] sm:$0xff]  ;;  %v4039_v57 = vld [vmem:[%s6056_s26 + $0x48] sm:$0x3] }
  0x54   : > { %597 = vmatprep.mubr.f32.mxu0 %v404_v1  ;;  %4620 = vmatpush3.msra.mxu0 %v4054_v2  ;;  %v410_v1 = vsel %vm386_vm0, %v6335_v41, %v409_v42  ;;  %v1160_v2 = vrot.slane %v4105_v62, 1  ;;  %v769_v36 = vsel %vm386_vm0, %v390_v59, %v768_v13  ;;  %v4143_v42 = vld [vmem:[%s8272_s3 + $0x3f8] sm:$0xff]  ;;  %v801_v59 = vsel %vm419_vm1, %v423_v56, %v800_v34  ;;  %v4043_v34 = vld [vmem:[%s6056_s26 + $0x68] sm:$0x3] }
  0x55   : > { %5302 = vmatpush3.msra.mxu1 %v4087_v63  ;;  %598 = vmatmul.mubr.f32.gmra.mxu0 %v6223_v40  ;;  %v4083_v63 = vld [vmem:[%s8272_s3 + $0x298] sm:$0xff] }
  0x56   : > { %4621 = vmatprep.subr.mxu0 %v4069_v3  ;;  %5303 = vmatprep.subr.mxu1 %v4086_v4  ;;  %v1192_v3 = vrot.slane %v4105_v62, 2  ;;  %v6382_v14 = vsel %vm386_vm0, %v6283_v5, %v1160_v2  ;;  %v4159_v56 = vld [vmem:[%s8272_s3 + $0x478] sm:$0xff]  ;;  %v4140_v62 = vld [vmem:[%s8272_s3 + $0x3e0] sm:$0xff] }
  0x57   : > { %4622 = vmatpush3.msra.mxu0 %v4053_v9  ;;  %5304 = vmatpush3.msra.mxu1 %v4086_v4  ;;  %v4107_v4 = vld [vmem:[%s6056_s26 + $0x78] sm:$0x3] }
  0x58   : > { %4623 = vmatprep.subr.mxu0 %v4068_v22  ;;  %5305 = vmatprep.subr.mxu1 %v4085_v26  ;;  %v1195_v8 = vrot.slane %v4107_v4, 2  ;;  %v1163_v9 = vrot.slane %v4107_v4, 1  ;;  %v6386_v16 = vsel %vm419_vm1, %v6290_v10, %v1192_v3  ;;  %v4124_v3 = vld [vmem:[%s8272_s3 + $0x360] sm:$0xff]  ;;  %v809_v4 = vrot.slane %v4039_v57, 2  ;;  %v4041_v13 = vld [vmem:[%s6056_s26 + $0x58] sm:$0x3] }
  0x59   : > { %602 = vmatprep.mubr.f32.mxu0 %v407_v27  ;;  %4624 = vmatpush3.msra.mxu0 %v4052_v32  ;;  %v4064_v27 = vld [vmem:[%s8272_s3 + $0x200] sm:$0xff]  ;;  %v812_v37 = vrot.slane %v4041_v13, 2 }
  0x5a   : > { %5306 = vmatpush3.msra.mxu1 %v4085_v26  ;;  %603 = vmatmul.mubr.f32.gmra.mxu0 %v6259_v58  ;;  %v6397_v22 = vsel %vm419_vm1, %v6327_v33, %v1195_v8  ;;  %v6401_v26 = vsel %vm386_vm0, %v6335_v41, %v1163_v9  ;;  %v4048_v32 = vld [vmem:[%s8272_s3 + $0x180] sm:$0xff]  ;;  %v777_v8 = vrot.slane %v4039_v57, 1 }
  0x5b   : > { %4625 = vmatprep.subr.mxu0 %v4067_v38  ;;  %5307 = vmatprep.subr.mxu1 %v4084_v45  ;;  %v4080_v38 = vld [vmem:[%s8272_s3 + $0x280] sm:$0xff] }
  0x5c   : > { %5282 = vmatprep.mubr.f32.mxu1 %v440_v39  ;;  %4626 = vmatpush3.msra.mxu0 %v4051_v53  ;;  %v771_v39 = vrot.slane %v4035_v21, 1  ;;  %v778_v21 = vsel %vm386_vm0, %v6211_v35, %v777_v8  ;;  %v4121_v35 = vld [vmem:[%s8272_s3 + $0x348] sm:$0xff]  ;;  %v6549_v57 = vld [vmem:[%s6056_s26 + $0x80] sm:$0xff] }
  0x5d   : > { %5308 = vmatpush3.msra.mxu1 %v4084_v45  ;;  %4627 = vmatprep.subr.mxu0 %v4066_v55  ;;  %v4037_v45 = vld [vmem:[%s6056_s26 + $0x38] sm:$0x3]  ;;  %v4158_v55 = vld [vmem:[%s8272_s3 + $0x470] sm:$0xff] }
  0x5e   : > { %5283 = vmatmul.mubr.f32.gmra.mxu1 %v443_v54  ;;  %5309 = vmatprep.subr.mxu1 %v4083_v63  ;;  %v772_v53 = vsel %vm386_vm0, %v6145_v7, %v771_v39  ;;  %v774_v15 = vrot.slane %v4037_v45, 1  ;;  %v4141_v54 = vld [vmem:[%s8272_s3 + $0x3e8] sm:$0xff] }
  0x5f   : > { %607 = vmatprep.mubr.f32.mxu0 %v410_v1  ;;  %4628 = vmatpush3.msra.mxu0 %v4050_v6  ;;  %v4125_v7 = vld [vmem:[%s8272_s3 + $0x368] sm:$0xff]  ;;  %v4139_v6 = vld [vmem:[%s8272_s3 + $0x3d8] sm:$0xff] }
  0x60   : > { %5310 = vmatpush3.msra.mxu1 %v4083_v63  ;;  %608 = vmatmul.mubr.f32.gmra.mxu0 %v6294_v17  ;;  %v806_v63 = vrot.slane %v4037_v45, 2  ;;  %v4157_v1 = vld [vmem:[%s8272_s3 + $0x468] sm:$0xff]  ;;  %v775_v2 = vsel %vm386_vm0, %v6182_v23, %v774_v15  ;;  %v4156_v23 = vld [vmem:[%s8272_s3 + $0x460] sm:$0xff]  ;;  %v783_v45 = vrot.slane %v4043_v34, 1 }
  0x61   : > { %4629 = vmatprep.subr.mxu0 %v4065_v11  ;;  %5311 = vmatprep.subr.mxu1 %v4082_v18  ;;  %v4123_v11 = vld [vmem:[%s8272_s3 + $0x358] sm:$0xff] }
  0x62   : > { %4630 = vmatpush3.msra.mxu0 %v4049_v19  ;;  %5312 = vmatpush3.msra.mxu1 %v4082_v18  ;;  %v807_v9 = vsel %vm419_vm1, %v6176_v20, %v806_v63  ;;  %v810_v18 = vsel %vm419_vm1, %v6230_v43, %v809_v4  ;;  %v4138_v19 = vld [vmem:[%s8272_s3 + $0x3d0] sm:$0xff]  ;;  %v4155_v20 = vld [vmem:[%s8272_s3 + $0x458] sm:$0xff]  ;;  %v784_v15 = vsel %vm386_vm0, %v6283_v5, %v783_v45  ;;  %v4117_v5 = vld [vmem:[%s8272_s3 + $0x328] sm:$0xff] }
  0x63   : > { %4631 = vmatprep.subr.mxu0 %v4064_v27  ;;  %5313 = vmatprep.subr.mxu1 %v4081_v31  ;;  %v4122_v43 = vld [vmem:[%s8272_s3 + $0x350] sm:$0xff]  ;;  %v780_v27 = vrot.slane %v4041_v13, 1  ;;  %v4132_v63 = vld [vmem:[%s8272_s3 + $0x3a0] sm:$0xff] }
  0x64   : > { %4632 = vmatpush3.msra.mxu0 %v4048_v32  ;;  %952 = vmatprep.mubr.f32.mxu0 %v769_v36  ;;  %v4154_v32 = vld [vmem:[%s8272_s3 + $0x450] sm:$0xff]  ;;  %v4136_v36 = vld [vmem:[%s8272_s3 + $0x3c0] sm:$0xff] }
  0x65   : > { %5314 = vmatpush3.msra.mxu1 %v4081_v31  ;;  %953 = vmatmul.mubr.f32.vlgmr.msra.gmra.mxu0 %v6097_v47  ;;  %v4126_v47 = vld [vmem:[%s8272_s3 + $0x370] sm:$0xff]  ;;  %v4137_v31 = vld [vmem:[%s8272_s3 + $0x3c8] sm:$0xff]  ;;  %v781_v39 = vsel %vm386_vm0, %v6248_v52, %v780_v27  ;;  %v4152_v52 = vld [vmem:[%s8272_s3 + $0x440] sm:$0xff] }
  0x66   : > { %5315 = vmatprep.subr.mxu1 %v4080_v38  ;;  %4681 = vmatprep.subr.mxu0 %v4143_v42  ;;  %v4120_v42 = vld [vmem:[%s8272_s3 + $0x340] sm:$0xff]  ;;  %v4129_v27 = vld [vmem:[%s8272_s3 + $0x388] sm:$0xff] }
  0x67   : > { %5316 = vmatpush3.msra.mxu1 %v4080_v38  ;;  %5317 = vmatprep.mubr.f32.mxu1 %v801_v59  ;;  %v4153_v38 = vld [vmem:[%s8272_s3 + $0x448] sm:$0xff]  ;;  %v815_v59 = vrot.slane %v4043_v34, 2  ;;  %v4116_v4 = vld [vmem:[%s8272_s3 + $0x320] sm:$0xff] }
  0x68   : > { %4682 = vmatpush3.msra.mxu0 %v4127_v44  ;;  %5318 = vmatmul.mubr.f32.vlgmr.msra.gmra.mxu1 %v804_v50  ;;  %v4135_v44 = vld [vmem:[%s8272_s3 + $0x3b8] sm:$0xff]  ;;  %v813_v50 = vsel %vm419_vm1, %v6242_v49, %v812_v37  ;;  %v4145_v34 = vld [vmem:[%s8272_s3 + $0x408] sm:$0xff]  ;;  %v4144_v37 = vld [vmem:[%s8272_s3 + $0x400] sm:$0xff] }
  0x69   : > { %4683 = vmatprep.subr.mxu0 %v4142_v51  ;;  %5329 = vmatprep.subr.mxu1 %v4159_v56  ;;  %v4119_v51 = vld [vmem:[%s8272_s3 + $0x338] sm:$0xff]  ;;  %v4172_v45 = vld [vmem:[%s8272_s3 + $0x4e0] sm:$0xff] }
  0x6a   : > { %957 = vmatprep.mubr.f32.mxu0 %v772_v53  ;;  %4684 = vmatpush3.msra.mxu0 %v4126_v47  ;;  %v816_v53 = vsel %vm419_vm1, %v6290_v10, %v815_v59  ;;  %v4134_v47 = vld [vmem:[%s8272_s3 + $0x3b0] sm:$0xff]  ;;  %v4151_v49 = vld [vmem:[%s8272_s3 + $0x438] sm:$0xff] }
  0x6b   : > { %5330 = vmatpush3.msra.mxu1 %v4159_v56  ;;  %958 = vmatmul.mubr.f32.gmra.mxu0 %v6126_v0  ;;  %v4045_v56 = vld [vmem:[%s6056_s26 + $0x78] sm:$0x3]  ;;  %v4118_v10 = vld [vmem:[%s8272_s3 + $0x330] sm:$0xff] }
  0x6c   : > { %4685 = vmatprep.subr.mxu0 %v4141_v54  ;;  %5331 = vmatprep.subr.mxu1 %v4158_v55  ;;  %v786_v54 = vrot.slane %v4045_v56, 1  ;;  %v4207_v59 = vld [vmem:[%s8272_s3 + $0x5f8] sm:$0xff] }
  0x6d   : > { %4686 = vmatpush3.msra.mxu0 %v4125_v7  ;;  %5332 = vmatpush3.msra.mxu1 %v4158_v55  ;;  %v4133_v55 = vld [vmem:[%s8272_s3 + $0x3a8] sm:$0xff]  ;;  %v4150_v7 = vld [vmem:[%s8272_s3 + $0x430] sm:$0xff] }
  0x6e   : > { %4687 = vmatprep.subr.mxu0 %v4140_v62  ;;  %5333 = vmatprep.subr.mxu1 %v4157_v1  ;;  %v4047_v62 = vld [vmem:[%s6056_s26 + $0x88] sm:$0x3] }
  0x6f   : > { %962 = vmatprep.mubr.f32.mxu0 %v775_v2  ;;  %4688 = vmatpush3.msra.mxu0 %v4124_v3  ;;  %v4149_v2 = vld [vmem:[%s8272_s3 + $0x428] sm:$0xff]  ;;  %v787_v3 = vsel %vm386_vm0, %v6335_v41, %v786_v54  ;;  %v821_v8 = vrot.slane %v4047_v62, 2  ;;  %v4148_v41 = vld [vmem:[%s8272_s3 + $0x420] sm:$0xff]  ;;  %v4199_v54 = vld [vmem:[%s8272_s3 + $0x5b8] sm:$0xff] }
  0x70   : > { %5334 = vmatpush3.msra.mxu1 %v4157_v1  ;;  %963 = vmatmul.mubr.f32.gmra.mxu0 %v6157_v12  ;;  %v818_v1 = vrot.slane %v4045_v56, 2  ;;  %v4202_v56 = vld [vmem:[%s8272_s3 + $0x5d0] sm:$0xff] }
  0x71   : > { %4689 = vmatprep.subr.mxu0 %v4139_v6  ;;  %5335 = vmatprep.subr.mxu1 %v4156_v23  ;;  %v820_v6 = vrot.slane %v6549_v57, 2 }
  0x72   : > { %5320 = vmatprep.mubr.f32.mxu1 %v807_v9  ;;  %4690 = vmatpush3.msra.mxu0 %v4123_v11  ;;  %v788_v9 = vrot.slane %v6549_v57, 1  ;;  %v789_v11 = vrot.slane %v4047_v62, 1  ;;  %v819_v13 = vsel %vm419_vm1, %v6327_v33, %v818_v1  ;;  %v4147_v33 = vld [vmem:[%s8272_s3 + $0x418] sm:$0xff]  ;;  %v4110_v62 = vld [vmem:[%s6056_s26 + $0x90] sm:$0xff] }
  0x73   : > { %5336 = vmatpush3.msra.mxu1 %v4156_v23  ;;  %4691 = vmatprep.subr.mxu0 %v4138_v19  ;;  %v4131_v23 = vld [vmem:[%s8272_s3 + $0x398] sm:$0xff]  ;;  %v822_v19 = vsel %vm419_vm1, %v820_v6, %v821_v8 }
  0x74   : > { %5321 = vmatmul.mubr.f32.gmra.mxu1 %v810_v18  ;;  %5337 = vmatprep.subr.mxu1 %v4155_v20  ;;  %v4115_v18 = vld [vmem:[%s8272_s3 + $0x318] sm:$0xff] }
  0x75   : > { %967 = vmatprep.mubr.f32.mxu0 %v778_v21  ;;  %4692 = vmatpush3.msra.mxu0 %v4122_v43  ;;  %v790_v21 = vsel %vm386_vm0, %v788_v9, %v789_v11  ;;  %v4114_v43 = vld [vmem:[%s8272_s3 + $0x310] sm:$0xff] }
  0x76   : > { %5338 = vmatpush3.msra.mxu1 %v4155_v20  ;;  %968 = vmatmul.mubr.f32.gmra.mxu0 %v6193_v28  ;;  %v4130_v20 = vld [vmem:[%s8272_s3 + $0x390] sm:$0xff] }
  0x77   : > { %4693 = vmatprep.subr.mxu0 %v4137_v31  ;;  %5339 = vmatprep.subr.mxu1 %v4154_v32  ;;  %v4146_v31 = vld [vmem:[%s8272_s3 + $0x410] sm:$0xff] }
  0x78   : > { %4694 = vmatpush3.msra.mxu0 %v4121_v35  ;;  %5340 = vmatpush3.msra.mxu1 %v4154_v32  ;;  %v4113_v32 = vld [vmem:[%s8272_s3 + $0x308] sm:$0xff]  ;;  %v4128_v35 = vld [vmem:[%s8272_s3 + $0x380] sm:$0xff] }
  0x79   : > { %4695 = vmatprep.subr.mxu0 %v4136_v36  ;;  %5341 = vmatprep.subr.mxu1 %v4153_v38  ;;  %v4112_v36 = vld [vmem:[%s8272_s3 + $0x300] sm:$0xff] }
  0x7a   : > { %972 = vmatprep.mubr.f32.mxu0 %v781_v39  ;;  %4696 = vmatpush3.msra.mxu0 %v4120_v42  ;;  %v4175_v39 = vld [vmem:[%s8272_s3 + $0x4f8] sm:$0xff]  ;;  %v4190_v42 = vld [vmem:[%s8272_s3 + $0x570] sm:$0xff] }
  0x7b   : > { %5342 = vmatpush3.msra.mxu1 %v4153_v38  ;;  %973 = vmatmul.mubr.f32.gmra.mxu0 %v6223_v40  ;;  %v4191_v38 = vld [vmem:[%s8272_s3 + $0x578] sm:$0xff] }
  0x7c   : > { %4697 = vmatprep.subr.mxu0 %v4135_v44  ;;  %5343 = vmatprep.subr.mxu1 %v4152_v52  ;;  %v4206_v44 = vld [vmem:[%s8272_s3 + $0x5f0] sm:$0xff] }
  0x7d   : > { %5323 = vmatprep.mubr.f32.mxu1 %v813_v50  ;;  %4698 = vmatpush3.msra.mxu0 %v4119_v51  ;;  %v4171_v50 = vld [vmem:[%s8272_s3 + $0x4d8] sm:$0xff]  ;;  %v4186_v51 = vld [vmem:[%s8272_s3 + $0x550] sm:$0xff] }
  0x7e   : > { %5344 = vmatpush3.msra.mxu1 %v4152_v52  ;;  %4699 = vmatprep.subr.mxu0 %v4134_v47  ;;  %v4187_v52 = vld [vmem:[%s8272_s3 + $0x558] sm:$0xff]  ;;  %v4168_v47 = vld [vmem:[%s8272_s3 + $0x4c0] sm:$0xff] }
  0x7f   : > { %5324 = vmatmul.mubr.f32.gmra.mxu1 %v816_v53  ;;  %5345 = vmatprep.subr.mxu1 %v4151_v49  ;;  %v4169_v53 = vld [vmem:[%s8272_s3 + $0x4c8] sm:$0xff] }
  0x80   : > { %977 = vmatprep.mubr.f32.mxu0 %v784_v15  ;;  %4700 = vmatpush3.msra.mxu0 %v4118_v10  ;;  %v4167_v15 = vld [vmem:[%s8272_s3 + $0x4b8] sm:$0xff]  ;;  %v4109_v10 = vld [vmem:[%s6056_s26 + $0x88] sm:$0x3] }
  0x81   : > { %5346 = vmatpush3.msra.mxu1 %v4151_v49  ;;  %978 = vmatmul.mubr.f32.gmra.mxu0 %v6259_v58  ;;  %v4183_v49 = vld [vmem:[%s8272_s3 + $0x538] sm:$0xff]  ;;  %v1198_v1 = vrot.slane %v4109_v10, 2 }
  0x82   : > { %4701 = vmatprep.subr.mxu0 %v4133_v55  ;;  %5347 = vmatprep.subr.mxu1 %v4150_v7  ;;  %v1166_v55 = vrot.slane %v4109_v10, 1  ;;  %v1501_v10 = vld [vmem:[%s6764_s30 + $0x38] sm:$0x3] }
  0x83   : > { %4702 = vmatpush3.msra.mxu0 %v4117_v5  ;;  %5348 = vmatpush3.msra.mxu1 %v4150_v7  ;;  %v4198_v7 = vld [vmem:[%s8272_s3 + $0x5b0] sm:$0xff]  ;;  %v4165_v5 = vld [vmem:[%s8272_s3 + $0x4a8] sm:$0xff] }
  0x84   : > { %4703 = vmatprep.subr.mxu0 %v4132_v63  ;;  %5349 = vmatprep.subr.mxu1 %v4149_v2  ;;  %v4111_v63 = vld [vmem:[%s6056_s26 + $0x98] sm:$0x3] }
  0x85   : > { %982 = vmatprep.mubr.f32.mxu0 %v787_v3  ;;  %4704 = vmatpush3.msra.mxu0 %v4116_v4  ;;  %v4164_v3 = vld [vmem:[%s8272_s3 + $0x4a0] sm:$0xff]  ;;  %v1200_v4 = vrot.slane %v4110_v62, 2  ;;  %v1201_v8 = vrot.slane %v4111_v63, 2  ;;  %v1169_v11 = vrot.slane %v4111_v63, 1  ;;  %v4251_v63 = vld [vmem:[%s8272_s3 + $0x6d8] sm:$0xff] }
  0x86   : > { %5350 = vmatpush3.msra.mxu1 %v4149_v2  ;;  %983 = vmatmul.mubr.f32.gmra.mxu0 %v6294_v17  ;;  %v1167_v2 = vsel %vm386_vm0, %v788_v9, %v1166_v55  ;;  %v4196_v9 = vld [vmem:[%s8272_s3 + $0x5a0] sm:$0xff]  ;;  %v4269_v55 = vld [vmem:[%s8272_s3 + $0x768] sm:$0xff] }
  0x87   : > { %4705 = vmatprep.subr.mxu0 %v4131_v23  ;;  %5351 = vmatprep.subr.mxu1 %v4148_v41  ;;  %v1168_v23 = vrot.slane %v4110_v62, 1 }
  0x88   : > { %5326 = vmatprep.mubr.f32.mxu1 %v819_v13  ;;  %4706 = vmatpush3.msra.mxu0 %v4115_v18  ;;  %v4163_v13 = vld [vmem:[%s8272_s3 + $0x498] sm:$0xff]  ;;  %v1202_v18 = vsel %vm419_vm1, %v1200_v4, %v1201_v8  ;;  %v6892_v4 = vld [vmem:[%s6764_s30 + $0x40] sm:$0xff]  ;;  %v1503_v8 = vld [vmem:[%s6764_s30 + $0x48] sm:$0x3] }
  0x89   : > { %5352 = vmatpush3.msra.mxu1 %v4148_v41  ;;  %4707 = vmatprep.subr.mxu0 %v4130_v20  ;;  %v1199_v41 = vsel %vm419_vm1, %v820_v6, %v1198_v1  ;;  %v1494_v20 = vld [vmem:[%s6764_s30] sm:$0xff]  ;;  %v4195_v6 = vld [vmem:[%s8272_s3 + $0x598] sm:$0xff]  ;;  %v1536_v1 = vrot.slane %v1501_v10, 1 }
  0x8a   : > { %5327 = vmatmul.mubr.f32.gmra.mxu1 %v822_v19  ;;  %5353 = vmatprep.subr.mxu1 %v4147_v33  ;;  %v4178_v19 = vld [vmem:[%s8272_s3 + $0x510] sm:$0xff] }
  0x8b   : > { %987 = vmatprep.mubr.f32.mxu0 %v790_v21  ;;  %4708 = vmatpush3.msra.mxu0 %v4114_v43  ;;  %v1170_v21 = vsel %vm386_vm0, %v1168_v23, %v1169_v11  ;;  %v4177_v43 = vld [vmem:[%s8272_s3 + $0x508] sm:$0xff]  ;;  %v4250_v23 = vld [vmem:[%s8272_s3 + $0x6d0] sm:$0xff]  ;;  %v4267_v11 = vld [vmem:[%s8272_s3 + $0x758] sm:$0xff] }
  0x8c   : > { %5354 = vmatpush3.msra.mxu1 %v4147_v33  ;;  %988 = vmatmul.mubr.f32.gmra.mxu0 %v6549_v57  ;;  %v1495_v33 = vld [vmem:[%s6764_s30 + $0x8] sm:$0x3] }
  0x8d   : > { %4709 = vmatprep.subr.mxu0 %v4129_v27  ;;  %5355 = vmatprep.subr.mxu1 %v4146_v31  ;;  %v4194_v27 = vld [vmem:[%s8272_s3 + $0x590] sm:$0xff] }
  0x8e   : > { %4710 = vmatpush3.msra.mxu0 %v4113_v32  ;;  %5356 = vmatpush3.msra.mxu1 %v4146_v31  ;;  %v1526_v31 = vrot.slane %v1494_v20, 1  ;;  %v1527_v32 = vrot.slane %v1495_v33, 1 }
  0x8f   : > { %4711 = vmatprep.subr.mxu0 %v4128_v35  ;;  %5357 = vmatprep.subr.mxu1 %v4145_v34  ;;  %v4161_v35 = vld [vmem:[%s8272_s3 + $0x488] sm:$0xff] }
  0x90   : > { %4712 = vmatpush3.msra.mxu0 %v4112_v36  ;;  %1332 = vmatprep.mubr.f32.mxu0 %v6302_v24  ;;  %v4174_v24 = vld [vmem:[%s8272_s3 + $0x4f0] sm:$0xff]  ;;  %v1497_v36 = vld [vmem:[%s6764_s30 + $0x18] sm:$0x3] }
  0x91   : > { %5358 = vmatpush3.msra.mxu1 %v4145_v34  ;;  %1333 = vmatmul.mubr.f32.vlgmr.msra.gmra.mxu0 %v6126_v0  ;;  %v4189_v0 = vld [vmem:[%s8272_s3 + $0x568] sm:$0xff]  ;;  %v6799_v34 = vld [vmem:[%s6764_s30 + $0x10] sm:$0xff] }
  0x92   : > { %5359 = vmatprep.subr.mxu1 %v4144_v37  ;;  %4761 = vmatprep.subr.mxu0 %v4191_v38  ;;  %v4193_v38 = vld [vmem:[%s8272_s3 + $0x588] sm:$0xff] }
  0x93   : > { %5360 = vmatpush3.msra.mxu1 %v4144_v37  ;;  %5361 = vmatprep.mubr.f32.mxu1 %v6306_v25  ;;  %v4173_v25 = vld [vmem:[%s8272_s3 + $0x4e8] sm:$0xff]  ;;  %v4176_v37 = vld [vmem:[%s8272_s3 + $0x500] sm:$0xff] }
  0x94   : > { %4762 = vmatpush3.msra.mxu0 %v4175_v39  ;;  %5362 = vmatmul.mubr.f32.vlgmr.msra.gmra.mxu1 %v6316_v29  ;;  %v4188_v29 = vld [vmem:[%s8272_s3 + $0x560] sm:$0xff] }
  0x95   : > { %4763 = vmatprep.subr.mxu0 %v4190_v42  ;;  %5373 = vmatprep.subr.mxu1 %v4207_v59  ;;  %v4160_v39 = vld [vmem:[%s8272_s3 + $0x480] sm:$0xff]  ;;  %v1558_v42 = vrot.slane %v1494_v20, 2 }
  0x96   : > { %1337 = vmatprep.mubr.f32.mxu0 %v6320_v30  ;;  %4764 = vmatpush3.msra.mxu0 %v4174_v24  ;;  %v4205_v30 = vld [vmem:[%s8272_s3 + $0x5e8] sm:$0xff]  ;;  %v1528_v24 = vsel %vm386_vm0, %v1526_v31, %v1527_v32 }
  0x97   : > { %5374 = vmatpush3.msra.mxu1 %v4207_v59  ;;  %1338 = vmatmul.mubr.f32.gmra.mxu0 %v6157_v12  ;;  %v4204_v12 = vld [vmem:[%s8272_s3 + $0x5e0] sm:$0xff]  ;;  %v1559_v59 = vrot.slane %v1495_v33, 2  ;;  %v4233_v33 = vld [vmem:[%s8272_s3 + $0x648] sm:$0xff] }
  0x98   : > { %4765 = vmatprep.subr.mxu0 %v4189_v0  ;;  %5375 = vmatprep.subr.mxu1 %v4206_v44  ;;  %v1561_v0 = vrot.slane %v6799_v34, 2  ;;  %v4265_v31 = vld [vmem:[%s8272_s3 + $0x748] sm:$0xff] }
  0x99   : > { %4766 = vmatpush3.msra.mxu0 %v4173_v25  ;;  %5376 = vmatpush3.msra.mxu1 %v4206_v44  ;;  %v1562_v44 = vrot.slane %v1497_v36, 2  ;;  %v4192_v25 = vld [vmem:[%s8272_s3 + $0x580] sm:$0xff] }
  0x9a   : > { %4767 = vmatprep.subr.mxu0 %v4188_v29  ;;  %5377 = vmatprep.subr.mxu1 %v4205_v30  ;;  %v1529_v29 = vrot.slane %v6799_v34, 1 }
  0x9b   : > { %1342 = vmatprep.mubr.f32.mxu0 %v6343_v46  ;;  %4768 = vmatpush3.msra.mxu0 %v4172_v45  ;;  %v4203_v46 = vld [vmem:[%s8272_s3 + $0x5d8] sm:$0xff] }
  0x9c   : > { %5378 = vmatpush3.msra.mxu1 %v4205_v30  ;;  %1343 = vmatmul.mubr.f32.gmra.mxu0 %v6193_v28  ;;  %v4170_v28 = vld [vmem:[%s8272_s3 + $0x4d0] sm:$0xff]  ;;  %v1530_v30 = vrot.slane %v1497_v36, 1  ;;  %v4255_v45 = vld [vmem:[%s8272_s3 + $0x6f8] sm:$0xff] }
  0x9d   : > { %4769 = vmatprep.subr.mxu0 %v4187_v52  ;;  %5379 = vmatprep.subr.mxu1 %v4204_v12  ;;  %v1560_v52 = vsel %vm419_vm1, %v1558_v42, %v1559_v59  ;;  %v4264_v59 = vld [vmem:[%s8272_s3 + $0x740] sm:$0xff] }
  0x9e   : > { %5364 = vmatprep.mubr.f32.mxu1 %v6347_v48  ;;  %4770 = vmatpush3.msra.mxu0 %v4171_v50  ;;  %v4185_v48 = vld [vmem:[%s8272_s3 + $0x548] sm:$0xff]  ;;  %v6825_v50 = vld [vmem:[%s6764_s30 + $0x20] sm:$0xff] }
  0x9f   : > { %5380 = vmatpush3.msra.mxu1 %v4204_v12  ;;  %4771 = vmatprep.subr.mxu0 %v4186_v51  ;;  %v4239_v12 = vld [vmem:[%s8272_s3 + $0x678] sm:$0xff]  ;;  %v1499_v51 = vld [vmem:[%s6764_s30 + $0x28] sm:$0x3] }
  0xa0   : > { %5365 = vmatmul.mubr.f32.gmra.mxu1 %v6361_v60  ;;  %5381 = vmatprep.subr.mxu1 %v4203_v46  ;;  %v4184_v60 = vld [vmem:[%s8272_s3 + $0x540] sm:$0xff] }
  0xa1   : > { %1347 = vmatprep.mubr.f32.mxu0 %v6365_v61  ;;  %4772 = vmatpush3.msra.mxu0 %v4170_v28  ;;  %v4201_v61 = vld [vmem:[%s8272_s3 + $0x5c8] sm:$0xff]  ;;  %v4254_v28 = vld [vmem:[%s8272_s3 + $0x6f0] sm:$0xff] }
  0xa2   : > { %5382 = vmatpush3.msra.mxu1 %v4203_v46  ;;  %1348 = vmatmul.mubr.f32.gmra.mxu0 %v6223_v40  ;;  %v4200_v40 = vld [vmem:[%s8272_s3 + $0x5c0] sm:$0xff]  ;;  %v1563_v46 = vsel %vm419_vm1, %v1561_v0, %v1562_v44  ;;  %v4231_v44 = vld [vmem:[%s8272_s3 + $0x638] sm:$0xff] }
  0xa3   : > { %4773 = vmatprep.subr.mxu0 %v4185_v48  ;;  %5383 = vmatprep.subr.mxu1 %v4202_v56  ;;  %v4271_v48 = vld [vmem:[%s8272_s3 + $0x778] sm:$0xff] }
  0xa4   : > { %4774 = vmatpush3.msra.mxu0 %v4169_v53  ;;  %5384 = vmatpush3.msra.mxu1 %v4202_v56  ;;  %v1531_v56 = vsel %vm386_vm0, %v1529_v29, %v1530_v30  ;;  %v4238_v53 = vld [vmem:[%s8272_s3 + $0x670] sm:$0xff]  ;;  %v1507_v30 = vld [vmem:[%s6764_s30 + $0x68] sm:$0x3] }
  0xa5   : > { %4775 = vmatprep.subr.mxu0 %v4184_v60  ;;  %5385 = vmatprep.subr.mxu1 %v4201_v61  ;;  %v6844_v60 = vrot.slane %v6825_v50, 1 }
  0xa6   : > { %1352 = vmatprep.mubr.f32.mxu0 %v6382_v14  ;;  %4776 = vmatpush3.msra.mxu0 %v4168_v47  ;;  %v4182_v14 = vld [vmem:[%s8272_s3 + $0x530] sm:$0xff]  ;;  %v4253_v47 = vld [vmem:[%s8272_s3 + $0x6e8] sm:$0xff] }
  0xa7   : > { %5386 = vmatpush3.msra.mxu1 %v4201_v61  ;;  %1353 = vmatmul.mubr.f32.gmra.mxu0 %v6259_v58  ;;  %v4166_v58 = vld [vmem:[%s8272_s3 + $0x4b0] sm:$0xff]  ;;  %v1533_v61 = vrot.slane %v1499_v51, 1 }
  0xa8   : > { %4777 = vmatprep.subr.mxu0 %v4183_v49  ;;  %5387 = vmatprep.subr.mxu1 %v4200_v40  ;;  %v4270_v49 = vld [vmem:[%s8272_s3 + $0x770] sm:$0xff] }
  0xa9   : > { %5367 = vmatprep.mubr.f32.mxu1 %v6386_v16  ;;  %4778 = vmatpush3.msra.mxu0 %v4167_v15  ;;  %v4181_v16 = vld [vmem:[%s8272_s3 + $0x528] sm:$0xff]  ;;  %v6856_v15 = vld [vmem:[%s6764_s30 + $0x30] sm:$0xff] }
  0xaa   : > { %5388 = vmatpush3.msra.mxu1 %v4200_v40  ;;  %4779 = vmatprep.subr.mxu0 %v4182_v14  ;;  %v4237_v40 = vld [vmem:[%s8272_s3 + $0x668] sm:$0xff]  ;;  %v4252_v14 = vld [vmem:[%s8272_s3 + $0x6e0] sm:$0xff] }
  0xab   : > { %5368 = vmatmul.mubr.f32.gmra.mxu1 %v6397_v22  ;;  %5389 = vmatprep.subr.mxu1 %v4199_v54  ;;  %v4180_v22 = vld [vmem:[%s8272_s3 + $0x520] sm:$0xff] }
  0xac   : > { %1357 = vmatprep.mubr.f32.mxu0 %v6401_v26  ;;  %4780 = vmatpush3.msra.mxu0 %v4166_v58  ;;  %v4197_v26 = vld [vmem:[%s8272_s3 + $0x5a8] sm:$0xff]  ;;  %v1565_v58 = vrot.slane %v1499_v51, 2 }
  0xad   : > { %5390 = vmatpush3.msra.mxu1 %v4199_v54  ;;  %1358 = vmatmul.mubr.f32.gmra.mxu0 %v6294_v17  ;;  %v4179_v17 = vld [vmem:[%s8272_s3 + $0x518] sm:$0xff]  ;;  %v6863_v54 = vrot.slane %v6825_v50, 2 }
  0xae   : > { %4781 = vmatprep.subr.mxu0 %v4181_v16  ;;  %5391 = vmatprep.subr.mxu1 %v4198_v7  ;;  %v1534_v16 = vsel %vm386_vm0, %v6844_v60, %v1533_v61  ;;  %v4229_v61 = vld [vmem:[%s8272_s3 + $0x628] sm:$0xff] }
  0xaf   : > { %4782 = vmatpush3.msra.mxu0 %v4165_v5  ;;  %5392 = vmatpush3.msra.mxu1 %v4198_v7  ;;  %v4236_v7 = vld [vmem:[%s8272_s3 + $0x660] sm:$0xff]  ;;  %v6875_v5 = vrot.slane %v6856_v15, 2 }
  0xb0   : > { %4783 = vmatprep.subr.mxu0 %v4180_v22  ;;  %5393 = vmatprep.subr.mxu1 %v4197_v26  ;;  %v6881_v22 = vrot.slane %v6856_v15, 1 }
  0xb1   : > { %1362 = vmatprep.mubr.f32.mxu0 %v1167_v2  ;;  %4784 = vmatpush3.msra.mxu0 %v4164_v3  ;;  %v1566_v2 = vsel %vm419_vm1, %v6863_v54, %v1565_v58  ;;  %v4235_v3 = vld [vmem:[%s8272_s3 + $0x658] sm:$0xff]  ;;  %v4261_v58 = vld [vmem:[%s8272_s3 + $0x728] sm:$0xff] }
  0xb2   : > { %5394 = vmatpush3.msra.mxu1 %v4197_v26  ;;  %1363 = vmatmul.mubr.f32.gmra.mxu0 %v6549_v57  ;;  %v4162_v57 = vld [vmem:[%s8272_s3 + $0x490] sm:$0xff]  ;;  %v4268_v26 = vld [vmem:[%s8272_s3 + $0x760] sm:$0xff] }
  0xb3   : > { %4785 = vmatprep.subr.mxu0 %v4179_v17  ;;  %5395 = vmatprep.subr.mxu1 %v4196_v9 }
  0xb4   : > { %5370 = vmatprep.mubr.f32.mxu1 %v1199_v41  ;;  %4786 = vmatpush3.msra.mxu0 %v4163_v13  ;;  %v4234_v41 = vld [vmem:[%s8272_s3 + $0x650] sm:$0xff]  ;;  %v6910_v13 = vrot.slane %v6892_v4, 1 }
  0xb5   : > { %5396 = vmatpush3.msra.mxu1 %v4196_v9  ;;  %4787 = vmatprep.subr.mxu0 %v4178_v19  ;;  %v1537_v9 = vsel %vm386_vm0, %v6881_v22, %v1536_v1  ;;  %v4249_v19 = vld [vmem:[%s8272_s3 + $0x6c8] sm:$0xff] }
  0xb6   : > { %5371 = vmatmul.mubr.f32.gmra.mxu1 %v1202_v18  ;;  %5397 = vmatprep.subr.mxu1 %v4195_v6  ;;  %v1539_v18 = vrot.slane %v1503_v8, 1 }
  0xb7   : > { %1367 = vmatprep.mubr.f32.mxu0 %v1170_v21  ;;  %4788 = vmatpush3.msra.mxu0 %v4162_v57  ;;  %v1505_v21 = vld [vmem:[%s6764_s30 + $0x58] sm:$0x3]  ;;  %v4248_v57 = vld [vmem:[%s8272_s3 + $0x6c0] sm:$0xff] }
  0xb8   : > { %5398 = vmatpush3.msra.mxu1 %v4195_v6  ;;  %1368 = vmatmul.mubr.f32.gmra.mxu0 %v4110_v62  ;;  %v1568_v62 = vrot.slane %v1501_v10, 2  ;;  %v6922_v6 = vld [vmem:[%s6764_s30 + $0x50] sm:$0xff]  ;;  %v1540_v32 = vsel %vm386_vm0, %v6910_v13, %v1539_v18  ;;  %v1542_v42 = vrot.slane %v1505_v21, 1 }
  0xb9   : > { %4789 = vmatprep.subr.mxu0 %v4177_v43  ;;  %5399 = vmatprep.subr.mxu1 %v4194_v27  ;;  %v6929_v43 = vrot.slane %v6892_v4, 2  ;;  %v6941_v36 = vrot.slane %v6922_v6, 2  ;;  %v4226_v18 = vld [vmem:[%s8272_s3 + $0x610] sm:$0xff] }
  0xba   : > { %4790 = vmatpush3.msra.mxu0 %v4161_v35  ;;  %5400 = vmatpush3.msra.mxu1 %v4194_v27  ;;  %v1569_v17 = vsel %vm419_vm1, %v6875_v5, %v1568_v62  ;;  %v1571_v27 = vrot.slane %v1503_v8, 2  ;;  %v4232_v35 = vld [vmem:[%s8272_s3 + $0x640] sm:$0xff]  ;;  %v4227_v8 = vld [vmem:[%s8272_s3 + $0x618] sm:$0xff] }
  0xbb   : > { %4791 = vmatprep.subr.mxu0 %v4176_v37  ;;  %5401 = vmatprep.subr.mxu1 %v4193_v38  ;;  %v1574_v37 = vrot.slane %v1505_v21, 2  ;;  %v4225_v21 = vld [vmem:[%s8272_s3 + $0x608] sm:$0xff] }
  0xbc   : > { %4792 = vmatpush3.msra.mxu0 %v4160_v39  ;;  %1711 = vmatprep.mubr.f32.mxu0 %v1528_v24  ;;  %v6947_v39 = vrot.slane %v6922_v6, 1  ;;  %v1572_v24 = vsel %vm419_vm1, %v6929_v43, %v1571_v27  ;;  %v4240_v27 = vld [vmem:[%s8272_s3 + $0x680] sm:$0xff] }
  0xbd   : > { %5402 = vmatpush3.msra.mxu1 %v4193_v38  ;;  %1712 = vmatmul.mubr.f32.vlgmr.msra.gmra.mxu0 %v1494_v20  ;;  %v4266_v20 = vld [vmem:[%s8272_s3 + $0x750] sm:$0xff]  ;;  %v4247_v38 = vld [vmem:[%s8272_s3 + $0x6b8] sm:$0xff] }
  0xbe   : > { %5403 = vmatprep.subr.mxu1 %v4192_v25  ;;  %4841 = vmatprep.subr.mxu0 %v4255_v45  ;;  %v1575_v45 = vsel %vm419_vm1, %v6941_v36, %v1574_v37  ;;  %v1543_v51 = vsel %vm386_vm0, %v6947_v39, %v1542_v42  ;;  %v4256_v42 = vld [vmem:[%s8272_s3 + $0x700] sm:$0xff] }
  0xbf   : > { %5404 = vmatpush3.msra.mxu1 %v4192_v25  ;;  %5405 = vmatprep.mubr.f32.mxu1 %v1560_v52  ;;  %v6958_v25 = vld [vmem:[%s6764_s30 + $0x60] sm:$0xff]  ;;  %v4246_v52 = vld [vmem:[%s8272_s3 + $0x6b0] sm:$0xff] }
  0xc0   : > { %4842 = vmatpush3.msra.mxu0 %v4239_v12  ;;  %5406 = vmatmul.mubr.f32.vlgmr.msra.gmra.mxu1 %v1563_v46  ;;  %v4263_v12 = vld [vmem:[%s8272_s3 + $0x738] sm:$0xff]  ;;  %v4230_v46 = vld [vmem:[%s8272_s3 + $0x630] sm:$0xff]  ;;  %v6995_v10 = vrot.slane %v6958_v25, 2 }
  0xc1   : > { %4843 = vmatprep.subr.mxu0 %v4254_v28  ;;  %5417 = vmatprep.subr.mxu1 %v4271_v48  ;;  %v6976_v28 = vrot.slane %v6958_v25, 1 }
  0xc2   : > { %1716 = vmatprep.mubr.f32.mxu0 %v1531_v56  ;;  %4844 = vmatpush3.msra.mxu0 %v4238_v53  ;;  %v4245_v56 = vld [vmem:[%s8272_s3 + $0x6a8] sm:$0xff]  ;;  %v4262_v53 = vld [vmem:[%s8272_s3 + $0x730] sm:$0xff] }
  0xc3   : > { %5418 = vmatpush3.msra.mxu1 %v4271_v48  ;;  %1717 = vmatmul.mubr.f32.gmra.mxu0 %v6799_v34  ;;  %v1545_v48 = vrot.slane %v1507_v30, 1 }
  0xc4   : > { %4845 = vmatprep.subr.mxu0 %v4253_v47  ;;  %5419 = vmatprep.subr.mxu1 %v4270_v49  ;;  %v6988_v47 = vld [vmem:[%s6764_s30 + $0x70] sm:$0xff] }
  0xc5   : > { %4846 = vmatpush3.msra.mxu0 %v4237_v40  ;;  %5420 = vmatpush3.msra.mxu1 %v4270_v49  ;;  %v1509_v49 = vld [vmem:[%s6764_s30 + $0x78] sm:$0x3]  ;;  %v4244_v40 = vld [vmem:[%s8272_s3 + $0x6a0] sm:$0xff]  ;;  %v7013_v1 = vrot.slane %v6988_v47, 1 }
  0xc6   : > { %4847 = vmatprep.subr.mxu0 %v4252_v14  ;;  %5421 = vmatprep.subr.mxu1 %v4269_v55  ;;  %v1577_v14 = vrot.slane %v1507_v30, 2  ;;  %v1580_v62 = vrot.slane %v1509_v49, 2  ;;  %v4213_v30 = vld [vmem:[%s6764_s30 + $0x38] sm:$0x3] }
  0xc7   : > { %1721 = vmatprep.mubr.f32.mxu0 %v1534_v16  ;;  %4848 = vmatpush3.msra.mxu0 %v4236_v7  ;;  %v4228_v16 = vld [vmem:[%s8272_s3 + $0x620] sm:$0xff]  ;;  %v7007_v7 = vrot.slane %v6988_v47, 2 }
  0xc8   : > { %5422 = vmatpush3.msra.mxu1 %v4269_v55  ;;  %1722 = vmatmul.mubr.f32.gmra.mxu0 %v6825_v50  ;;  %v1546_v55 = vsel %vm386_vm0, %v6976_v28, %v1545_v48  ;;  %v4334_v48 = vld [vmem:[%s8272_s3 + $0x8f0] sm:$0xff] }
  0xc9   : > { %4849 = vmatprep.subr.mxu0 %v4251_v63  ;;  %5423 = vmatprep.subr.mxu1 %v4268_v26  ;;  %v4243_v63 = vld [vmem:[%s8272_s3 + $0x698] sm:$0xff] }
  0xca   : > { %5408 = vmatprep.mubr.f32.mxu1 %v1566_v2  ;;  %4850 = vmatpush3.msra.mxu0 %v4235_v3  ;;  %v4260_v2 = vld [vmem:[%s8272_s3 + $0x720] sm:$0xff]  ;;  %v1578_v3 = vsel %vm419_vm1, %v6995_v10, %v1577_v14 }
  0xcb   : > { %5424 = vmatpush3.msra.mxu1 %v4268_v26  ;;  %4851 = vmatprep.subr.mxu0 %v4250_v23  ;;  %v1548_v26 = vrot.slane %v1509_v49, 1  ;;  %v4242_v23 = vld [vmem:[%s8272_s3 + $0x690] sm:$0xff]  ;;  %v1945_v49 = vrot.slane %v4213_v30, 2 }
  0xcc   : > { %5409 = vmatmul.mubr.f32.gmra.mxu1 %v1569_v17  ;;  %5425 = vmatprep.subr.mxu1 %v4267_v11  ;;  %v1581_v17 = vsel %vm419_vm1, %v7007_v7, %v1580_v62 }
  0xcd   : > { %1726 = vmatprep.mubr.f32.mxu0 %v1537_v9  ;;  %4852 = vmatpush3.msra.mxu0 %v4234_v41  ;;  %v4259_v9 = vld [vmem:[%s8272_s3 + $0x718] sm:$0xff]  ;;  %v1549_v41 = vsel %vm386_vm0, %v7013_v1, %v1548_v26  ;;  %v1946_v26 = vsel %vm419_vm1, %v6875_v5, %v1945_v49 }
  0xce   : > { %5426 = vmatpush3.msra.mxu1 %v4267_v11  ;;  %1727 = vmatmul.mubr.f32.gmra.mxu0 %v6856_v15  ;;  %v4209_v11 = vld [vmem:[%s6764_s30 + $0x18] sm:$0x3] }
  0xcf   : > { %4853 = vmatprep.subr.mxu0 %v4249_v19  ;;  %5427 = vmatprep.subr.mxu1 %v4266_v20  ;;  %v4241_v19 = vld [vmem:[%s8272_s3 + $0x688] sm:$0xff] }
  0xd0   : > { %4854 = vmatpush3.msra.mxu0 %v4233_v33  ;;  %5428 = vmatpush3.msra.mxu1 %v4266_v20  ;;  %v1907_v20 = vrot.slane %v4209_v11, 1  ;;  %v4258_v33 = vld [vmem:[%s8272_s3 + $0x710] sm:$0xff] }
  0xd1   : > { %4855 = vmatprep.subr.mxu0 %v4248_v57  ;;  %5429 = vmatprep.subr.mxu1 %v4265_v31  ;;  %v4211_v57 = vld [vmem:[%s6764_s30 + $0x28] sm:$0x3] }
  0xd2   : > { %1731 = vmatprep.mubr.f32.mxu0 %v1540_v32  ;;  %4856 = vmatpush3.msra.mxu0 %v4232_v35  ;;  %v4224_v32 = vld [vmem:[%s8272_s3 + $0x600] sm:$0xff]  ;;  %v1939_v35 = vrot.slane %v4209_v11, 2  ;;  %v1908_v37 = vsel %vm386_vm0, %v1529_v29, %v1907_v20  ;;  %v4297_v20 = vld [vmem:[%s8272_s3 + $0x7c8] sm:$0xff] }
  0xd3   : > { %5430 = vmatpush3.msra.mxu1 %v4265_v31  ;;  %1732 = vmatmul.mubr.f32.gmra.mxu0 %v6892_v4  ;;  %v4257_v31 = vld [vmem:[%s8272_s3 + $0x708] sm:$0xff] }
  0xd4   : > { %4857 = vmatprep.subr.mxu0 %v4247_v38  ;;  %5431 = vmatprep.subr.mxu1 %v4264_v59  ;;  %v1942_v38 = vrot.slane %v4211_v57, 2  ;;  %v1940_v29 = vsel %vm419_vm1, %v1561_v0, %v1939_v35  ;;  %v4335_v0 = vld [vmem:[%s8272_s3 + $0x8f8] sm:$0xff]  ;;  %v4296_v35 = vld [vmem:[%s8272_s3 + $0x7c0] sm:$0xff] }
  0xd5   : > { %5411 = vmatprep.mubr.f32.mxu1 %v1572_v24  ;;  %4858 = vmatpush3.msra.mxu0 %v4231_v44  ;;  %v4319_v24 = vld [vmem:[%s8272_s3 + $0x878] sm:$0xff] }
  0xd6   : > { %5432 = vmatpush3.msra.mxu1 %v4264_v59  ;;  %4859 = vmatprep.subr.mxu0 %v4246_v52  ;;  %v1910_v59 = vrot.slane %v4211_v57, 1  ;;  %v4303_v44 = vld [vmem:[%s8272_s3 + $0x7f8] sm:$0xff]  ;;  %v4318_v52 = vld [vmem:[%s8272_s3 + $0x870] sm:$0xff] }
  0xd7   : > { %5412 = vmatmul.mubr.f32.gmra.mxu1 %v1575_v45  ;;  %5433 = vmatprep.subr.mxu1 %v4263_v12  ;;  %v1943_v45 = vsel %vm419_vm1, %v6863_v54, %v1942_v38 }
  0xd8   : > { %1736 = vmatprep.mubr.f32.mxu0 %v1543_v51  ;;  %4860 = vmatpush3.msra.mxu0 %v4230_v46  ;;  %v1913_v51 = vrot.slane %v4213_v30, 1  ;;  %v4317_v46 = vld [vmem:[%s8272_s3 + $0x868] sm:$0xff] }
  0xd9   : > { %5434 = vmatpush3.msra.mxu1 %v4263_v12  ;;  %1737 = vmatmul.mubr.f32.gmra.mxu0 %v6922_v6  ;;  %v1911_v12 = vsel %vm386_vm0, %v6844_v60, %v1910_v59 }
  0xda   : > { %4861 = vmatprep.subr.mxu0 %v4245_v56  ;;  %5435 = vmatprep.subr.mxu1 %v4262_v53  ;;  %v4301_v56 = vld [vmem:[%s8272_s3 + $0x7e8] sm:$0xff]  ;;  %v1914_v14 = vsel %vm386_vm0, %v6881_v22, %v1913_v51 }
  0xdb   : > { %4862 = vmatpush3.msra.mxu0 %v4229_v61  ;;  %5436 = vmatpush3.msra.mxu1 %v4262_v53  ;;  %v4215_v53 = vld [vmem:[%s6764_s30 + $0x48] sm:$0x3]  ;;  %v4316_v61 = vld [vmem:[%s8272_s3 + $0x860] sm:$0xff] }
  0xdc   : > { %4863 = vmatprep.subr.mxu0 %v4244_v40  ;;  %5437 = vmatprep.subr.mxu1 %v4261_v58  ;;  %v4333_v40 = vld [vmem:[%s8272_s3 + $0x8e8] sm:$0xff]  ;;  %v1916_v62 = vrot.slane %v4215_v53, 1 }
  0xdd   : > { %1741 = vmatprep.mubr.f32.mxu0 %v1546_v55  ;;  %4864 = vmatpush3.msra.mxu0 %v4228_v16  ;;  %v1948_v55 = vrot.slane %v4215_v53, 2  ;;  %v4315_v16 = vld [vmem:[%s8272_s3 + $0x858] sm:$0xff]  ;;  %v4294_v53 = vld [vmem:[%s8272_s3 + $0x7b0] sm:$0xff] }
  0xde   : > { %5438 = vmatpush3.msra.mxu1 %v4261_v58  ;;  %1742 = vmatmul.mubr.f32.gmra.mxu0 %v6958_v25  ;;  %v4300_v58 = vld [vmem:[%s8272_s3 + $0x7e0] sm:$0xff]  ;;  %v1917_v11 = vsel %vm386_vm0, %v6910_v13, %v1916_v62  ;;  %v4223_v62 = vld [vmem:[%s6764_s30 + $0x88] sm:$0x3] }
  0xdf   : > { %4865 = vmatprep.subr.mxu0 %v4243_v63  ;;  %5439 = vmatprep.subr.mxu1 %v4260_v2  ;;  %v4332_v63 = vld [vmem:[%s8272_s3 + $0x8e0] sm:$0xff] }
  0xe0   : > { %5414 = vmatprep.mubr.f32.mxu1 %v1578_v3  ;;  %4866 = vmatpush3.msra.mxu0 %v4227_v8  ;;  %v4217_v3 = vld [vmem:[%s6764_s30 + $0x58] sm:$0x3]  ;;  %v1949_v8 = vsel %vm419_vm1, %v6929_v43, %v1948_v55  ;;  %v4293_v55 = vld [vmem:[%s8272_s3 + $0x7a8] sm:$0xff] }
  0xe1   : > { %5440 = vmatpush3.msra.mxu1 %v4260_v2  ;;  %4867 = vmatprep.subr.mxu0 %v4242_v23  ;;  %v4299_v2 = vld [vmem:[%s8272_s3 + $0x7d8] sm:$0xff]  ;;  %v1951_v57 = vrot.slane %v4217_v3, 2 }
  0xe2   : > { %5415 = vmatmul.mubr.f32.gmra.mxu1 %v1581_v17  ;;  %5441 = vmatprep.subr.mxu1 %v4259_v9  ;;  %v4314_v17 = vld [vmem:[%s8272_s3 + $0x850] sm:$0xff]  ;;  %v4331_v23 = vld [vmem:[%s8272_s3 + $0x8d8] sm:$0xff] }
  0xe3   : > { %1746 = vmatprep.mubr.f32.mxu0 %v1549_v41  ;;  %4868 = vmatpush3.msra.mxu0 %v4226_v18  ;;  %v1919_v41 = vrot.slane %v4217_v3, 1  ;;  %v4313_v18 = vld [vmem:[%s8272_s3 + $0x848] sm:$0xff]  ;;  %v1952_v30 = vsel %vm419_vm1, %v6941_v36, %v1951_v57  ;;  %v4324_v57 = vld [vmem:[%s8272_s3 + $0x8a0] sm:$0xff] }
  0xe4   : > { %5442 = vmatpush3.msra.mxu1 %v4259_v9  ;;  %1747 = vmatmul.mubr.f32.gmra.mxu0 %v6988_v47  ;;  %v4298_v9 = vld [vmem:[%s8272_s3 + $0x7d0] sm:$0xff] }
  0xe5   : > { %4869 = vmatprep.subr.mxu0 %v4241_v19  ;;  %5443 = vmatprep.subr.mxu1 %v4258_v33  ;;  %v4330_v19 = vld [vmem:[%s8272_s3 + $0x8d0] sm:$0xff] }
  0xe6   : > { %4870 = vmatpush3.msra.mxu0 %v4225_v21  ;;  %5444 = vmatpush3.msra.mxu1 %v4258_v33  ;;  %v4219_v33 = vld [vmem:[%s6764_s30 + $0x68] sm:$0x3]  ;;  %v4312_v21 = vld [vmem:[%s8272_s3 + $0x840] sm:$0xff] }
  0xe7   : > { %4871 = vmatprep.subr.mxu0 %v4240_v27  ;;  %5445 = vmatprep.subr.mxu1 %v4257_v31  ;;  %v1922_v59 = vrot.slane %v4219_v33, 1 }
  0xe8   : > { %4872 = vmatpush3.msra.mxu0 %v4224_v32  ;;  %2091 = vmatprep.mubr.f32.mxu0 %v1908_v37  ;;  %v1920_v32 = vsel %vm386_vm0, %v6947_v39, %v1919_v41  ;;  %v1954_v37 = vrot.slane %v4219_v33, 2 }
  0xe9   : > { %5446 = vmatpush3.msra.mxu1 %v4257_v31  ;;  %2092 = vmatmul.mubr.f32.vlgmr.msra.gmra.mxu0 %v6799_v34  ;;  %v4302_v34 = vld [vmem:[%s8272_s3 + $0x7f0] sm:$0xff]  ;;  %v4329_v31 = vld [vmem:[%s8272_s3 + $0x8c8] sm:$0xff] }
  0xea   : > { %5447 = vmatprep.subr.mxu1 %v4256_v42  ;;  %4921 = vmatprep.subr.mxu0 %v4319_v24 }
  0xeb   : > { %5448 = vmatpush3.msra.mxu1 %v4256_v42  ;;  %5449 = vmatprep.mubr.f32.mxu1 %v1940_v29  ;;  %v4311_v42 = vld [vmem:[%s8272_s3 + $0x838] sm:$0xff] }
  0xec   : > { %4922 = vmatpush3.msra.mxu0 %v4303_v44  ;;  %5450 = vmatmul.mubr.f32.vlgmr.msra.gmra.mxu1 %v1943_v45  ;;  %v4328_v44 = vld [vmem:[%s8272_s3 + $0x8c0] sm:$0xff]  ;;  %v4295_v45 = vld [vmem:[%s8272_s3 + $0x7b8] sm:$0xff] }
  0xed   : > { %4923 = vmatprep.subr.mxu0 %v4318_v52  ;;  %5461 = vmatprep.subr.mxu1 %v4335_v0  ;;  %v4221_v52 = vld [vmem:[%s6764_s30 + $0x78] sm:$0x3] }
  0xee   : > { %2096 = vmatprep.mubr.f32.mxu0 %v1911_v12  ;;  %4924 = vmatpush3.msra.mxu0 %v4302_v34  ;;  %v1955_v12 = vsel %vm419_vm1, %v6995_v10, %v1954_v37  ;;  %v4310_v34 = vld [vmem:[%s8272_s3 + $0x830] sm:$0xff] }
  0xef   : > { %5462 = vmatpush3.msra.mxu1 %v4335_v0  ;;  %2097 = vmatmul.mubr.f32.gmra.mxu0 %v6825_v50  ;;  %v4306_v37 = vld [vmem:[%s8272_s3 + $0x810] sm:$0xff] }
  0xf0   : > { %4925 = vmatprep.subr.mxu0 %v4317_v46  ;;  %5463 = vmatprep.subr.mxu1 %v4334_v48 }
  0xf1   : > { %4926 = vmatpush3.msra.mxu0 %v4301_v56  ;;  %5464 = vmatpush3.msra.mxu1 %v4334_v48  ;;  %v4327_v48 = vld [vmem:[%s8272_s3 + $0x8b8] sm:$0xff]  ;;  %v1923_v56 = vsel %vm386_vm0, %v6976_v28, %v1922_v59 }
  0xf2   : > { %4927 = vmatprep.subr.mxu0 %v4316_v61  ;;  %5465 = vmatprep.subr.mxu1 %v4333_v40  ;;  %v1925_v61 = vrot.slane %v4221_v52, 1 }
  0xf3   : > { %2101 = vmatprep.mubr.f32.mxu0 %v1914_v14  ;;  %4928 = vmatpush3.msra.mxu0 %v4300_v58  ;;  %v4326_v14 = vld [vmem:[%s8272_s3 + $0x8b0] sm:$0xff] }
  0xf4   : > { %5466 = vmatpush3.msra.mxu1 %v4333_v40  ;;  %2102 = vmatmul.mubr.f32.gmra.mxu0 %v6856_v15  ;;  %v4309_v40 = vld [vmem:[%s8272_s3 + $0x828] sm:$0xff] }
  0xf5   : > { %4929 = vmatprep.subr.mxu0 %v4315_v16  ;;  %5467 = vmatprep.subr.mxu1 %v4332_v63  ;;  %v7196_v16 = vld [vmem:[%s6764_s30 + $0x80] sm:$0xff] }
  0xf6   : > { %5452 = vmatprep.mubr.f32.mxu1 %v1946_v26  ;;  %4930 = vmatpush3.msra.mxu0 %v4299_v2  ;;  %v1957_v26 = vrot.slane %v4221_v52, 2 }
  0xf7   : > { %5468 = vmatpush3.msra.mxu1 %v4332_v63  ;;  %4931 = vmatprep.subr.mxu0 %v4314_v17  ;;  %v4308_v63 = vld [vmem:[%s8272_s3 + $0x820] sm:$0xff]  ;;  %v1926_v17 = vsel %vm386_vm0, %v7013_v1, %v1925_v61  ;;  %v4321_v61 = vld [vmem:[%s8272_s3 + $0x888] sm:$0xff] }
  0xf8   : > { %5453 = vmatmul.mubr.f32.gmra.mxu1 %v1949_v8  ;;  %5469 = vmatprep.subr.mxu1 %v4331_v23  ;;  %v4325_v8 = vld [vmem:[%s8272_s3 + $0x8a8] sm:$0xff] }
  0xf9   : > { %2106 = vmatprep.mubr.f32.mxu0 %v1917_v11  ;;  %4932 = vmatpush3.msra.mxu0 %v4298_v9  ;;  %v4553_v27 = vpop.f32.mrf.mxu0  ;;  %v1959_v11 = vrot.slane %v7196_v16, 2  ;;  %v1960_v9 = vrot.slane %v4223_v62, 2 }
  0xfa   : > { %5470 = vmatpush3.msra.mxu1 %v4331_v23  ;;  %2107 = vmatmul.mubr.f32.gmra.mxu0 %v6892_v4  ;;  %v4292_v23 = vld [vmem:[%s8272_s3 + $0x7a0] sm:$0xff] }
  0xfb   : > { %4933 = vmatprep.subr.mxu0 %v4313_v18  ;;  %5471 = vmatprep.subr.mxu1 %v4330_v19  ;;  %v4554_v38 = vpop.f32.mrf.mxu0  ;;  %v4307_v18 = vld [vmem:[%s8272_s3 + $0x818] sm:$0xff] }
  0xfc   : > { %4934 = vmatpush3.msra.mxu0 %v4297_v20  ;;  %5472 = vmatpush3.msra.mxu1 %v4330_v19  ;;  %v4555_v24 = vadd.f32 %v4554_v38, %v4553_v27  ;;  %v5275_v29 = vpop.f32.mrf.mxu1  ;;  %v1927_v19 = vrot.slane %v7196_v16, 1  ;;  %v1928_v20 = vrot.slane %v4223_v62, 1  ;;  %v1958_v27 = vsel %vm419_vm1, %v7007_v7, %v1957_v26  ;;  %v4273_v38 = vld [vmem:[%s6764_s30 + $0x28] sm:$0x3]  ;;  %v4320_v62 = vld [vmem:[%s8272_s3 + $0x880] sm:$0xff] }
  0xfd   : > { %4935 = vmatprep.subr.mxu0 %v4312_v21  ;;  %5473 = vmatprep.subr.mxu1 %v4329_v31  ;;  %v2287_v52 = vrot.slane %v4273_v38, 1 }
  0xfe   : > { %2111 = vmatprep.mubr.f32.mxu0 %v1920_v32  ;;  %4936 = vmatpush3.msra.mxu0 %v4296_v35  ;;  %v679_v0 = vpop.f32.mrf.mxu1  ;;  %v1961_v35 = vsel %vm419_vm1, %v1959_v11, %v1960_v9 }
  0xff   : > { %5474 = vmatpush3.msra.mxu1 %v4329_v31  ;;  %2112 = vmatmul.mubr.f32.gmra.mxu0 %v6922_v6  ;;  %v4556_v51 = vpop.f32.mrf.mxu0  ;;  %v7176_v46 = vadd.f32 %v4555_v24, %v679_v0  ;;  %v4291_v31 = vld [vmem:[%s8272_s3 + $0x798] sm:$0xff] }
 0x100   : > { %4937 = vmatprep.subr.mxu0 %v4311_v42  ;;  %5475 = vmatprep.subr.mxu1 %v4328_v44  ;;  %v4323_v24 = vld [vmem:[%s8272_s3 + $0x898] sm:$0xff] }
 0x101   : > { %5455 = vmatprep.mubr.f32.mxu1 %v1952_v30  ;;  %4938 = vmatpush3.msra.mxu0 %v4295_v45  ;;  %v4557_v49 = vpop.f32.mrf.mxu0  ;;  %v4305_v45 = vld [vmem:[%s8272_s3 + $0x808] sm:$0xff] }
 0x102   : > { %5476 = vmatpush3.msra.mxu1 %v4328_v44  ;;  %4939 = vmatprep.subr.mxu0 %v4310_v34  ;;  %v4558_v58 = vadd.f32 %v4557_v49, %v4556_v51  ;;  %v4290_v44 = vld [vmem:[%s8272_s3 + $0x790] sm:$0xff]  ;;  %v4289_v34 = vld [vmem:[%s8272_s3 + $0x788] sm:$0xff]  ;;  %v4275_v51 = vld [vmem:[%s6764_s30 + $0x38] sm:$0x3] }
 0x103   : > { %5456 = vmatmul.mubr.f32.gmra.mxu1 %v1955_v12  ;;  %5477 = vmatprep.subr.mxu1 %v4327_v48  ;;  %v4322_v12 = vld [vmem:[%s8272_s3 + $0x890] sm:$0xff]  ;;  %v4288_v49 = vld [vmem:[%s8272_s3 + $0x780] sm:$0xff] }
 0x104   : > { %2116 = vmatprep.mubr.f32.mxu0 %v1923_v56  ;;  %4940 = vmatpush3.msra.mxu0 %v4294_v53  ;;  %v7202_v2 = vadd.f32 %v5275_v29, %v4558_v58  ;;  %v4559_v3 = vpop.f32.mrf.mxu0  ;;  %v1929_v29 = vsel %vm386_vm0, %v1927_v19, %v1928_v20  ;;  %v2322_v58 = vrot.slane %v4275_v51, 2 }
 0x105   : > { %5478 = vmatpush3.msra.mxu1 %v4327_v48  ;;  %2117 = vmatmul.mubr.f32.gmra.mxu0 %v6958_v25  ;;  %v4304_v48 = vld [vmem:[%s8272_s3 + $0x800] sm:$0xff] }
 0x106   : > { %4941 = vmatprep.subr.mxu0 %v4309_v40  ;;  %5479 = vmatprep.subr.mxu1 %v4326_v14  ;;  %v4560_v41 = vpop.f32.mrf.mxu0  ;;  %v2319_v40 = vrot.slane %v4273_v38, 2 }
 0x107   : > { %4942 = vmatpush3.msra.mxu0 %v4293_v55  ;;  %5480 = vmatpush3.msra.mxu1 %v4326_v14  ;;  %v4561_v33 = vadd.f32 %v4560_v41, %v4559_v3  ;;  %v2288_v14 = vsel %vm386_vm0, %v6844_v60, %v2287_v52  ;;  %v2323_v41 = vsel %vm419_vm1, %v6875_v5, %v2322_v58  ;;  %v4350_v5 = vld [vmem:[%s8272_s3 + $0x970] sm:$0xff]  ;;  %v4379_v58 = vld [vmem:[%s8272_s3 + $0xa58] sm:$0xff] }
 0x108   : > { %4943 = vmatprep.subr.mxu0 %v4308_v63  ;;  %v5278_v21 = vpop.f32.mrf.mxu1  ;;  %5481 = vmatprep.subr.mxu1 %v4325_v8  ;;  %v2290_v63 = vrot.slane %v4275_v51, 1  ;;  %v2320_v60 = vsel %vm419_vm1, %v6863_v54, %v2319_v40  ;;  %v4383_v54 = vld [vmem:[%s8272_s3 + $0xa78] sm:$0xff] }
 0x109   : > { %2121 = vmatprep.mubr.f32.mxu0 %v1926_v17  ;;  %4944 = vmatpush3.msra.mxu0 %v4292_v23  ;;  %v4351_v17 = vld [vmem:[%s8272_s3 + $0x978] sm:$0xff]  ;;  %v4277_v23 = vld [vmem:[%s6764_s30 + $0x48] sm:$0x3] }
 0x10a   : > { %5482 = vmatpush3.msra.mxu1 %v4325_v8  ;;  %v689_v32 = vpop.f32.mrf.mxu1  ;;  %2122 = vmatmul.mubr.f32.gmra.mxu0 %v6988_v47  ;;  %v4562_v42 = vpop.f32.mrf.mxu0  ;;  %v4367_v8 = vld [vmem:[%s8272_s3 + $0x9f8] sm:$0xff]  ;;  %v2325_v38 = vrot.slane %v4277_v23, 2 }
 0x10b   : > { %4945 = vmatprep.subr.mxu0 %v4307_v18  ;;  %v7234_v59 = vadd.f32 %v4561_v33, %v689_v32  ;;  %5483 = vmatprep.subr.mxu1 %v4324_v57  ;;  %v4366_v18 = vld [vmem:[%s8272_s3 + $0x9f0] sm:$0xff]  ;;  %v4349_v32 = vld [vmem:[%s8272_s3 + $0x968] sm:$0xff] }
 0x10c   : > { %5458 = vmatprep.mubr.f32.mxu1 %v1958_v27  ;;  %4946 = vmatpush3.msra.mxu0 %v4291_v31  ;;  %v4563_v30 = vpop.f32.mrf.mxu0  ;;  %v4365_v27 = vld [vmem:[%s8272_s3 + $0x9e8] sm:$0xff]  ;;  %v2326_v51 = vsel %vm419_vm1, %v6929_v43, %v2325_v38  ;;  %v4362_v43 = vld [vmem:[%s8272_s3 + $0x9d0] sm:$0xff] }
 0x10d   : > { %5484 = vmatpush3.msra.mxu1 %v4324_v57  ;;  %4947 = vmatprep.subr.mxu0 %v4306_v37  ;;  %v4564_v0 = vadd.f32 %v4563_v30, %v4562_v42  ;;  %v4364_v37 = vld [vmem:[%s8272_s3 + $0x9e0] sm:$0xff] }
 0x10e   : > { %5459 = vmatmul.mubr.f32.gmra.mxu1 %v1961_v35  ;;  %5485 = vmatprep.subr.mxu1 %v4323_v24  ;;  %v4279_v35 = vld [vmem:[%s6764_s30 + $0x58] sm:$0x3]  ;;  %v4348_v30 = vld [vmem:[%s8272_s3 + $0x960] sm:$0xff] }
 0x10f   : > { %2126 = vmatprep.mubr.f32.mxu0 %v1929_v29  ;;  %4948 = vmatpush3.msra.mxu0 %v4290_v44  ;;  %v7258_v56 = vadd.f32 %v5278_v21, %v4564_v0  ;;  %v4565_v53 = vpop.f32.mrf.mxu0  ;;  %v2293_v21 = vrot.slane %v4277_v23, 1  ;;  %v4381_v29 = vld [vmem:[%s8272_s3 + $0xa68] sm:$0xff]  ;;  %v2296_v0 = vrot.slane %v4279_v35, 1 }
 0x110   : > { %5486 = vmatpush3.msra.mxu1 %v4323_v24  ;;  %2127 = vmatmul.mubr.f32.gmra.mxu0 %v7196_v16 }
 0x111   : > { %4949 = vmatprep.subr.mxu0 %v4305_v45  ;;  %5487 = vmatprep.subr.mxu1 %v4322_v12  ;;  %v4566_v55 = vpop.f32.mrf.mxu0  ;;  %v2294_v44 = vsel %vm386_vm0, %v6910_v13, %v2293_v21  ;;  %v2328_v45 = vrot.slane %v4279_v35, 2  ;;  %v4380_v13 = vld [vmem:[%s8272_s3 + $0xa60] sm:$0xff] }
 0x112   : > { %4950 = vmatpush3.msra.mxu0 %v4289_v34  ;;  %5488 = vmatpush3.msra.mxu1 %v4322_v12  ;;  %v4567_v26 = vadd.f32 %v4566_v55, %v4565_v53  ;;  %v4281_v53 = vld [vmem:[%s6764_s30 + $0x68] sm:$0x3] }
 0x113   : > { %4951 = vmatprep.subr.mxu0 %v4304_v48  ;;  %v5281_v3 = vpop.f32.mrf.mxu1  ;;  %5489 = vmatprep.subr.mxu1 %v4321_v61  ;;  %v4347_v48 = vld [vmem:[%s8272_s3 + $0x958] sm:$0xff]  ;;  %v2299_v55 = vrot.slane %v4281_v53, 1 }
 0x114   : > { %4952 = vmatpush3.msra.mxu0 %v4288_v49  ;;  %2471 = vmatprep.mubr.f32.mxu0 %v2288_v14  ;;  %v2329_v49 = vsel %vm419_vm1, %v6941_v36, %v2328_v45  ;;  %v4346_v36 = vld [vmem:[%s8272_s3 + $0x950] sm:$0xff] }
 0x115   : > { %5490 = vmatpush3.msra.mxu1 %v4321_v61  ;;  %v699_v9 = vpop.f32.mrf.mxu1  ;;  %2472 = vmatmul.mubr.f32.vlgmr.msra.gmra.mxu0 %v6825_v50  ;;  %v4568_v20 = vpop.f32.mrf.mxu0  ;;  %v2291_v50 = vsel %vm386_vm0, %v6881_v22, %v2290_v63  ;;  %v4382_v22 = vld [vmem:[%s8272_s3 + $0xa70] sm:$0xff] }
 0x116   : > { %5491 = vmatprep.subr.mxu1 %v4320_v62  ;;  %v7287_v33 = vadd.f32 %v4567_v26, %v699_v9  ;;  %5001 = vmatprep.subr.mxu0 %v4367_v8  ;;  %v4378_v26 = vld [vmem:[%s8272_s3 + $0xa50] sm:$0xff]  ;;  %v4283_v8 = vld [vmem:[%s6764_s30 + $0x78] sm:$0x3] }
 0x117   : > { %5492 = vmatpush3.msra.mxu1 %v4320_v62  ;;  %5493 = vmatprep.mubr.f32.mxu1 %v2320_v60  ;;  %v4569_v57 = vpop.f32.mrf.mxu0  ;;  %v4360_v60 = vld [vmem:[%s8272_s3 + $0x9c0] sm:$0xff]  ;;  %v4374_v45 = vld [vmem:[%s8272_s3 + $0xa30] sm:$0xff] }
 0x118   : > { %5002 = vmatpush3.msra.mxu0 %v4351_v17  ;;  %5494 = vmatmul.mubr.f32.vlgmr.msra.gmra.mxu1 %v2323_v41  ;;  %v4570_v31 = vadd.f32 %v4569_v57, %v4568_v20  ;;  %v2331_v17 = vrot.slane %v4281_v53, 2  ;;  %v4377_v41 = vld [vmem:[%s8272_s3 + $0xa48] sm:$0xff]  ;;  %v4344_v20 = vld [vmem:[%s8272_s3 + $0x940] sm:$0xff] }
 0x119   : > { %5003 = vmatprep.subr.mxu0 %v4366_v18  ;;  %5505 = vmatprep.subr.mxu1 %v4383_v54  ;;  %v2300_v18 = vsel %vm386_vm0, %v6976_v28, %v2299_v55  ;;  %v4376_v28 = vld [vmem:[%s8272_s3 + $0xa40] sm:$0xff] }
 0x11a   : > { %2476 = vmatprep.mubr.f32.mxu0 %v2291_v50  ;;  %5004 = vmatpush3.msra.mxu0 %v4350_v5  ;;  %v7310_v42 = vadd.f32 %v5281_v3, %v4570_v31  ;;  %v4571_v24 = vpop.f32.mrf.mxu0  ;;  %v4345_v3 = vld [vmem:[%s8272_s3 + $0x948] sm:$0xff]  ;;  %v2302_v5 = vrot.slane %v4283_v8, 1  ;;  %v4343_v31 = vld [vmem:[%s8272_s3 + $0x938] sm:$0xff]  ;;  %v4372_v55 = vld [vmem:[%s8272_s3 + $0xa20] sm:$0xff] }
 0x11b   : > { %5506 = vmatpush3.msra.mxu1 %v4383_v54  ;;  %2477 = vmatmul.mubr.f32.gmra.mxu0 %v6856_v15  ;;  %v4363_v15 = vld [vmem:[%s8272_s3 + $0x9d8] sm:$0xff]  ;;  %v2334_v54 = vrot.slane %v4283_v8, 2  ;;  %v2633_v8 = vld [vmem:[%s7457_s10] sm:$0xff] }
 0x11c   : > { %5005 = vmatprep.subr.mxu0 %v4365_v27  ;;  %5507 = vmatprep.subr.mxu1 %v4382_v22  ;;  %v4572_v52 = vpop.f32.mrf.mxu0  ;;  %v2332_v27 = vsel %vm419_vm1, %v6995_v10, %v2331_v17  ;;  %v4358_v10 = vld [vmem:[%s8272_s3 + $0x9b0] sm:$0xff] }
 0x11d   : > { %5006 = vmatpush3.msra.mxu0 %v4349_v32  ;;  %5508 = vmatpush3.msra.mxu1 %v4382_v22  ;;  %v4573_v12 = vadd.f32 %v4572_v52, %v4571_v24  ;;  %v4285_v22 = vld [vmem:[%s6764_s30 + $0x88] sm:$0x3]  ;;  %v2335_v35 = vsel %vm419_vm1, %v7007_v7, %v2334_v54  ;;  %v4375_v24 = vld [vmem:[%s8272_s3 + $0xa38] sm:$0xff] }
 0x11e   : > { %5007 = vmatprep.subr.mxu0 %v4364_v37  ;;  %v5284_v34 = vpop.f32.mrf.mxu1  ;;  %5509 = vmatprep.subr.mxu1 %v4381_v29  ;;  %v2305_v7 = vrot.slane %v4285_v22, 1  ;;  %v4353_v54 = vld [vmem:[%s8272_s3 + $0x988] sm:$0xff] }
 0x11f   : > { %2481 = vmatprep.mubr.f32.mxu0 %v2294_v44  ;;  %5008 = vmatpush3.msra.mxu0 %v4348_v30 }
 0x120   : > { %5510 = vmatpush3.msra.mxu1 %v4381_v29  ;;  %v709_v61 = vpop.f32.mrf.mxu1  ;;  %2482 = vmatmul.mubr.f32.gmra.mxu0 %v6892_v4  ;;  %v4574_v40 = vpop.f32.mrf.mxu0  ;;  %v2297_v4 = vsel %vm386_vm0, %v6947_v39, %v2296_v0  ;;  %v4361_v39 = vld [vmem:[%s8272_s3 + $0x9c8] sm:$0xff]  ;;  %v2303_v29 = vsel %vm386_vm0, %v7013_v1, %v2302_v5  ;;  %v4287_v0 = vld [vmem:[%s6764_s30 + $0x98] sm:$0x3]  ;;  %v2306_v53 = vsel %vm386_vm0, %v1927_v19, %v2305_v7 }
 0x121   : > { %5009 = vmatprep.subr.mxu0 %v4363_v15  ;;  %v7340_v14 = vadd.f32 %v4573_v12, %v709_v61  ;;  %5511 = vmatprep.subr.mxu1 %v4380_v13  ;;  %v4357_v1 = vld [vmem:[%s8272_s3 + $0x9a8] sm:$0xff]  ;;  %v7429_v15 = vld [vmem:[%s6764_s30 + $0x90] sm:$0xff]  ;;  %v4356_v12 = vld [vmem:[%s8272_s3 + $0x9a0] sm:$0xff]  ;;  %s8188_s30 = scalar_lea.hbm %s8273_s4, %s4516_s27 }
 0x122   : > { %5496 = vmatprep.mubr.f32.mxu1 %v2326_v51  ;;  %5010 = vmatpush3.msra.mxu0 %v4347_v48  ;;  %v4575_v62 = vpop.f32.mrf.mxu0  ;;  %v4373_v48 = vld [vmem:[%s8272_s3 + $0xa28] sm:$0xff]  ;;  %v4340_v61 = vld [vmem:[%s8272_s3 + $0x920] sm:$0xff]  ;;  %v2307_v19 = vrot.slane %v7429_v15, 1 }
 0x123   : > { %5512 = vmatpush3.msra.mxu1 %v4380_v13  ;;  %5011 = vmatprep.subr.mxu0 %v4362_v43  ;;  %v4576_v63 = vadd.f32 %v4575_v62, %v4574_v40  ;;  %v2340_v43 = vrot.slane %v4287_v0, 2 }
 0x124   : > { %5497 = vmatmul.mubr.f32.gmra.mxu1 %v2329_v49  ;;  %5513 = vmatprep.subr.mxu1 %v4379_v58  ;;  %v2339_v49 = vrot.slane %v7429_v15, 2 }
 0x125   : > { %2486 = vmatprep.mubr.f32.mxu0 %v2297_v4  ;;  %5012 = vmatpush3.msra.mxu0 %v4346_v36  ;;  %v7375_v23 = vadd.f32 %v5284_v34, %v4576_v63  ;;  %v4633_v9 = vpop.f32.mrf.mxu0  ;;  %v2337_v34 = vrot.slane %v4285_v22, 2  ;;  %v2308_v4 = vrot.slane %v4287_v0, 1  ;;  %v4415_v0 = vld [vmem:[%s8272_s3 + $0xaf8] sm:$0xff] }
 0x126   : > { %5514 = vmatpush3.msra.mxu1 %v4379_v58  ;;  %2487 = vmatmul.mubr.f32.gmra.mxu0 %v6922_v6  ;;  %v4359_v6 = vld [vmem:[%s8272_s3 + $0x9b8] sm:$0xff] }
 0x127   : > { %5013 = vmatprep.subr.mxu0 %v4361_v39  ;;  %5515 = vmatprep.subr.mxu1 %v4378_v26  ;;  %v4634_v50 = vpop.f32.mrf.mxu0  ;;  %v4355_v58 = vld [vmem:[%s8272_s3 + $0x998] sm:$0xff]  ;;  %v2338_v62 = vsel %vm419_vm1, %v1959_v11, %v2337_v34  ;;  %v2638_v34 = vld [vmem:[%s7457_s10 + $0x28] sm:$0x3] }
 0x128   : > { %5014 = vmatpush3.msra.mxu0 %v4345_v3  ;;  %5516 = vmatpush3.msra.mxu1 %v4378_v26  ;;  %v4635_v21 = vadd.f32 %v4634_v50, %v4633_v9  ;;  %v5319_v57 = vpop.f32.mrf.mxu1  ;;  %v4339_v39 = vld [vmem:[%s8272_s3 + $0x918] sm:$0xff]  ;;  %v2341_v26 = vsel %vm419_vm1, %v2339_v49, %v2340_v43  ;;  %v4354_v3 = vld [vmem:[%s8272_s3 + $0x990] sm:$0xff] }
 0x129   : > { %5015 = vmatprep.subr.mxu0 %v4360_v60  ;;  %5517 = vmatprep.subr.mxu1 %v4377_v41  ;;  %v2634_v60 = vld [vmem:[%s7457_s10 + $0x8] sm:$0x3]  ;;  %v4371_v9 = vld [vmem:[%s8272_s3 + $0xa18] sm:$0xff]  ;;  %v4370_v50 = vld [vmem:[%s8272_s3 + $0xa10] sm:$0xff] }
 0x12a   : > { %2491 = vmatprep.mubr.f32.mxu0 %v2300_v18  ;;  %5016 = vmatpush3.msra.mxu0 %v4344_v20  ;;  %v1059_v32 = vpop.f32.mrf.mxu1  ;;  %v2666_v5 = vrot.slane %v2634_v60, 1  ;;  %v4447_v49 = vld [vmem:[%s8272_s3 + $0xbf8] sm:$0xff] }
 0x12b   : > { %5518 = vmatpush3.msra.mxu1 %v4377_v41  ;;  %2492 = vmatmul.mubr.f32.gmra.mxu0 %v6958_v25  ;;  %v4636_v37 = vpop.f32.mrf.mxu0  ;;  %v1060_v38 = vadd.f32 %v4635_v21, %v1059_v32  ;;  %v4342_v25 = vld [vmem:[%s8272_s3 + $0x930] sm:$0xff]  ;;  %v2309_v41 = vsel %vm386_vm0, %v2307_v19, %v2308_v4  ;;  %v4369_v32 = vld [vmem:[%s8272_s3 + $0xa08] sm:$0xff]  ;;  %v2672_v19 = vrot.slane %v2638_v34, 1 }
 0x12c   : > { %5017 = vmatprep.subr.mxu0 %v4359_v6  ;;  %5519 = vmatprep.subr.mxu1 %v4376_v28  ;;  %v2665_v6 = vrot.slane %v2633_v8, 1 }
 0x12d   : > { %5499 = vmatprep.mubr.f32.mxu1 %v2332_v27  ;;  %5018 = vmatpush3.msra.mxu0 %v4343_v31  ;;  %v7417_v44 = vadd.f32 %v1060_v38, %v7176_v46  ;;  %v4637_v30 = vpop.f32.mrf.mxu0  ;;  %v4341_v46 = vld [vmem:[%s8272_s3 + $0x928] sm:$0xff]  ;;  %v4352_v27 = vld [vmem:[%s8272_s3 + $0x980] sm:$0xff] }
 0x12e   : > { %5520 = vmatpush3.msra.mxu1 %v4376_v28  ;;  %5019 = vmatprep.subr.mxu0 %v4358_v10  ;;  %v4638_v52 = vadd.f32 %v4637_v30, %v4636_v37  ;;  %v2636_v28 = vld [vmem:[%s7457_s10 + $0x18] sm:$0x3]  ;;  %v2697_v10 = vrot.slane %v2633_v8, 2  ;;  %v2698_v37 = vrot.slane %v2634_v60, 2  ;;  %v2667_v38 = vsel %vm386_vm0, %v2665_v6, %v2666_v5  ;;  %v4368_v30 = vld [vmem:[%s8272_s3 + $0xa00] sm:$0xff] }
 0x12f   : > { %5500 = vmatmul.mubr.f32.gmra.mxu1 %v2335_v35  ;;  %5521 = vmatprep.subr.mxu1 %v4375_v24  ;;  %v4336_v35 = vld [vmem:[%s8272_s3 + $0x900] sm:$0xff]  ;;  %v4427_v6 = vld [vmem:[%s8272_s3 + $0xb58] sm:$0xff] }
 0x130   : > { %2496 = vmatprep.mubr.f32.mxu0 %v2303_v29  ;;  %5020 = vmatpush3.msra.mxu0 %v4342_v25  ;;  %v1065_v13 = vadd.f32 %v5319_v57, %v4638_v52  ;;  %v4639_v51 = vpop.f32.mrf.mxu0  ;;  %v7495_v57 = vld [vmem:[%s7457_s10 + $0x10] sm:$0xff]  ;;  %v2701_v29 = vrot.slane %v2636_v28, 2 }
 0x131   : > { %5522 = vmatpush3.msra.mxu1 %v4375_v24  ;;  %2497 = vmatmul.mubr.f32.gmra.mxu0 %v6988_v47  ;;  %v2700_v24 = vrot.slane %v7495_v57, 2 }
 0x132   : > { %5021 = vmatprep.subr.mxu0 %v4357_v1  ;;  %5523 = vmatprep.subr.mxu1 %v4374_v45  ;;  %v7448_v47 = vadd.f32 %v1065_v13, %v7202_v2  ;;  %v4640_v40 = vpop.f32.mrf.mxu0  ;;  %v2668_v1 = vrot.slane %v7495_v57, 1 }
 0x133   : > { %5022 = vmatpush3.msra.mxu0 %v4341_v46  ;;  %5524 = vmatpush3.msra.mxu1 %v4374_v45  ;;  %v4641_v36 = vadd.f32 %v4640_v40, %v4639_v51  ;;  %v2669_v45 = vrot.slane %v2636_v28, 1  ;;  %v2702_v51 = vsel %vm419_vm1, %v2700_v24, %v2701_v29  ;;  %v4414_v40 = vld [vmem:[%s8272_s3 + $0xaf0] sm:$0xff] }
 0x134   : > { %5023 = vmatprep.subr.mxu0 %v4356_v12  ;;  %v5322_v2 = vpop.f32.mrf.mxu1  ;;  %5525 = vmatprep.subr.mxu1 %v4373_v48  ;;  %v7525_v12 = vld [vmem:[%s7457_s10 + $0x20] sm:$0xff] }
 0x135   : > { %2501 = vmatprep.mubr.f32.mxu0 %v2306_v53  ;;  %5024 = vmatpush3.msra.mxu0 %v4340_v61  ;;  %v2670_v43 = vsel %vm386_vm0, %v2668_v1, %v2669_v45  ;;  %v4410_v45 = vld [vmem:[%s8272_s3 + $0xad0] sm:$0xff] }
 0x136   : > { %5526 = vmatpush3.msra.mxu1 %v4373_v48  ;;  %v1069_v63 = vpop.f32.mrf.mxu1  ;;  %2502 = vmatmul.mubr.f32.gmra.mxu0 %v7196_v16  ;;  %v4642_v17 = vpop.f32.mrf.mxu0  ;;  %v4338_v16 = vld [vmem:[%s8272_s3 + $0x910] sm:$0xff] }
 0x137   : > { %5025 = vmatprep.subr.mxu0 %v4355_v58  ;;  %v1070_v11 = vadd.f32 %v4641_v36, %v1069_v63  ;;  %5527 = vmatprep.subr.mxu1 %v4372_v55  ;;  %v4430_v48 = vld [vmem:[%s8272_s3 + $0xb70] sm:$0xff]  ;;  %v7544_v58 = vrot.slane %v7525_v12, 1  ;;  %v2640_v63 = vld [vmem:[%s7457_s10 + $0x38] sm:$0x3] }
 0x138   : > { %5502 = vmatprep.mubr.f32.mxu1 %v2338_v62  ;;  %5026 = vmatpush3.msra.mxu0 %v4339_v39  ;;  %v4643_v20 = vpop.f32.mrf.mxu0  ;;  %v4413_v39 = vld [vmem:[%s8272_s3 + $0xae8] sm:$0xff] }
 0x139   : > { %5528 = vmatpush3.msra.mxu1 %v4372_v55  ;;  %v7483_v18 = vadd.f32 %v1070_v11, %v7234_v59  ;;  %5027 = vmatprep.subr.mxu0 %v4354_v3  ;;  %v4644_v21 = vadd.f32 %v4643_v20, %v4642_v17  ;;  %v4337_v59 = vld [vmem:[%s8272_s3 + $0x908] sm:$0xff]  ;;  %v4446_v55 = vld [vmem:[%s8272_s3 + $0xbf0] sm:$0xff]  ;;  %v7566_v3 = vrot.slane %v7525_v12, 2  ;;  %v2707_v20 = vrot.slane %v2640_v63, 2 }
 0x13a   : > { %5503 = vmatmul.mubr.f32.gmra.mxu1 %v2341_v26  ;;  %5529 = vmatprep.subr.mxu1 %v4371_v9  ;;  %v4428_v26 = vld [vmem:[%s8272_s3 + $0xb60] sm:$0xff]  ;;  %v4445_v11 = vld [vmem:[%s8272_s3 + $0xbe8] sm:$0xff] }
 0x13b   : > { %2506 = vmatprep.mubr.f32.mxu0 %v2309_v41  ;;  %5028 = vmatpush3.msra.mxu0 %v4338_v16  ;;  %v1075_v31 = vadd.f32 %v5322_v2, %v4644_v21  ;;  %v4645_v22 = vpop.f32.mrf.mxu0  ;;  %v4429_v2 = vld [vmem:[%s8272_s3 + $0xb68] sm:$0xff]  ;;  %v4412_v41 = vld [vmem:[%s8272_s3 + $0xae0] sm:$0xff]  ;;  %v2675_v21 = vrot.slane %v2640_v63, 1 }
 0x13c   : > { %5530 = vmatpush3.msra.mxu1 %v4371_v9  ;;  %2507 = vmatmul.mubr.f32.gmra.mxu0 %v7429_v15  ;;  %v2699_v15 = vsel %vm419_vm1, %v2697_v10, %v2698_v37  ;;  %v2673_v9 = vsel %vm386_vm0, %v7544_v58, %v2672_v19  ;;  %v4426_v37 = vld [vmem:[%s8272_s3 + $0xb50] sm:$0xff]  ;;  %v4441_v19 = vld [vmem:[%s8272_s3 + $0xbc8] sm:$0xff] }
 0x13d   : > { %5029 = vmatprep.subr.mxu0 %v4353_v54  ;;  %5531 = vmatprep.subr.mxu1 %v4370_v50  ;;  %v7511_v25 = vadd.f32 %v1075_v31, %v7258_v56  ;;  %v4646_v7 = vpop.f32.mrf.mxu0  ;;  %v4431_v56 = vld [vmem:[%s8272_s3 + $0xb78] sm:$0xff] }
 0x13e   : > { %5030 = vmatpush3.msra.mxu0 %v4337_v59  ;;  %5532 = vmatpush3.msra.mxu1 %v4370_v50  ;;  %v4647_v52 = vadd.f32 %v4646_v7, %v4645_v22  ;;  %v4411_v31 = vld [vmem:[%s8272_s3 + $0xad8] sm:$0xff]  ;;  %v7598_v22 = vld [vmem:[%s7457_s10 + $0x40] sm:$0xff] }
 0x13f   : > { %5031 = vmatprep.subr.mxu0 %v4352_v27  ;;  %v5325_v46 = vpop.f32.mrf.mxu1  ;;  %5533 = vmatprep.subr.mxu1 %v4369_v32  ;;  %v4443_v7 = vld [vmem:[%s8272_s3 + $0xbd8] sm:$0xff] }
 0x140   : > { %5032 = vmatpush3.msra.mxu0 %v4336_v35  ;;  %2850 = vmatprep.mubr.f32.mxu0 %v2667_v38 }
 0x141   : > { %5534 = vmatpush3.msra.mxu1 %v4369_v32  ;;  %v1079_v13 = vpop.f32.mrf.mxu1  ;;  %2851 = vmatmul.mubr.f32.vlgmr.msra.gmra.mxu0 %v2633_v8  ;;  %v4648_v53 = vpop.f32.mrf.mxu0  ;;  %v2704_v8 = vrot.slane %v2638_v34, 2  ;;  %v2642_v32 = vld [vmem:[%s7457_s10 + $0x48] sm:$0x3]  ;;  %v4442_v34 = vld [vmem:[%s8272_s3 + $0xbd0] sm:$0xff] }
 0x142   : > { %5535 = vmatprep.subr.mxu1 %v4368_v30  ;;  %v1080_v61 = vadd.f32 %v4647_v52, %v1079_v13  ;;  %5081 = vmatprep.subr.mxu0 %v4431_v56  ;;  %v7616_v52 = vrot.slane %v7598_v22, 1 }
 0x143   : > { %5536 = vmatpush3.msra.mxu1 %v4368_v30  ;;  %5537 = vmatprep.mubr.f32.mxu1 %v2699_v15  ;;  %v4649_v36 = vpop.f32.mrf.mxu0  ;;  %v2705_v27 = vsel %vm419_vm1, %v7566_v3, %v2704_v8 }
 0x144   : > { %5082 = vmatpush3.msra.mxu0 %v4415_v0  ;;  %v7547_v4 = vadd.f32 %v1080_v61, %v7287_v33  ;;  %5538 = vmatmul.mubr.f32.vlgmr.msra.gmra.mxu1 %v2702_v51  ;;  %v4650_v62 = vadd.f32 %v4649_v36, %v4648_v53  ;;  %v7559_v33 = vld [vmem:[%s7457_s10 + $0x30] sm:$0xff]  ;;  %v4425_v0 = vld [vmem:[%s8272_s3 + $0xb48] sm:$0xff]  ;;  %v4424_v53 = vld [vmem:[%s8272_s3 + $0xb40] sm:$0xff]  ;;  %v7638_v61 = vrot.slane %v7598_v22, 2 }
 0x145   : > { %5083 = vmatprep.subr.mxu0 %v4430_v48  ;;  %5549 = vmatprep.subr.mxu1 %v4447_v49  ;;  %v7578_v16 = vrot.slane %v7559_v33, 2  ;;  %v7587_v5 = vrot.slane %v7559_v33, 1  ;;  %v4409_v51 = vld [vmem:[%s8272_s3 + $0xac8] sm:$0xff]  ;;  %v2644_v48 = vld [vmem:[%s7457_s10 + $0x58] sm:$0x3] }
 0x146   : > { %2855 = vmatprep.mubr.f32.mxu0 %v2670_v43  ;;  %5084 = vmatpush3.msra.mxu0 %v4414_v40  ;;  %v1085_v60 = vadd.f32 %v5325_v46, %v4650_v62  ;;  %v4651_v17 = vpop.f32.mrf.mxu0  ;;  %v2678_v46 = vrot.slane %v2642_v32, 1  ;;  %v2713_v62 = vrot.slane %v2644_v48, 2 }
 0x147   : > { %5550 = vmatpush3.msra.mxu1 %v4447_v49  ;;  %2856 = vmatmul.mubr.f32.gmra.mxu0 %v7495_v57  ;;  %v2708_v10 = vsel %vm419_vm1, %v7578_v16, %v2707_v20  ;;  %v2676_v30 = vsel %vm386_vm0, %v7587_v5, %v2675_v21  ;;  %v2710_v49 = vrot.slane %v2642_v32, 2  ;;  %v7670_v20 = vld [vmem:[%s7457_s10 + $0x60] sm:$0xff]  ;;  %v4406_v32 = vld [vmem:[%s8272_s3 + $0xab0] sm:$0xff] }
 0x148   : > { %5085 = vmatprep.subr.mxu0 %v4429_v2  ;;  %5551 = vmatprep.subr.mxu1 %v4446_v55  ;;  %v7581_v54 = vadd.f32 %v1085_v60, %v7310_v42  ;;  %v4652_v50 = vpop.f32.mrf.mxu0  ;;  %v4444_v42 = vld [vmem:[%s8272_s3 + $0xbe0] sm:$0xff]  ;;  %v2679_v36 = vsel %vm386_vm0, %v7616_v52, %v2678_v46  ;;  %v2681_v60 = vrot.slane %v2644_v48, 1  ;;  %v2648_v46 = vld [vmem:[%s7457_s10 + $0x78] sm:$0x3]  ;;  %v4437_v48 = vld [vmem:[%s8272_s3 + $0xba8] sm:$0xff] }
 0x149   : > { %5086 = vmatpush3.msra.mxu0 %v4413_v39  ;;  %5552 = vmatpush3.msra.mxu1 %v4446_v55  ;;  %v4653_v59 = vadd.f32 %v4652_v50, %v4651_v17  ;;  %v4408_v2 = vld [vmem:[%s8272_s3 + $0xac0] sm:$0xff]  ;;  %v2646_v50 = vld [vmem:[%s7457_s10 + $0x68] sm:$0x3] }
 0x14a   : > { %5087 = vmatprep.subr.mxu0 %v4428_v26  ;;  %v5328_v28 = vpop.f32.mrf.mxu1  ;;  %5553 = vmatprep.subr.mxu1 %v4445_v11  ;;  %v4423_v26 = vld [vmem:[%s8272_s3 + $0xb38] sm:$0xff] }
 0x14b   : > { %2860 = vmatprep.mubr.f32.mxu0 %v2673_v9  ;;  %5088 = vmatpush3.msra.mxu0 %v4412_v41  ;;  %v2711_v9 = vsel %vm419_vm1, %v7638_v61, %v2710_v49  ;;  %v4407_v41 = vld [vmem:[%s8272_s3 + $0xab8] sm:$0xff]  ;;  %v4404_v49 = vld [vmem:[%s8272_s3 + $0xaa0] sm:$0xff] }
 0x14c   : > { %5554 = vmatpush3.msra.mxu1 %v4445_v11  ;;  %v1089_v35 = vpop.f32.mrf.mxu1  ;;  %2861 = vmatmul.mubr.f32.gmra.mxu0 %v7525_v12  ;;  %v4654_v38 = vpop.f32.mrf.mxu0 }
 0x14d   : > { %5089 = vmatprep.subr.mxu0 %v4427_v6  ;;  %v1090_v29 = vadd.f32 %v4653_v59, %v1089_v35  ;;  %5555 = vmatprep.subr.mxu1 %v4444_v42  ;;  %v4422_v59 = vld [vmem:[%s8272_s3 + $0xb30] sm:$0xff]  ;;  %v7688_v35 = vrot.slane %v7670_v20, 1 }
 0x14e   : > { %5540 = vmatprep.mubr.f32.mxu1 %v2705_v27  ;;  %5090 = vmatpush3.msra.mxu0 %v4411_v31  ;;  %v4655_v15 = vpop.f32.mrf.mxu0  ;;  %v4439_v27 = vld [vmem:[%s8272_s3 + $0xbb8] sm:$0xff] }
 0x14f   : > { %5556 = vmatpush3.msra.mxu1 %v4444_v42  ;;  %v7619_v56 = vadd.f32 %v1090_v29, %v7340_v14  ;;  %5091 = vmatprep.subr.mxu0 %v4426_v37  ;;  %v4656_v13 = vadd.f32 %v4655_v15, %v4654_v38  ;;  %v7631_v14 = vld [vmem:[%s7457_s10 + $0x50] sm:$0xff]  ;;  %v4421_v29 = vld [vmem:[%s8272_s3 + $0xb28] sm:$0xff]  ;;  %v4420_v15 = vld [vmem:[%s8272_s3 + $0xb20] sm:$0xff] }
 0x150   : > { %5541 = vmatmul.mubr.f32.gmra.mxu1 %v2708_v10  ;;  %5557 = vmatprep.subr.mxu1 %v4443_v7  ;;  %v7650_v55 = vrot.slane %v7631_v14, 2  ;;  %v7659_v8 = vrot.slane %v7631_v14, 1  ;;  %v2684_v10 = vrot.slane %v2646_v50, 1 }
 0x151   : > { %2865 = vmatprep.mubr.f32.mxu0 %v2676_v30  ;;  %5092 = vmatpush3.msra.mxu0 %v4410_v45  ;;  %v1095_v43 = vadd.f32 %v5328_v28, %v4656_v13  ;;  %v4713_v40 = vpop.f32.mrf.mxu0  ;;  %v4405_v45 = vld [vmem:[%s8272_s3 + $0xaa8] sm:$0xff] }
 0x152   : > { %5558 = vmatpush3.msra.mxu1 %v4443_v7  ;;  %2866 = vmatmul.mubr.f32.gmra.mxu0 %v7559_v33  ;;  %v2714_v21 = vsel %vm419_vm1, %v7650_v55, %v2713_v62  ;;  %v2682_v31 = vsel %vm386_vm0, %v7659_v8, %v2681_v60  ;;  %v4438_v7 = vld [vmem:[%s8272_s3 + $0xbb0] sm:$0xff] }
 0x153   : > { %5093 = vmatprep.subr.mxu0 %v4425_v0  ;;  %5559 = vmatprep.subr.mxu1 %v4442_v34  ;;  %v7653_v39 = vadd.f32 %v1095_v43, %v7375_v23  ;;  %v4714_v63 = vpop.f32.mrf.mxu0  ;;  %v4440_v23 = vld [vmem:[%s8272_s3 + $0xbc0] sm:$0xff]  ;;  %v7710_v0 = vrot.slane %v7670_v20, 2 }
 0x154   : > { %5094 = vmatpush3.msra.mxu0 %v4409_v51  ;;  %5560 = vmatpush3.msra.mxu1 %v4442_v34  ;;  %v4715_v17 = vadd.f32 %v4714_v63, %v4713_v40  ;;  %v5363_v11 = vpop.f32.mrf.mxu1  ;;  %v2716_v34 = vrot.slane %v2646_v50, 2  ;;  %v2719_v40 = vrot.slane %v2648_v46, 2  ;;  %v2687_v63 = vrot.slane %v2648_v46, 1  ;;  %v4385_v50 = vld [vmem:[%s7457_s10 + $0x18] sm:$0x3] }
 0x155   : > { %5095 = vmatprep.subr.mxu0 %v4424_v53  ;;  %5561 = vmatprep.subr.mxu1 %v4441_v19  ;;  %v2685_v53 = vsel %vm386_vm0, %v7688_v35, %v2684_v10  ;;  %v3046_v10 = vrot.slane %v4385_v50, 1 }
 0x156   : > { %2870 = vmatprep.mubr.f32.mxu0 %v2679_v36  ;;  %5096 = vmatpush3.msra.mxu0 %v4408_v2  ;;  %v1439_v6 = vpop.f32.mrf.mxu1  ;;  %v4419_v2 = vld [vmem:[%s8272_s3 + $0xb18] sm:$0xff] }
 0x157   : > { %5562 = vmatpush3.msra.mxu1 %v4441_v19  ;;  %2871 = vmatmul.mubr.f32.gmra.mxu0 %v7598_v22  ;;  %v4716_v28 = vpop.f32.mrf.mxu0  ;;  %v1440_v42 = vadd.f32 %v4715_v17, %v1439_v6  ;;  %v2717_v17 = vsel %vm419_vm1, %v7710_v0, %v2716_v34  ;;  %v4400_v34 = vld [vmem:[%s8272_s3 + $0xa80] sm:$0xff] }
 0x158   : > { %5097 = vmatprep.subr.mxu0 %v4423_v26  ;;  %5563 = vmatprep.subr.mxu1 %v4440_v23 }
 0x159   : > { %5543 = vmatprep.mubr.f32.mxu1 %v2711_v9  ;;  %5098 = vmatpush3.msra.mxu0 %v4407_v41  ;;  %v7691_v37 = vadd.f32 %v1440_v42, %v7417_v44  ;;  %v4717_v38 = vpop.f32.mrf.mxu0  ;;  %v7703_v44 = vld [vmem:[%s7457_s10 + $0x70] sm:$0xff] }
 0x15a   : > { %5564 = vmatpush3.msra.mxu1 %v4440_v23  ;;  %5099 = vmatprep.subr.mxu0 %v4422_v59  ;;  %v4718_v30 = vadd.f32 %v4717_v38, %v4716_v28  ;;  %v7722_v43 = vrot.slane %v7703_v44, 2  ;;  %v7731_v62 = vrot.slane %v7703_v44, 1  ;;  %v4418_v41 = vld [vmem:[%s8272_s3 + $0xb10] sm:$0xff]  ;;  %v4435_v59 = vld [vmem:[%s8272_s3 + $0xb98] sm:$0xff] }
 0x15b   : > { %5544 = vmatmul.mubr.f32.gmra.mxu1 %v2714_v21  ;;  %5565 = vmatprep.subr.mxu1 %v4439_v27  ;;  %v4402_v42 = vld [vmem:[%s8272_s3 + $0xa90] sm:$0xff] }
 0x15c   : > { %2875 = vmatprep.mubr.f32.mxu0 %v2682_v31  ;;  %5100 = vmatpush3.msra.mxu0 %v4406_v32  ;;  %v1445_v13 = vadd.f32 %v5363_v11, %v4718_v30  ;;  %v4719_v51 = vpop.f32.mrf.mxu0  ;;  %v4403_v11 = vld [vmem:[%s8272_s3 + $0xa98] sm:$0xff]  ;;  %v2720_v9 = vsel %vm419_vm1, %v7722_v43, %v2719_v40  ;;  %v2688_v28 = vsel %vm386_vm0, %v7731_v62, %v2687_v63  ;;  %v4417_v32 = vld [vmem:[%s8272_s3 + $0xb08] sm:$0xff]  ;;  %v4416_v30 = vld [vmem:[%s8272_s3 + $0xb00] sm:$0xff] }
 0x15d   : > { %5566 = vmatpush3.msra.mxu1 %v4439_v27  ;;  %2876 = vmatmul.mubr.f32.gmra.mxu0 %v7631_v14  ;;  %v4432_v40 = vld [vmem:[%s8272_s3 + $0xb80] sm:$0xff] }
 0x15e   : > { %5101 = vmatprep.subr.mxu0 %v4421_v29  ;;  %5567 = vmatprep.subr.mxu1 %v4438_v7  ;;  %v7725_v19 = vadd.f32 %v1445_v13, %v7448_v47  ;;  %v4720_v36 = vpop.f32.mrf.mxu0  ;;  %v4436_v47 = vld [vmem:[%s8272_s3 + $0xba0] sm:$0xff]  ;;  %v4434_v29 = vld [vmem:[%s8272_s3 + $0xb90] sm:$0xff]  ;;  %v3078_v13 = vrot.slane %v4385_v50, 2 }
 0x15f   : > { %5102 = vmatpush3.msra.mxu0 %v4405_v45  ;;  %5568 = vmatpush3.msra.mxu1 %v4438_v7  ;;  %v4721_v26 = vadd.f32 %v4720_v36, %v4719_v51  ;;  %v4387_v7 = vld [vmem:[%s7457_s10 + $0x28] sm:$0x3]  ;;  %v3047_v51 = vsel %vm386_vm0, %v2668_v1, %v3046_v10  ;;  %v4495_v1 = vld [vmem:[%s8272_s3 + $0xcf8] sm:$0xff] }
 0x160   : > { %5103 = vmatprep.subr.mxu0 %v4420_v15  ;;  %v5366_v60 = vpop.f32.mrf.mxu1  ;;  %5569 = vmatprep.subr.mxu1 %v4437_v48  ;;  %v4433_v15 = vld [vmem:[%s8272_s3 + $0xb88] sm:$0xff]  ;;  %v3049_v36 = vrot.slane %v4387_v7, 1 }
 0x161   : > { %2880 = vmatprep.mubr.f32.mxu0 %v2685_v53  ;;  %5104 = vmatpush3.msra.mxu0 %v4404_v49 }
 0x162   : > { %5570 = vmatpush3.msra.mxu1 %v4437_v48  ;;  %v1449_v23 = vpop.f32.mrf.mxu1  ;;  %2881 = vmatmul.mubr.f32.gmra.mxu0 %v7670_v20  ;;  %v4722_v6 = vpop.f32.mrf.mxu0  ;;  %v3081_v48 = vrot.slane %v4387_v7, 2 }
 0x163   : > { %5105 = vmatprep.subr.mxu0 %v4419_v2  ;;  %v1450_v21 = vadd.f32 %v4721_v26, %v1449_v23  ;;  %5571 = vmatprep.subr.mxu1 %v4436_v47  ;;  %v4479_v26 = vld [vmem:[%s8272_s3 + $0xc78] sm:$0xff] }
 0x164   : > { %5546 = vmatprep.mubr.f32.mxu1 %v2717_v17  ;;  %5106 = vmatpush3.msra.mxu0 %v4403_v11  ;;  %v4723_v31 = vpop.f32.mrf.mxu0  ;;  %v3082_v17 = vsel %vm419_vm1, %v7566_v3, %v3081_v48  ;;  %v4494_v11 = vld [vmem:[%s8272_s3 + $0xcf0] sm:$0xff] }
 0x165   : > { %5572 = vmatpush3.msra.mxu1 %v4436_v47  ;;  %v7757_v27 = vadd.f32 %v1450_v21, %v7483_v18  ;;  %5107 = vmatprep.subr.mxu0 %v4418_v41  ;;  %v4724_v38 = vadd.f32 %v4723_v31, %v4722_v6  ;;  %v4401_v18 = vld [vmem:[%s8272_s3 + $0xa88] sm:$0xff]  ;;  %v4478_v41 = vld [vmem:[%s8272_s3 + $0xc70] sm:$0xff] }
 0x166   : > { %5547 = vmatmul.mubr.f32.gmra.mxu1 %v2720_v9  ;;  %5573 = vmatprep.subr.mxu1 %v4435_v59  ;;  %v4477_v31 = vld [vmem:[%s8272_s3 + $0xc68] sm:$0xff] }
 0x167   : > { %2885 = vmatprep.mubr.f32.mxu0 %v2688_v28  ;;  %5108 = vmatpush3.msra.mxu0 %v4402_v42  ;;  %v1455_v45 = vadd.f32 %v5366_v60, %v4724_v38  ;;  %v4725_v46 = vpop.f32.mrf.mxu0  ;;  %v4389_v60 = vld [vmem:[%s7457_s10 + $0x38] sm:$0x3]  ;;  %v4510_v42 = vld [vmem:[%s8272_s3 + $0xd70] sm:$0xff] }
 0x168   : > { %5574 = vmatpush3.msra.mxu1 %v4435_v59  ;;  %2886 = vmatmul.mubr.f32.gmra.mxu0 %v7703_v44  ;;  %v3052_v50 = vrot.slane %v4389_v60, 1  ;;  %v4493_v59 = vld [vmem:[%s8272_s3 + $0xce8] sm:$0xff]  ;;  %v3084_v10 = vrot.slane %v4389_v60, 2  ;;  %v4507_v60 = vld [vmem:[%s8272_s3 + $0xd58] sm:$0xff] }
 0x169   : > { %5109 = vmatprep.subr.mxu0 %v4417_v32  ;;  %5575 = vmatprep.subr.mxu1 %v4434_v29  ;;  %v7783_v53 = vadd.f32 %v1455_v45, %v7511_v25  ;;  %v4726_v49 = vpop.f32.mrf.mxu0  ;;  %v3079_v25 = vsel %vm419_vm1, %v2700_v24, %v3078_v13  ;;  %v4511_v24 = vld [vmem:[%s8272_s3 + $0xd78] sm:$0xff]  ;;  %v4492_v32 = vld [vmem:[%s8272_s3 + $0xce0] sm:$0xff] }
 0x16a   : > { %5110 = vmatpush3.msra.mxu0 %v4401_v18  ;;  %5576 = vmatpush3.msra.mxu1 %v4434_v29  ;;  %v4727_v2 = vadd.f32 %v4726_v49, %v4725_v46  ;;  %v4509_v18 = vld [vmem:[%s8272_s3 + $0xd68] sm:$0xff]  ;;  %v3053_v7 = vsel %vm386_vm0, %v7587_v5, %v3052_v50  ;;  %v4508_v49 = vld [vmem:[%s8272_s3 + $0xd60] sm:$0xff] }
 0x16b   : > { %5111 = vmatprep.subr.mxu0 %v4416_v30  ;;  %v5369_v63 = vpop.f32.mrf.mxu1  ;;  %5577 = vmatprep.subr.mxu1 %v4433_v15  ;;  %v4476_v30 = vld [vmem:[%s8272_s3 + $0xc60] sm:$0xff]  ;;  %v4473_v50 = vld [vmem:[%s8272_s3 + $0xc48] sm:$0xff] }
 0x16c   : > { %5112 = vmatpush3.msra.mxu0 %v4400_v34  ;;  %3230 = vmatprep.mubr.f32.mxu0 %v3047_v51  ;;  %v4491_v34 = vld [vmem:[%s8272_s3 + $0xcd8] sm:$0xff] }
 0x16d   : > { %5578 = vmatpush3.msra.mxu1 %v4433_v15  ;;  %v1459_v47 = vpop.f32.mrf.mxu1  ;;  %3231 = vmatmul.mubr.f32.vlgmr.msra.gmra.mxu0 %v7495_v57  ;;  %v4728_v23 = vpop.f32.mrf.mxu0  ;;  %v3050_v57 = vsel %vm386_vm0, %v7544_v58, %v3049_v36  ;;  %v4393_v36 = vld [vmem:[%s7457_s10 + $0x58] sm:$0x3] }
 0x16e   : > { %5579 = vmatprep.subr.mxu1 %v4432_v40  ;;  %v1460_v9 = vadd.f32 %v4727_v2, %v1459_v47  ;;  %5161 = vmatprep.subr.mxu0 %v4495_v1  ;;  %v4490_v1 = vld [vmem:[%s8272_s3 + $0xcd0] sm:$0xff] }
 0x16f   : > { %5580 = vmatpush3.msra.mxu1 %v4432_v40  ;;  %5581 = vmatprep.mubr.f32.mxu1 %v3079_v25  ;;  %v4729_v21 = vpop.f32.mrf.mxu0  ;;  %v4475_v40 = vld [vmem:[%s8272_s3 + $0xc58] sm:$0xff] }
 0x170   : > { %5162 = vmatpush3.msra.mxu0 %v4479_v26  ;;  %v7813_v6 = vadd.f32 %v1460_v9, %v7547_v4  ;;  %5582 = vmatmul.mubr.f32.vlgmr.msra.gmra.mxu1 %v3082_v17  ;;  %v4730_v28 = vadd.f32 %v4729_v21, %v4728_v23  ;;  %v4391_v4 = vld [vmem:[%s7457_s10 + $0x48] sm:$0x3]  ;;  %v4474_v17 = vld [vmem:[%s8272_s3 + $0xc50] sm:$0xff]  ;;  %v4488_v21 = vld [vmem:[%s8272_s3 + $0xcc0] sm:$0xff] }
 0x171   : > { %5163 = vmatprep.subr.mxu0 %v4494_v11  ;;  %5593 = vmatprep.subr.mxu1 %v4511_v24  ;;  %v3087_v45 = vrot.slane %v4391_v4, 2  ;;  %v3055_v13 = vrot.slane %v4391_v4, 1  ;;  %v3058_v11 = vrot.slane %v4393_v36, 1 }
 0x172   : > { %3235 = vmatprep.mubr.f32.mxu0 %v3050_v57  ;;  %5164 = vmatpush3.msra.mxu0 %v4478_v41  ;;  %v1465_v38 = vadd.f32 %v5369_v63, %v4730_v28  ;;  %v4731_v29 = vpop.f32.mrf.mxu0  ;;  %v4506_v41 = vld [vmem:[%s8272_s3 + $0xd50] sm:$0xff] }
 0x173   : > { %5594 = vmatpush3.msra.mxu1 %v4511_v24  ;;  %3236 = vmatmul.mubr.f32.gmra.mxu0 %v7525_v12  ;;  %v3088_v63 = vsel %vm419_vm1, %v7638_v61, %v3087_v45  ;;  %v3056_v47 = vsel %vm386_vm0, %v7616_v52, %v3055_v13  ;;  %v4489_v24 = vld [vmem:[%s8272_s3 + $0xcc8] sm:$0xff]  ;;  %v3059_v4 = vsel %vm386_vm0, %v7659_v8, %v3058_v11  ;;  %v4397_v13 = vld [vmem:[%s7457_s10 + $0x78] sm:$0x3] }
 0x174   : > { %5165 = vmatprep.subr.mxu0 %v4493_v59  ;;  %5595 = vmatprep.subr.mxu1 %v4510_v42  ;;  %v7838_v46 = vadd.f32 %v1465_v38, %v7581_v54  ;;  %v4732_v15 = vpop.f32.mrf.mxu0  ;;  %v3085_v54 = vsel %vm419_vm1, %v7578_v16, %v3084_v10  ;;  %v3090_v59 = vrot.slane %v4393_v36, 2  ;;  %v4503_v36 = vld [vmem:[%s8272_s3 + $0xd38] sm:$0xff]  ;;  %v4469_v11 = vld [vmem:[%s8272_s3 + $0xc28] sm:$0xff] }
 0x175   : > { %5166 = vmatpush3.msra.mxu0 %v4477_v31  ;;  %5596 = vmatpush3.msra.mxu1 %v4510_v42  ;;  %v4733_v51 = vadd.f32 %v4732_v15, %v4731_v29  ;;  %v4505_v31 = vld [vmem:[%s8272_s3 + $0xd48] sm:$0xff]  ;;  %v4504_v15 = vld [vmem:[%s8272_s3 + $0xd40] sm:$0xff] }
 0x176   : > { %5167 = vmatprep.subr.mxu0 %v4492_v32  ;;  %v5372_v48 = vpop.f32.mrf.mxu1  ;;  %5597 = vmatprep.subr.mxu1 %v4509_v18  ;;  %v4472_v32 = vld [vmem:[%s8272_s3 + $0xc40] sm:$0xff] }
 0x177   : > { %3240 = vmatprep.mubr.f32.mxu0 %v3053_v7  ;;  %5168 = vmatpush3.msra.mxu0 %v4476_v30 }
 0x178   : > { %5598 = vmatpush3.msra.mxu1 %v4509_v18  ;;  %v1469_v2 = vpop.f32.mrf.mxu1  ;;  %3241 = vmatmul.mubr.f32.gmra.mxu0 %v7559_v33  ;;  %v4734_v25 = vpop.f32.mrf.mxu0  ;;  %v4487_v18 = vld [vmem:[%s8272_s3 + $0xcb8] sm:$0xff] }
 0x179   : > { %5169 = vmatprep.subr.mxu0 %v4491_v34  ;;  %v1470_v26 = vadd.f32 %v4733_v51, %v1469_v2  ;;  %5599 = vmatprep.subr.mxu1 %v4508_v49  ;;  %v4471_v34 = vld [vmem:[%s8272_s3 + $0xc38] sm:$0xff] }
 0x17a   : > { %5584 = vmatprep.mubr.f32.mxu1 %v3085_v54  ;;  %5170 = vmatpush3.msra.mxu0 %v4475_v40  ;;  %v4735_v9 = vpop.f32.mrf.mxu0 }
 0x17b   : > { %5600 = vmatpush3.msra.mxu1 %v4508_v49  ;;  %v7867_v23 = vadd.f32 %v1470_v26, %v7619_v56  ;;  %5171 = vmatprep.subr.mxu0 %v4490_v1  ;;  %v4736_v57 = vadd.f32 %v4735_v9, %v4734_v25  ;;  %v4395_v56 = vld [vmem:[%s7457_s10 + $0x68] sm:$0x3]  ;;  %v4486_v49 = vld [vmem:[%s8272_s3 + $0xcb0] sm:$0xff]  ;;  %v3064_v1 = vrot.slane %v4397_v13, 1 }
 0x17c   : > { %5585 = vmatmul.mubr.f32.gmra.mxu1 %v3088_v63  ;;  %5601 = vmatprep.subr.mxu1 %v4507_v60  ;;  %v3093_v10 = vrot.slane %v4395_v56, 2  ;;  %v3061_v7 = vrot.slane %v4395_v56, 1  ;;  %v4470_v63 = vld [vmem:[%s8272_s3 + $0xc30] sm:$0xff]  ;;  %v4399_v9 = vld [vmem:[%s7457_s10 + $0x88] sm:$0x3] }
 0x17d   : > { %3245 = vmatprep.mubr.f32.mxu0 %v3056_v47  ;;  %5172 = vmatpush3.msra.mxu0 %v4474_v17  ;;  %v1475_v28 = vadd.f32 %v5372_v48, %v4736_v57  ;;  %v4793_v42 = vpop.f32.mrf.mxu0  ;;  %v4502_v47 = vld [vmem:[%s8272_s3 + $0xd30] sm:$0xff]  ;;  %v3096_v57 = vrot.slane %v4397_v13, 2  ;;  %v4501_v56 = vld [vmem:[%s8272_s3 + $0xd28] sm:$0xff] }
 0x17e   : > { %5602 = vmatpush3.msra.mxu1 %v4507_v60  ;;  %3246 = vmatmul.mubr.f32.gmra.mxu0 %v7598_v22  ;;  %v3094_v48 = vsel %vm419_vm1, %v7710_v0, %v3093_v10  ;;  %v3062_v2 = vsel %vm386_vm0, %v7688_v35, %v3061_v7  ;;  %v4485_v60 = vld [vmem:[%s8272_s3 + $0xca8] sm:$0xff] }
 0x17f   : > { %5173 = vmatprep.subr.mxu0 %v4489_v24  ;;  %5603 = vmatprep.subr.mxu1 %v4506_v41  ;;  %v7892_v38 = vadd.f32 %v1475_v28, %v7653_v39  ;;  %v4794_v29 = vpop.f32.mrf.mxu0  ;;  %v3091_v39 = vsel %vm419_vm1, %v7650_v55, %v3090_v59  ;;  %v4484_v24 = vld [vmem:[%s8272_s3 + $0xca0] sm:$0xff]  ;;  %v4449_v13 = vld [vmem:[%s7457_s10 + $0x28] sm:$0x3] }
 0x180   : > { %5174 = vmatpush3.msra.mxu0 %v4473_v50  ;;  %5604 = vmatpush3.msra.mxu1 %v4506_v41  ;;  %v4795_v30 = vadd.f32 %v4794_v29, %v4793_v42  ;;  %v5407_v45 = vpop.f32.mrf.mxu1  ;;  %v4468_v59 = vld [vmem:[%s8272_s3 + $0xc20] sm:$0xff]  ;;  %v3099_v42 = vrot.slane %v4399_v9, 2  ;;  %v3067_v29 = vrot.slane %v4399_v9, 1 }
 0x181   : > { %5175 = vmatprep.subr.mxu0 %v4488_v21  ;;  %5605 = vmatprep.subr.mxu1 %v4505_v31  ;;  %v3065_v21 = vsel %vm386_vm0, %v7731_v62, %v3064_v1  ;;  %v3426_v1 = vrot.slane %v4449_v13, 1 }
 0x182   : > { %3250 = vmatprep.mubr.f32.mxu0 %v3059_v4  ;;  %5176 = vmatpush3.msra.mxu0 %v4472_v32  ;;  %v1818_v51 = vpop.f32.mrf.mxu1  ;;  %v4483_v32 = vld [vmem:[%s8272_s3 + $0xc98] sm:$0xff] }
 0x183   : > { %5606 = vmatpush3.msra.mxu1 %v4505_v31  ;;  %3251 = vmatmul.mubr.f32.gmra.mxu0 %v7631_v14  ;;  %v4796_v54 = vpop.f32.mrf.mxu0  ;;  %v1819_v40 = vadd.f32 %v4795_v30, %v1818_v51  ;;  %v3097_v30 = vsel %vm419_vm1, %v7722_v43, %v3096_v57  ;;  %v4497_v57 = vld [vmem:[%s8272_s3 + $0xd08] sm:$0xff] }
 0x184   : > { %5177 = vmatprep.subr.mxu0 %v4487_v18  ;;  %5607 = vmatprep.subr.mxu1 %v4504_v15 }
 0x185   : > { %5587 = vmatprep.mubr.f32.mxu1 %v3091_v39  ;;  %5178 = vmatpush3.msra.mxu0 %v4471_v34  ;;  %v7921_v25 = vadd.f32 %v1819_v40, %v7691_v37  ;;  %v4797_v26 = vpop.f32.mrf.mxu0  ;;  %v7933_v37 = vld [vmem:[%s7457_s10 + $0x80] sm:$0xff]  ;;  %v4482_v34 = vld [vmem:[%s8272_s3 + $0xc90] sm:$0xff] }
 0x186   : > { %5608 = vmatpush3.msra.mxu1 %v4504_v15  ;;  %5179 = vmatprep.subr.mxu0 %v4486_v49  ;;  %v4798_v17 = vadd.f32 %v4797_v26, %v4796_v54  ;;  %v3098_v28 = vrot.slane %v7933_v37, 2  ;;  %v3066_v10 = vrot.slane %v7933_v37, 1  ;;  %v4499_v49 = vld [vmem:[%s8272_s3 + $0xd18] sm:$0xff]  ;;  %v4466_v40 = vld [vmem:[%s8272_s3 + $0xc10] sm:$0xff] }
 0x187   : > { %5588 = vmatmul.mubr.f32.gmra.mxu1 %v3094_v48  ;;  %5609 = vmatprep.subr.mxu1 %v4503_v36  ;;  %v4451_v26 = vld [vmem:[%s7457_s10 + $0x38] sm:$0x3] }
 0x188   : > { %3255 = vmatprep.mubr.f32.mxu0 %v3062_v2  ;;  %5180 = vmatpush3.msra.mxu0 %v4470_v63  ;;  %v1824_v41 = vadd.f32 %v5407_v45, %v4798_v17  ;;  %v4799_v50 = vpop.f32.mrf.mxu0  ;;  %v4467_v45 = vld [vmem:[%s8272_s3 + $0xc18] sm:$0xff]  ;;  %v3100_v39 = vsel %vm419_vm1, %v3098_v28, %v3099_v42  ;;  %v3068_v54 = vsel %vm386_vm0, %v3066_v10, %v3067_v29  ;;  %v4481_v63 = vld [vmem:[%s8272_s3 + $0xc88] sm:$0xff]  ;;  %v4480_v17 = vld [vmem:[%s8272_s3 + $0xc80] sm:$0xff] }
 0x189   : > { %5610 = vmatpush3.msra.mxu1 %v4503_v36  ;;  %3256 = vmatmul.mubr.f32.gmra.mxu0 %v7670_v20 }
 0x18a   : > { %5181 = vmatprep.subr.mxu0 %v4485_v60  ;;  %5611 = vmatprep.subr.mxu1 %v4502_v47  ;;  %v7950_v31 = vadd.f32 %v1824_v41, %v7725_v19  ;;  %v4800_v4 = vpop.f32.mrf.mxu0  ;;  %v4500_v19 = vld [vmem:[%s8272_s3 + $0xd20] sm:$0xff] }
 0x18b   : > { %5182 = vmatpush3.msra.mxu0 %v4469_v11  ;;  %5612 = vmatpush3.msra.mxu1 %v4502_v47  ;;  %v4801_v18 = vadd.f32 %v4800_v4, %v4799_v50  ;;  %v4498_v47 = vld [vmem:[%s8272_s3 + $0xd10] sm:$0xff]  ;;  %v3458_v11 = vrot.slane %v4449_v13, 2  ;;  %v4464_v41 = vld [vmem:[%s8272_s3 + $0xc00] sm:$0xff]  ;;  %v3461_v50 = vrot.slane %v4451_v26, 2  ;;  %v4455_v4 = vld [vmem:[%s7457_s10 + $0x58] sm:$0x3] }
 0x18c   : > { %5183 = vmatprep.subr.mxu0 %v4484_v24  ;;  %v5410_v7 = vpop.f32.mrf.mxu1  ;;  %5613 = vmatprep.subr.mxu1 %v4501_v56 }
 0x18d   : > { %3260 = vmatprep.mubr.f32.mxu0 %v3065_v21  ;;  %5184 = vmatpush3.msra.mxu0 %v4468_v59  ;;  %v4453_v21 = vld [vmem:[%s7457_s10 + $0x48] sm:$0x3]  ;;  %v3427_v59 = vsel %vm386_vm0, %v7544_v58, %v3426_v1  ;;  %v3459_v58 = vsel %vm419_vm1, %v7566_v3, %v3458_v11 }
 0x18e   : > { %5614 = vmatpush3.msra.mxu1 %v4501_v56  ;;  %v1828_v15 = vpop.f32.mrf.mxu1  ;;  %3261 = vmatmul.mubr.f32.gmra.mxu0 %v7703_v44  ;;  %v4802_v51 = vpop.f32.mrf.mxu0  ;;  %v3429_v56 = vrot.slane %v4451_v26, 1  ;;  %v3464_v42 = vrot.slane %v4453_v21, 2 }
 0x18f   : > { %5185 = vmatprep.subr.mxu0 %v4483_v32  ;;  %v1829_v48 = vadd.f32 %v4801_v18, %v1828_v15  ;;  %5615 = vmatprep.subr.mxu1 %v4500_v19  ;;  %v4496_v18 = vld [vmem:[%s8272_s3 + $0xd00] sm:$0xff]  ;;  %v3467_v15 = vrot.slane %v4455_v4, 2 }
 0x190   : > { %5590 = vmatprep.mubr.f32.mxu1 %v3097_v30  ;;  %5186 = vmatpush3.msra.mxu0 %v4467_v45  ;;  %v4803_v2 = vpop.f32.mrf.mxu0  ;;  %v3432_v30 = vrot.slane %v4453_v21, 1  ;;  %v3430_v45 = vsel %vm386_vm0, %v7587_v5, %v3429_v56  ;;  %v3465_v13 = vsel %vm419_vm1, %v7638_v61, %v3464_v42  ;;  %v3435_v5 = vrot.slane %v4455_v4, 1 }
 0x191   : > { %5616 = vmatpush3.msra.mxu1 %v4500_v19  ;;  %v7982_v36 = vadd.f32 %v1829_v48, %v7757_v27  ;;  %5187 = vmatprep.subr.mxu0 %v4482_v34  ;;  %v4804_v60 = vadd.f32 %v4803_v2, %v4802_v51  ;;  %v4465_v27 = vld [vmem:[%s8272_s3 + $0xc08] sm:$0xff]  ;;  %v4459_v51 = vld [vmem:[%s7457_s10 + $0x78] sm:$0x3]  ;;  %v3468_v61 = vsel %vm419_vm1, %v7650_v55, %v3467_v15 }
 0x192   : > { %5591 = vmatmul.mubr.f32.gmra.mxu1 %v3100_v39  ;;  %5617 = vmatprep.subr.mxu1 %v4499_v49  ;;  %v4457_v39 = vld [vmem:[%s7457_s10 + $0x68] sm:$0x3] }
 0x193   : > { %3265 = vmatprep.mubr.f32.mxu0 %v3068_v54  ;;  %5188 = vmatpush3.msra.mxu0 %v4466_v40  ;;  %v1834_v9 = vadd.f32 %v5410_v7, %v4804_v60  ;;  %v4805_v24 = vpop.f32.mrf.mxu0  ;;  %v3470_v3 = vrot.slane %v4457_v39, 2  ;;  %v3473_v40 = vrot.slane %v4459_v51, 2  ;;  %v4461_v2 = vld [vmem:[%s7457_s10 + $0x88] sm:$0x3]  ;;  %v4462_v60 = vld [vmem:[%s7457_s10 + $0x90] sm:$0xff] }
 0x194   : > { %5618 = vmatpush3.msra.mxu1 %v4499_v49  ;;  %3266 = vmatmul.mubr.f32.gmra.mxu0 %v7933_v37  ;;  %v3476_v26 = vrot.slane %v4461_v2, 2  ;;  %v3478_v11 = vrot.slane %v4462_v60, 2  ;;  %v3444_v42 = vrot.slane %v4461_v2, 1 }
 0x195   : > { %5189 = vmatprep.subr.mxu0 %v4481_v63  ;;  %5619 = vmatprep.subr.mxu1 %v4498_v47  ;;  %v8009_v32 = vadd.f32 %v1834_v9, %v7783_v53  ;;  %v4806_v29 = vpop.f32.mrf.mxu0  ;;  %v3462_v53 = vsel %vm419_vm1, %v7578_v16, %v3461_v50  ;;  %v3433_v16 = vsel %vm386_vm0, %v7616_v52, %v3432_v30  ;;  %v4463_v52 = vld [vmem:[%s7457_s10 + $0x98] sm:$0x3]  ;;  %s8137_s10 = sand.u32 1, %s5817_s19  }
 0x196   : > { %5190 = vmatpush3.msra.mxu0 %v4465_v27  ;;  %5620 = vmatpush3.msra.mxu1 %v4498_v47  ;;  %v4807_v7 = vadd.f32 %v4806_v29, %v4805_v24  ;;  %v3471_v1 = vsel %vm419_vm1, %v7710_v0, %v3470_v3  ;;  %v3436_v27 = vsel %vm386_vm0, %v7659_v8, %v3435_v5  ;;  %s4027_s16 = sshll.u32 %s8137_s10, 6 }
 0x197   : > { %5191 = vmatprep.subr.mxu0 %v4480_v17  ;;  %v5413_v19 = vpop.f32.mrf.mxu1  ;;  %5621 = vmatprep.subr.mxu1 %v4497_v57  ;;  %v3438_v17 = vrot.slane %v4457_v39, 1  ;;  %v3474_v55 = vsel %vm419_vm1, %v7722_v43, %v3473_v40  ;;  %v3477_v24 = vsel %vm419_vm1, %v3098_v28, %v3476_v26  ;;  %v3441_v43 = vrot.slane %v4459_v51, 1  ;;  %s8144_s13 = scalar_lea.vmem [#allocation3], %s4027_s16 }
 0x198   : > { %5192 = vmatpush3.msra.mxu0 %v4464_v41  ;;  %3610 = vmatprep.mubr.f32.mxu0 %v3427_v59  ;;  %s3846_s8 = sshll.u32 %s8144_s13, 4  ;;  %s8190_s8 = int_to_ptr.vmem [resolvable:$true] %s3846_s8 }
 0x199   : > { %5622 = vmatpush3.msra.mxu1 %v4497_v57  ;;  %v1838_v34 = vpop.f32.mrf.mxu1  ;;  %3611 = vmatmul.mubr.f32.vlgmr.msra.gmra.mxu0 %v7525_v12  ;;  %v4808_v48 = vpop.f32.mrf.mxu0  ;;  %v3439_v8 = vsel %vm386_vm0, %v7688_v35, %v3438_v17  ;;  %v3442_v59 = vsel %vm386_vm0, %v7731_v62, %v3441_v43  ;;  %s5719_s16 = scalar_lea.vmem %s8190_s8, 1024  ;;  %p5726_p6 = scmp.lt.s32.totalorder %s8190_s8, %s5724_s9 }
 0x19a   : > { %5623 = vmatprep.subr.mxu1 %v4496_v18  ;;  %v1839_v49 = vadd.f32 %v4807_v7, %v1838_v34  ;;  %5625 = vmatprep.mubr.f32.mxu1 %v3459_v58  ;;  %v3447_v7 = vrot.slane %v4463_v52, 1  ;;  %p5720_p2 = scmp.ne.s32.totalorder %s8190_s8, %s5719_s16  ;;  %p5727_p7 = scmp.lt.s32.totalorder %s5725_s12, %s5719_s16 }
 0x19b   : > { %5624 = vmatpush3.msra.mxu1 %v4496_v18  ;;  %3615 = vmatprep.mubr.f32.mxu0 %v3430_v45  ;;  %v4809_v54 = vpop.f32.mrf.mxu0  ;;  %v3445_v18 = vsel %vm386_vm0, %v3066_v10, %v3444_v42 }
 0x19c   : > { %5626 = vmatmul.mubr.f32.vlgmr.msra.gmra.mxu1 %v3462_v53  ;;  %v8028_v12 = vadd.f32 %v1839_v49, %v7813_v6  ;;  %v4810_v63 = vadd.f32 %v4809_v54, %v4808_v48  ;;  %p5721_p4 = pnand %p5720_p2, %p5928_p3  ;;  %p5728_p9 = por %p5727_p7, %p5726_p6 }
 0x19d   : > { %5628 = vmatprep.mubr.f32.mxu1 %v3465_v13  ;;  %3616 = vmatmul.mubr.f32.gmra.mxu0 %v7559_v33  ;;  %v3479_v33 = vrot.slane %v4463_v52, 2 }
 0x19e   : > { %3620 = vmatprep.mubr.f32.mxu0 %v3433_v16  ;;  %v1844_v47 = vadd.f32 %v5413_v19, %v4810_v63  ;;  %v4811_v6 = vpop.f32.mrf.mxu0  ;;  %p5722_p5 = pneg %p5721_p4 }
 0x1a0   : > { %5629 = vmatmul.mubr.f32.gmra.mxu1 %v3468_v61  ;;  %v8043_v9 = vadd.f32 %v1844_v47, %v7838_v46  ;;  %v4812_v0 = vpop.f32.mrf.mxu0  ;;  %v3480_v46 = vsel %vm419_vm1, %v3478_v11, %v3479_v33  ;;  %p5729_p10 = pnand %p5728_p9, %p5722_p5 }
 0x1a1   : > { %5631 = vmatprep.mubr.f32.mxu1 %v3471_v1  ;;  %3621 = vmatmul.mubr.f32.gmra.mxu0 %v7598_v22  ;;  %v4813_v57 = vadd.f32 %v4812_v0, %v4811_v6 }
 0x1a2   : > { %v5416_v41 = vpop.f32.mrf.mxu1  ;;  %3625 = vmatprep.mubr.f32.mxu0 %v3436_v27 }
 0x1a4   : > { %5632 = vmatmul.mubr.f32.gmra.mxu1 %v3474_v55  ;;  %v1848_v50 = vpop.f32.mrf.mxu1  ;;  %v4814_v56 = vpop.f32.mrf.mxu0 }
 0x1a5   : > { %5634 = vmatprep.mubr.f32.mxu1 %v3477_v24  ;;  %v1849_v21 = vadd.f32 %v4813_v57, %v1848_v50  ;;  %3626 = vmatmul.mubr.f32.gmra.mxu0 %v7631_v14  ;;  %v3446_v14 = vrot.slane %v4462_v60, 1 }
 0x1a6   : > { %3630 = vmatprep.mubr.f32.mxu0 %v3439_v8  ;;  %v4815_v28 = vpop.f32.mrf.mxu0 }
 0x1a7   : > { %v1863_v22 = vadd.f32 %v1849_v21, %v7867_v23  ;;  %v4816_v35 = vadd.f32 %v4815_v28, %v4814_v56 }
 0x1a8   : > { %5635 = vmatmul.mubr.f32.gmra.mxu1 %v3480_v46 }
 0x1a9   : > { %3631 = vmatmul.mubr.f32.gmra.mxu0 %v7670_v20  ;;  %v1854_v4 = vadd.f32 %v5416_v41, %v4816_v35  ;;  %v4873_v29 = vpop.f32.mrf.mxu0  ;;  %v3448_v20 = vsel %vm386_vm0, %v3446_v14, %v3447_v7 }
 0x1aa   : > { %3635 = vmatprep.mubr.f32.mxu0 %v3442_v59 }
 0x1ab   : > { %v1864_v23 = vadd.f32 %v1854_v4, %v7892_v38  ;;  %v4874_v19 = vpop.f32.mrf.mxu0 }
 0x1ac   : > { %v4875_v58 = vadd.f32 %v4874_v19, %v4873_v29  ;;  %v5451_v30 = vpop.f32.mrf.mxu1 }
 0x1ad   : > { %3636 = vmatmul.mubr.f32.gmra.mxu0 %v7703_v44 }
 0x1ae   : > { %3640 = vmatprep.mubr.f32.mxu0 %v3445_v18  ;;  %v2198_v62 = vpop.f32.mrf.mxu1 }
 0x1af   : > { %v4876_v53 = vpop.f32.mrf.mxu0  ;;  %v2199_v45 = vadd.f32 %v4875_v58, %v2198_v62 }
 0x1b1   : > { %3641 = vmatmul.mubr.f32.gmra.mxu0 %v7933_v37  ;;  %v2237_v15 = vadd.f32 %v2199_v45, %v7921_v25  ;;  %v4877_v10 = vpop.f32.mrf.mxu0 }
 0x1b2   : > { %3645 = vmatprep.mubr.f32.mxu0 %v3448_v20  ;;  %v4878_v39 = vadd.f32 %v4877_v10, %v4876_v53 }
 0x1b4   : > { %v2204_v34 = vadd.f32 %v5451_v30, %v4878_v39  ;;  %v4879_v38 = vpop.f32.mrf.mxu0 }
 0x1b5   : > { %3646 = vmatmul.mubr.f32.gmra.mxu0 %v4462_v60 }
 0x1b6   : > { %v2238_v13 = vadd.f32 %v2204_v34, %v7950_v31  ;;  %v4880_v3 = vpop.f32.mrf.mxu0 }
 0x1b7   : > { %v4881_v44 = vadd.f32 %v4880_v3, %v4879_v38 }
 0x1b8   : > { %v5454_v51 = vpop.f32.mrf.mxu1 }
 0x1ba   : > { %v2208_v48 = vpop.f32.mrf.mxu1  ;;  %v4882_v49 = vpop.f32.mrf.mxu0 }
 0x1bb   : > { %v2209_v16 = vadd.f32 %v4881_v44, %v2208_v48 }
 0x1bc   : > { %v4883_v54 = vpop.f32.mrf.mxu0 }
 0x1bd   : > { %v2239_v5 = vadd.f32 %v2209_v16, %v7982_v36  ;;  %v4884_v37 = vadd.f32 %v4883_v54, %v4882_v49 }
 0x1bf   : > { %v2214_v61 = vadd.f32 %v5454_v51, %v4884_v37  ;;  %v4885_v25 = vpop.f32.mrf.mxu0 }
 0x1c1   : > { %v2240_v40 = vadd.f32 %v2214_v61, %v8009_v32  ;;  %v4886_v2 = vpop.f32.mrf.mxu0 }
 0x1c2   : > { %v4887_v63 = vadd.f32 %v4886_v2, %v4885_v25 }
 0x1c3   : > { %v5457_v1 = vpop.f32.mrf.mxu1 }
 0x1c5   : > { %v2218_v26 = vpop.f32.mrf.mxu1  ;;  %v4888_v60 = vpop.f32.mrf.mxu0 }
 0x1c6   : > { %v2219_v31 = vadd.f32 %v4887_v63, %v2218_v26 }
 0x1c7   : > { %v4889_v47 = vpop.f32.mrf.mxu0 }
 0x1c8   : > { %v2241_v52 = vadd.f32 %v2219_v31, %v8028_v12  ;;  %v4890_v6 = vadd.f32 %v4889_v47, %v4888_v60 }
 0x1ca   : > { %v2224_v27 = vadd.f32 %v5457_v1, %v4890_v6  ;;  %v4891_v17 = vpop.f32.mrf.mxu0 }
 0x1cc   : > { %v2242_v36 = vadd.f32 %v2224_v27, %v8043_v9  ;;  %v4892_v55 = vpop.f32.mrf.mxu0 }
 0x1cd   : > { %v4893_v11 = vadd.f32 %v4892_v55, %v4891_v17 }
 0x1ce   : > { %v5460_v33 = vpop.f32.mrf.mxu1 }
 0x1d0   : > { %v2228_v0 = vpop.f32.mrf.mxu1  ;;  %v4894_v24 = vpop.f32.mrf.mxu0 }
 0x1d1   : > { %v2229_v32 = vadd.f32 %v4893_v11, %v2228_v0 }
 0x1d2   : > { %v4895_v41 = vpop.f32.mrf.mxu0 }
 0x1d3   : > { %v2243_v57 = vadd.f32 %v2229_v32, %v1863_v22  ;;  %v4896_v8 = vadd.f32 %v4895_v41, %v4894_v24 }
 0x1d5   : > { %v2234_v43 = vadd.f32 %v5460_v33, %v4896_v8  ;;  %v4953_v50 = vpop.f32.mrf.mxu0 }
 0x1d7   : > { %v2244_v46 = vadd.f32 %v2234_v43, %v1864_v23  ;;  %v4954_v56 = vpop.f32.mrf.mxu0 }
 0x1d8   : > { %v4955_v12 = vadd.f32 %v4954_v56, %v4953_v50  ;;  %v5495_v21 = vpop.f32.mrf.mxu1 }
 0x1da   : > { %v2578_v28 = vpop.f32.mrf.mxu1 }
 0x1db   : > { %v4956_v59 = vpop.f32.mrf.mxu0  ;;  %v2579_v42 = vadd.f32 %v4955_v12, %v2578_v28 }
 0x1dd   : > { %v8070_v35 = vadd.f32 %v2579_v42, %v2237_v15  ;;  %v4957_v9 = vpop.f32.mrf.mxu0 }
 0x1de   : > { %v4958_v4 = vadd.f32 %v4957_v9, %v4956_v59 }
 0x1e0   : > { %v2584_v29 = vadd.f32 %v5495_v21, %v4958_v4  ;;  %v4959_v18 = vpop.f32.mrf.mxu0 }
 0x1e2   : > { %v8072_v14 = vadd.f32 %v2584_v29, %v2238_v13  ;;  %v4960_v22 = vpop.f32.mrf.mxu0 }
 0x1e3   : > { %v4961_v7 = vadd.f32 %v4960_v22, %v4959_v18 }
 0x1e4   : > { %v5498_v19 = vpop.f32.mrf.mxu1 }
 0x1e6   : > { %v2588_v58 = vpop.f32.mrf.mxu1  ;;  %v4962_v30 = vpop.f32.mrf.mxu0 }
 0x1e7   : > { %v2589_v23 = vadd.f32 %v4961_v7, %v2588_v58 }
 0x1e8   : > { %v4963_v20 = vpop.f32.mrf.mxu0 }
 0x1e9   : > { %v8074_v62 = vadd.f32 %v2589_v23, %v2239_v5  ;;  %v4964_v53 = vadd.f32 %v4963_v20, %v4962_v30 }
 0x1eb   : > { %v2594_v45 = vadd.f32 %v5498_v19, %v4964_v53  ;;  %v4965_v10 = vpop.f32.mrf.mxu0 }
 0x1ed   : > { %v8076_v15 = vadd.f32 %v2594_v45, %v2240_v40  ;;  %v4966_v39 = vpop.f32.mrf.mxu0 }
 0x1ee   : > { %v4967_v34 = vadd.f32 %v4966_v39, %v4965_v10 }
 0x1ef   : > { %v5501_v38 = vpop.f32.mrf.mxu1 }
 0x1f1   : > { %v2598_v3 = vpop.f32.mrf.mxu1  ;;  %v4968_v13 = vpop.f32.mrf.mxu0 }
 0x1f2   : > { %v2599_v44 = vadd.f32 %v4967_v34, %v2598_v3 }
 0x1f3   : > { %v4969_v48 = vpop.f32.mrf.mxu0 }
 0x1f4   : > { %v8078_v51 = vadd.f32 %v2599_v44, %v2241_v52  ;;  %v4970_v49 = vadd.f32 %v4969_v48, %v4968_v13 }
 0x1f6   : > { %v2604_v16 = vadd.f32 %v5501_v38, %v4970_v49  ;;  %v4971_v54 = vpop.f32.mrf.mxu0 }
 0x1f8   : > { %v8080_v5 = vadd.f32 %v2604_v16, %v2242_v36  ;;  %v4972_v37 = vpop.f32.mrf.mxu0 }
 0x1f9   : > { %v4973_v61 = vadd.f32 %v4972_v37, %v4971_v54 }
 0x1fa   : > { %v5504_v25 = vpop.f32.mrf.mxu1 }
 0x1fc   : > { %v2608_v2 = vpop.f32.mrf.mxu1  ;;  %v4974_v40 = vpop.f32.mrf.mxu0 }
 0x1fd   : > { %v2609_v63 = vadd.f32 %v4973_v61, %v2608_v2 }
 0x1fe   : > { %v4975_v26 = vpop.f32.mrf.mxu0 }
 0x1ff   : > { %v8082_v1 = vadd.f32 %v2609_v63, %v2243_v57  ;;  %v4976_v60 = vadd.f32 %v4975_v26, %v4974_v40 }
 0x201   : > { %8279 = vst [vmem:[#allocation9_spill] sm:$0xff] %v8082_v1  ;;  %v2614_v31 = vadd.f32 %v5504_v25, %v4976_v60  ;;  %v5033_v47 = vpop.f32.mrf.mxu0 }
 0x203   : > { %v8084_v52 = vadd.f32 %v2614_v31, %v2244_v46  ;;  %v5034_v6 = vpop.f32.mrf.mxu0 }
 0x204   : > { %v5539_v46 = vpop.f32.mrf.mxu1  ;;  %v5035_v49 = vadd.f32 %v5034_v6, %v5033_v47 }
 0x205   : > { %8280 = vst [vmem:[#allocation10_spill] sm:$0xff] %v8084_v52 }
 0x206   : > { %v2957_v12 = vpop.f32.mrf.mxu1 }
 0x207   : > { %v5036_v27 = vpop.f32.mrf.mxu0  ;;  %v2958_v25 = vadd.f32 %v5035_v49, %v2957_v12 }
 0x209   : > { %v5037_v17 = vpop.f32.mrf.mxu0  ;;  %v2996_v6 = vadd.f32 %v2958_v25, %v8070_v35 }
 0x20a   : > { %v5038_v2 = vadd.f32 %v5037_v17, %v5036_v27 }
 0x20c   : > { %v5039_v55 = vpop.f32.mrf.mxu0 }
 0x20e   : > { %v5040_v36 = vpop.f32.mrf.mxu0 }
 0x20f   : > { %v5041_v31 = vadd.f32 %v5040_v36, %v5039_v55 }
 0x210   : > { %v8106_v28 = vpop.f32.mrf.mxu1 }
 0x212   : > { %v8086_v11 = vpop.f32.mrf.mxu0  ;;  %v2967_v42 = vpop.f32.mrf.mxu1 }
 0x213   : > { %v2968_v1 = vadd.f32 %v5041_v31, %v2967_v42 }
 0x214   : > { %v8088_v33 = vpop.f32.mrf.mxu0 }
 0x215   : > { %v2998_v42 = vadd.f32 %v2968_v1, %v8074_v62 }
 0x217   : > { %v8090_v0 = vpop.f32.mrf.mxu0 }
 0x219   : > { %v8092_v24 = vpop.f32.mrf.mxu0 }
 0x21b   : > { %v8108_v4 = vpop.f32.mrf.mxu1 }
 0x21d   : > { %v8094_v32 = vpop.f32.mrf.mxu0  ;;  %v8110_v22 = vpop.f32.mrf.mxu1 }
 0x21f   : > { %v8096_v57 = vpop.f32.mrf.mxu0 }
 0x220   : > { %v5050_v1 = vadd.f32 %v8096_v57, %v8094_v32 }
 0x222   : > { %v8098_v41 = vpop.f32.mrf.mxu0  ;;  %v2983_v32 = vadd.f32 %v8108_v4, %v5050_v1 }
 0x224   : > { %v8100_v8 = vpop.f32.mrf.mxu0 }
 0x225   : > { %v5053_v57 = vadd.f32 %v8100_v8, %v8098_v41  ;;  %v3001_v41 = vadd.f32 %v2983_v32, %v8080_v5 }
 0x226   : > { %v8112_v7 = vpop.f32.mrf.mxu1 }
 0x227   : > { %8281 = vst [vmem:[#allocation11_spill] sm:$0xff] %v8112_v7  ;;  %v2963_v7 = vadd.f32 %v5539_v46, %v5038_v2 }
 0x228   : > { %v8102_v43 = vpop.f32.mrf.mxu0  ;;  %v8114_v30 = vpop.f32.mrf.mxu1 }
 0x229   : > { %v2997_v55 = vadd.f32 %v2963_v7, %v8072_v14  ;;  %v5047_v14 = vadd.f32 %v8092_v24, %v8090_v0 }
 0x22a   : > { %v8104_v50 = vpop.f32.mrf.mxu0 }
 0x22b   : > { %v2978_v0 = vadd.f32 %v5047_v14, %v8110_v22 }
 0x22d   : > { %v5113_v56 = vpop.f32.mrf.mxu0 }
 0x22f   : > { %v5114_v21 = vpop.f32.mrf.mxu0 }
 0x230   : > { %v5583_v23 = vpop.f32.mrf.mxu1  ;;  %v5115_v37 = vadd.f32 %v5114_v21, %v5113_v56 }
 0x232   : > { %v3337_v45 = vpop.f32.mrf.mxu1 }
 0x233   : > { %v5116_v59 = vpop.f32.mrf.mxu0  ;;  %v3338_v26 = vadd.f32 %v5115_v37, %v3337_v45 }
 0x235   : > { %v5117_v9 = vpop.f32.mrf.mxu0  ;;  %v3376_v27 = vadd.f32 %v3338_v26, %v2996_v6 }
 0x236   : > { %v5118_v60 = vadd.f32 %v5117_v9, %v5116_v59 }
 0x238   : > { %v5119_v29 = vpop.f32.mrf.mxu0  ;;  %v3343_v17 = vadd.f32 %v5583_v23, %v5118_v60 }
 0x23a   : > { %v5120_v18 = vpop.f32.mrf.mxu0  ;;  %v3377_v37 = vadd.f32 %v3343_v17, %v2997_v55 }
 0x23b   : > { %v5121_v56 = vadd.f32 %v5120_v18, %v5119_v29 }
 0x23c   : > { %v5586_v10 = vpop.f32.mrf.mxu1 }
 0x23e   : > { %v5122_v19 = vpop.f32.mrf.mxu0  ;;  %v3347_v38 = vpop.f32.mrf.mxu1 }
 0x23f   : > { %v3348_v35 = vadd.f32 %v5121_v56, %v3347_v38 }
 0x240   : > { %v5123_v58 = vpop.f32.mrf.mxu0 }
 0x241   : > { %v5124_v46 = vadd.f32 %v5123_v58, %v5122_v19  ;;  %v3378_v19 = vadd.f32 %v3348_v35, %v2998_v42 }
 0x243   : > { %v5125_v20 = vpop.f32.mrf.mxu0  ;;  %v3353_v58 = vadd.f32 %v5586_v10, %v5124_v46 }
 0x245   : > { %v5126_v53 = vpop.f32.mrf.mxu0 }
 0x246   : > { %v5127_v38 = vadd.f32 %v5126_v53, %v5125_v20 }
 0x247   : > { %v8122_v13 = vpop.f32.mrf.mxu1 }
 0x249   : > { %v8116_v39 = vpop.f32.mrf.mxu0  ;;  %v8126_v48 = vpop.f32.mrf.mxu1 }
 0x24b   : > { %v8118_v34 = vpop.f32.mrf.mxu0 }
 0x24c   : > { %v5130_v53 = vadd.f32 %v8118_v34, %v8116_v39 }
 0x24e   : > { %v8120_v3 = vpop.f32.mrf.mxu0  ;;  %v3363_v34 = vadd.f32 %v8122_v13, %v5130_v53  ;;  %v5056_v13 = vadd.f32 %v8104_v50, %v8102_v43 }
 0x250   : > { %v8124_v44 = vpop.f32.mrf.mxu0  ;;  %v3381_v35 = vadd.f32 %v3363_v34, %v3001_v41 }
 0x252   : > { %v8130_v54 = vpop.f32.mrf.mxu1 }
 0x253   : > { %8282 = vst [vmem:[#allocation12_spill] sm:$0xff] %v8130_v54 }
 0x254   : > { %v8128_v16 = vpop.f32.mrf.mxu0  ;;  %v8134_v40 = vpop.f32.mrf.mxu1 }
 0x256   : > { %v8132_v61 = vpop.f32.mrf.mxu0 }
 0x257   : > { %8283 = vst [vmem:[#allocation13_spill] sm:$0xff] %v8132_v61  ;;  %v5044_v61 = vadd.f32 %v8088_v33, %v8086_v11 }
 0x259   : > { %v5193_v63 = vpop.f32.mrf.mxu0  ;;  %v2973_v11 = vadd.f32 %v8106_v28, %v5044_v61 }
 0x25b   : > { %v5194_v52 = vpop.f32.mrf.mxu0  ;;  %v2999_v62 = vadd.f32 %v2973_v11, %v8076_v15  ;;  %v8285_v11 = vld [vmem:[#allocation9_spill] sm:$0xff] }
 0x25c   : > { %v5627_v47 = vpop.f32.mrf.mxu1  ;;  %v5195_v54 = vadd.f32 %v5194_v52, %v5193_v63 }
 0x25d   : > { %v5196_v21 = vpop.f32.mrf.mxu0  ;;  %v3379_v20 = vadd.f32 %v3353_v58, %v2999_v62  ;;  %v8287_v58 = vld [vmem:[#allocation12_spill] sm:$0xff] }
 0x25e   : > { %v3717_v12 = vpop.f32.mrf.mxu1 }
 0x25f   : > { %v3718_v49 = vadd.f32 %v5195_v54, %v3717_v12  ;;  %v5197_v45 = vpop.f32.mrf.mxu0  ;;  %v3000_v12 = vadd.f32 %v2978_v0, %v8078_v51  ;;  %v2988_v51 = vadd.f32 %v5053_v57, %v8114_v30 }
 0x260   : > { %v5630_v59 = vpop.f32.mrf.mxu1  ;;  %v5198_v9 = vadd.f32 %v5197_v45, %v5196_v21 }
 0x261   : > { %v3756_v36 = vadd.f32 %v3718_v49, %v3376_v27  ;;  %v5199_v52 = vpop.f32.mrf.mxu0 }
 0x262   : > { %v3723_v29 = vadd.f32 %v5627_v47, %v5198_v9  ;;  %v3727_v18 = vpop.f32.mrf.mxu1  ;;  %v3358_v47 = vadd.f32 %v5127_v38, %v8126_v48  ;;  %v5133_v48 = vadd.f32 %v8124_v44, %v8120_v3 }
 0x263   : > { %3780 = vst [vmem:[%s8144_s13] sm:$0xff] %v3756_v36  ;;  %v5200_v33 = vpop.f32.mrf.mxu0  ;;  %v3801_v25 = vmul.f32 %v3756_v36, %v3756_v36 }
 0x264   : > { %v3757_v7 = vadd.f32 %v3723_v29, %v3377_v37  ;;  %v5201_v23 = vadd.f32 %v5200_v33, %v5199_v52  ;;  %v5633_v61 = vpop.f32.mrf.mxu1  ;;  %v3380_v45 = vadd.f32 %v3358_v47, %v3000_v12  ;;  %v3368_v46 = vadd.f32 %v5133_v48, %v8134_v40  ;;  %v8284_v37 = vld [vmem:[#allocation13_spill] sm:$0xff] }
 0x265   : > { %v5202_v54 = vpop.f32.mrf.mxu0  ;;  %v5136_v29 = vadd.f32 %v8284_v37, %v8128_v16  ;;  %v3002_v33 = vadd.f32 %v2988_v51, %v8285_v11 }
 0x266   : > { %3781 = vst [vmem:[%s8144_s13 + $0x8] sm:$0xff] %v3757_v7  ;;  %v3802_v2 = vmul.f32 %v3757_v7, %v3757_v7  ;;  %v3728_v63 = vadd.f32 %v5201_v23, %v3727_v18  ;;  %v3788_v26 = vadd.f32 %v3757_v7, %v3756_v36  ;;  %v3737_v21 = vpop.f32.mrf.mxu1  ;;  %v8286_v18 = vld [vmem:[#allocation11_spill] sm:$0xff] }
 0x267   : > { %v5203_v28 = vpop.f32.mrf.mxu0  ;;  %v2993_v14 = vadd.f32 %v8286_v18, %v5056_v13  ;;  %v3373_v38 = vadd.f32 %v8287_v58, %v5136_v29 }
 0x268   : > { %v3758_v24 = vadd.f32 %v3728_v63, %v3378_v19  ;;  %v3809_v60 = vadd.f32 %v3802_v2, %v3801_v25  ;;  %v5204_v10 = vadd.f32 %v5203_v28, %v5202_v54  ;;  %v5636_v36 = vpop.f32.mrf.mxu1  ;;  %v3382_v19 = vadd.f32 %v3368_v46, %v3002_v33 }
 0x269   : > { %v5205_v31 = vpop.f32.mrf.mxu0 }
 0x26a   : > { %3782 = vst [vmem:[%s8144_s13 + $0x10] sm:$0xff] %v3758_v24  ;;  %v3789_v15 = vadd.f32 %v3788_v26, %v3758_v24  ;;  %v3803_v6 = vmul.f32 %v3758_v24, %v3758_v24  ;;  %v3733_v56 = vadd.f32 %v5630_v59, %v5204_v10  ;;  %v3747_v50 = vpop.f32.mrf.mxu1  ;;  %v8288_v26 = vld [vmem:[#allocation10_spill] sm:$0xff] }
 0x26b   : > { %v5206_v22 = vpop.f32.mrf.mxu0  ;;  %v3003_v62 = vadd.f32 %v2993_v14, %v8288_v26 }
 0x26c   : > { %v3810_v27 = vadd.f32 %v3809_v60, %v3803_v6  ;;  %v3759_v17 = vadd.f32 %v3733_v56, %v3379_v20  ;;  %v5207_v39 = vadd.f32 %v5206_v22, %v5205_v31 }
 0x26d   : > { %v5208_v49 = vpop.f32.mrf.mxu0  ;;  %v3383_v0 = vadd.f32 %v3373_v38, %v3003_v62 }
 0x26e   : > { %3783 = vst [vmem:[%s8144_s13 + $0x18] sm:$0xff] %v3759_v17  ;;  %v3804_v4 = vmul.f32 %v3759_v17, %v3759_v17  ;;  %v3738_v59 = vadd.f32 %v5207_v39, %v3737_v21  ;;  %v3790_v55 = vadd.f32 %v3789_v15, %v3759_v17 }
 0x26f   : > { %v5209_v8 = vpop.f32.mrf.mxu0 }
 0x270   : > { %v3760_v9 = vadd.f32 %v3738_v59, %v3380_v45  ;;  %v3811_v3 = vadd.f32 %v3810_v27, %v3804_v4  ;;  %v5210_v44 = vadd.f32 %v5209_v8, %v5208_v49 }
 0x271   : > { %v5211_v52 = vpop.f32.mrf.mxu0 }
 0x272   : > { %3784 = vst [vmem:[%s8144_s13 + $0x20] sm:$0xff] %v3760_v9  ;;  %v3791_v5 = vadd.f32 %v3790_v55, %v3760_v9  ;;  %v3805_v30 = vmul.f32 %v3760_v9, %v3760_v9  ;;  %v3743_v42 = vadd.f32 %v5633_v61, %v5210_v44 }
 0x273   : > { %v5212_v43 = vpop.f32.mrf.mxu0 }
 0x274   : > { %v3812_v7 = vadd.f32 %v3811_v3, %v3805_v30  ;;  %v3761_v23 = vadd.f32 %v3743_v42, %v3381_v35  ;;  %v5213_v40 = vadd.f32 %v5212_v43, %v5211_v52 }
 0x275   : > { %v5214_v16 = vpop.f32.mrf.mxu0 }
 0x276   : > { %3785 = vst [vmem:[%s8144_s13 + $0x28] sm:$0xff] %v3761_v23  ;;  %v3806_v54 = vmul.f32 %v3761_v23, %v3761_v23  ;;  %v3748_v25 = vadd.f32 %v5213_v40, %v3747_v50  ;;  %v3792_v2 = vadd.f32 %v3791_v5, %v3761_v23 }
 0x277   : > { %v5215_v63 = vpop.f32.mrf.mxu0 }
 0x278   : > { %v3762_v1 = vadd.f32 %v3748_v25, %v3382_v19  ;;  %v3813_v28 = vadd.f32 %v3812_v7, %v3806_v54  ;;  %v5216_v61 = vadd.f32 %v5215_v63, %v5214_v16 }
 0x27a   : > { %3786 = vst [vmem:[%s8144_s13 + $0x30] sm:$0xff] %v3762_v1  ;;  %v3793_v24 = vadd.f32 %v3792_v2, %v3762_v1  ;;  %v3807_v60 = vmul.f32 %v3762_v1, %v3762_v1  ;;  %v3753_v10 = vadd.f32 %v5636_v36, %v5216_v61 }
 0x27c   : > { %v3814_v20 = vadd.f32 %v3813_v28, %v3807_v60  ;;  %v3763_v53 = vadd.f32 %v3753_v10, %v3383_v0 }
 0x27e   : > { %3787 = vst [vmem:[%s8144_s13 + $0x38] sm:$0xff] %v3763_v53  ;;  %v3794_v31 = vadd.f32 %v3793_v24, %v3763_v53  ;;  %v3808_v47 = vmul.f32 %v3763_v53, %v3763_v53 }
 0x27f   : > { %5732 = shalt.err (!%p5729_p10)
}
 0x280   : > { %s5733_s13 = scalar_lea.hbm %s8188_s30, 1024  ;;  %s5737_s17 = scalar_lea.hbm %s8273_s4, 16384 }
 0x281   : > { %p5734_p11 = scmp.ne.s32.totalorder %s8188_s30, %s5733_s13  ;;  %p5738_p0 = scmp.lt.s32.totalorder %s8188_s30, %s8273_s4 }
 0x282   : > { %p5739_p1 = scmp.lt.s32.totalorder %s5737_s17, %s5733_s13 }
 0x283   : > { %p5735_p12 = pnand %p5734_p11, %p5928_p3 }
 0x284   : > { %p5740_p2 = por %p5739_p1, %p5738_p0 }
 0x285   : > { %p5736_p13 = pneg %p5735_p12 }
 0x287   : > { %p5741_p4 = pnand %p5740_p2, %p5736_p13 }
 0x289   : > { %5744 = shalt.err (!%p5741_p4)
}
 0x28a   : > { %s5844_s16 = smov 128   ;;  %s5845_s9 = smov 8   ;;  %v3795_v15 = vrot.slane %v3794_v31, 4  ;;  %v3815_v6 = vadd.f32 %v3814_v20, %v3808_v47  ;;  %vm3822_vm2 = vcmask 1040384  }
 0x28b   : > { %s8289_s12 = scalar_lea.sflag [#allocation4], %s8137_s10  ;;  %s4028_s14 = sshll.u32 %s8137_s10, 1 }
 0x28c   : > { %5641 = dma.vmem_to_hbm [thread:$0]  (%p5928_p3), %s8190_s8, 1024, %s8188_s30, %s8289_s12, %s5844_s16, %s5844_s16, %s5845_s9   ;;  %v3796_v56 = vadd.f32 %v3795_v15, %v3794_v31  ;;  %v3816_v32 = vrot.slane %v3815_v6, 4 }
 0x28d   : > { %s4517_s13 = sshll.u32 %s5829_s22, 3  ;;  %s314_s17 = scalar_lea.vmem [#allocation5], %s4028_s14 }
 0x28e   : > { %v3797_v57 = vrot.slane %v3796_v56, 2  ;;  %v3817_v22 = vadd.f32 %v3816_v32, %v3815_v6  ;;  %s3860_s27 = sadd.s32 %s5825_s21, %s4517_s13  ;;  %s3864_s15 = sshll.u32 %s314_s17, 4  ;;  %s3865_s15 = int_to_ptr.vmem [resolvable:$true] %s3864_s15 }
 0x28f   : > { %s4518_s26 = sshll.u32 %s3860_s27, 5  ;;  %s3831_s22 = scalar_lea.sflag [#allocation6], %s8137_s10 }
 0x290   : > { %v3798_v21 = vadd.f32 %v3797_v57, %v3796_v56  ;;  %v3818_v12 = vrot.slane %v3817_v22, 2  ;;  %s8222_s16 = scalar_lea.hbm %s8274_s5, %s4518_s26  ;;  %s5745_s21 = scalar_lea.vmem %s3865_s15, 32 }
 0x291   : > { %p5746_p5 = scmp.ne.s32.totalorder %s3865_s15, %s5745_s21  ;;  %s5846_s9 = smov [#allocation5]  }
 0x292   : > { %v3799_v27 = vrot.slane %v3798_v21, 1  ;;  %v3819_v17 = vadd.f32 %v3818_v12, %v3817_v22  ;;  %s5749_s12 = sshll.u32 %s5846_s9, 4  ;;  %s5750_s12 = int_to_ptr.vmem [resolvable:$false] %s5749_s12 }
 0x293   : > { %p5747_p6 = pnand %p5746_p5, %p5928_p3  ;;  %s5751_s14 = scalar_lea.vmem %s5750_s12, 64 }
 0x294   : > { %v3820_v39 = vrot.slane %v3819_v17, 1  ;;  %v3800_v34 = vadd.f32 %v3799_v27, %v3798_v21  ;;  %p5752_p9 = scmp.lt.s32.totalorder %s3865_s15, %s5750_s12  ;;  %p5753_p10 = scmp.lt.s32.totalorder %s5751_s14, %s5745_s21 }
 0x295   : > { %p5748_p7 = pneg %p5747_p6 }
 0x296   : > { %v3821_v48 = vadd.f32 %v3820_v39, %v3819_v17  ;;  %p5754_p11 = por %p5753_p10, %p5752_p9 }
 0x298   : > { %v3823_v49 = vsel %vm3822_vm2, %v3800_v34, %v3821_v48  ;;  %p5755_p12 = pnand %p5754_p11, %p5748_p7 }
 0x299   : > { %3824 = vst [vmem:[%s314_s17] sm:$0x3] %v3823_v49 }
 0x29a   : > { %5758 = shalt.err (!%p5755_p12)
}
 0x29b   : > { %s5759_s13 = scalar_lea.hbm %s8222_s16, 32  ;;  %s5763_s26 = scalar_lea.hbm %s8274_s5, 512 }
 0x29c   : > { %p5760_p13 = scmp.ne.s32.totalorder %s8222_s16, %s5759_s13  ;;  %p5764_p2 = scmp.lt.s32.totalorder %s8222_s16, %s8274_s5 }
 0x29d   : > { %p5765_p4 = scmp.lt.s32.totalorder %s5763_s26, %s5759_s13 }
 0x29e   : > { %p5761_p0 = pnand %p5760_p13, %p5928_p3 }
 0x29f   : > { %p5766_p5 = por %p5765_p4, %p5764_p2 }
 0x2a0   : > { %p5762_p1 = pneg %p5761_p0 }
 0x2a2   : > { %p5767_p6 = pnand %p5766_p5, %p5762_p1 }
 0x2a4   : > { %5770 = shalt.err (!%p5767_p6)
}
 0x2a5   : > { %5642 = dma.vmem_to_hbm [thread:$0]  (%p5928_p3), %s3865_s15, 32, %s8222_s16, %s3831_s22  }
 0x2a6 PF: > { %p5652_p7 = scmp.ge.s32.totalorder %s5841_s25, 2  ;;  %s3876_s30 = sand.u32 1, %s5813_s18  }
 0x2a7   : > { %s3877_s21 = scalar_lea.sflag [#allocation4], %s3876_s30 }
 0x2a8   : > { %p5646_p9 = pnand %p5652_p7, %p5937_p8 }
 0x2aa   : > { %p5647_p10 = pneg %p5646_p9 }
 0x2ac   : > { %5804 = dma.done.wait (%p5647_p10), %s3877_s21, 1024  }
 0x2ad   : > { %5806 = vsyncadd (%p5647_p10), %s3877_s21, 4294966272  ;;  %s3886_s9 = scalar_lea.sflag [#allocation6], %s3876_s30 }
 0x2ae   : > { %5808 = dma.done.wait (%p5647_p10), %s3886_s9, 32  }
 0x2af   : > { %5810 = vsyncadd (%p5647_p10), %s3886_s9, 4294967264  ;;  %s22_s25 = sadd.s32 1, %s5841_s25   ;;  %s8290_s18 = smov %s5817_s19 }
 0x2b0   : > { %p19_p11 = scmp.ge.s32.totalorder %s22_s25, 18   ;;  %s8291_s19 = smov %s5821_s20 }
 0x2b1   : > { %s8292_s20 = smov %s5946_s11  ;;  %s8293_s21 = smov %s5833_s23 }
 0x2b2   : > { %s8294_s22 = smov %s5837_s24  ;;  %s8295_s23 = smov %s8298_s28 }
 0x2b3   : > { %s8296_s24 = smov %s8302_s29  ;;  %21 = sbr.rel (!%p19_p11) target bundleno = 7 (0x7), region = 108 }
 0x2b8   :  { %3891 = vsyncpa [#allocation4], 1 }
 0x2b9   :  { %3893 = vsyncpa [#allocation4 + $0x1], 1 }
 0x2ba   :  { %3894 = vsyncpa [#allocation6], 1 }
 0x2bb   :  { %3896 = vsyncpa [#allocation6 + $0x1], 1 }

</bundles_post_ra>
